<compile_context>
chip_gen: v7x
topology: tpu7x:2x2x1
jax: 0.10.0
libtpu: 0.0.40
codegen_flags: <defaults>
</compile_context>

<pallas_src>
import functools

import jax
import jax.numpy as jnp
from jax.experimental import pallas as pl
from jax.experimental.pallas import tpu as pltpu

# ---- small synthetic config (stand-in for bart-large-cnn: 1024/4096/16/12) ----
VOCAB = 1024
D_MODEL = 128
FFN = 512
HEADS = 4
HEAD_DIM = D_MODEL // HEADS
ENC_LAYERS = 2
DEC_LAYERS = 2
MAX_POS = 64
LN_EPS = 1e-5
NEG_INF = -1e9

# Tile targets (production values per the perf review would be 256/512/512;
# TK_TARGET=256 here so the K-reduction / accumulator path is exercised at
# FFN=512 even at toy shapes).
TM_TARGET = 256
TN_TARGET = 512
TK_TARGET = 256


def _tile(dim, target, align):
    """Largest tile <= target that divides `dim` and respects (8,128) alignment."""
    if dim <= target:
        return dim
    t = (target // align) * align
    while t >= align:
        if dim % t == 0:
            return t
        t -= align
    return dim


def _clamp_vmem(nbytes):
    return int(min(max(nbytes, 16 << 20), 64 << 20))


# ----------------------------- Pallas kernels ------------------------------
def _mm_bias_kernel(x_ref, w_ref, b_ref, o_ref, acc_ref):
    @pl.when(pl.program_id(2) == 0)
    def _():
        acc_ref[...] = jnp.zeros_like(acc_ref)

    acc_ref[...] += jnp.dot(x_ref[...], w_ref[...],
                            preferred_element_type=jnp.float32)

    @pl.when(pl.program_id(2) == pl.num_programs(2) - 1)
    def _():
        o_ref[...] = (acc_ref[...] + b_ref[...]).astype(o_ref.dtype)


def _mm_bias_gelu_kernel(x_ref, w_ref, b_ref, o_ref, acc_ref):
    @pl.when(pl.program_id(2) == 0)
    def _():
        acc_ref[...] = jnp.zeros_like(acc_ref)

    acc_ref[...] += jnp.dot(x_ref[...], w_ref[...],
                            preferred_element_type=jnp.float32)

    @pl.when(pl.program_id(2) == pl.num_programs(2) - 1)
    def _():
        # TODO(synk): HF BART uses exact erf-GELU; tanh approximation is used
        # because lax.erf lowering on Mosaic is not guaranteed.
        y = acc_ref[...] + b_ref[...]
        c = jnp.float32(0.7978845608028654)  # sqrt(2/pi)
        o_ref[...] = (0.5 * y * (1.0 + jnp.tanh(c * (y + 0.044715 * y * y * y)))
                      ).astype(o_ref.dtype)


def _mm_bias_res_ln_kernel(x_ref, w_ref, b_ref, r_ref, g_ref, be_ref, o_ref, acc_ref):
    # Fused: out = LayerNorm(residual + x @ w + b) * gamma + beta  (post-LN BART)
    @pl.when(pl.program_id(1) == 0)
    def _():
        acc_ref[...] = jnp.zeros_like(acc_ref)

    acc_ref[...] += jnp.dot(x_ref[...], w_ref[...],
                            preferred_element_type=jnp.float32)

    @pl.when(pl.program_id(1) == pl.num_programs(1) - 1)
    def _():
        y = acc_ref[...] + b_ref[...] + r_ref[...].astype(jnp.float32)
        mu = jnp.mean(y, axis=-1, keepdims=True)
        var = jnp.mean((y - mu) ** 2, axis=-1, keepdims=True)
        o_ref[...] = ((y - mu) * jax.lax.rsqrt(var + LN_EPS) * g_ref[...]
                      + be_ref[...]).astype(o_ref.dtype)


def _mm_wt_kernel(x_ref, w_ref, o_ref, acc_ref):
    # weight stored (N, K) (= tied (V, D) embedding); contract along K directly.
    @pl.when(pl.program_id(2) == 0)
    def _():
        acc_ref[...] = jnp.zeros_like(acc_ref)

    acc_ref[...] += jax.lax.dot_general(
        x_ref[...], w_ref[...], (((1,), (1,)), ((), ())),
        preferred_element_type=jnp.float32)

    @pl.when(pl.program_id(2) == pl.num_programs(2) - 1)
    def _():
        o_ref[...] = acc_ref[...].astype(o_ref.dtype)


def _ln_kernel(x_ref, g_ref, b_ref, o_ref):
    x = x_ref[...].astype(jnp.float32)
    mu = jnp.mean(x, axis=-1, keepdims=True)
    var = jnp.mean((x - mu) ** 2, axis=-1, keepdims=True)
    o_ref[...] = ((x - mu) * jax.lax.rsqrt(var + LN_EPS) * g_ref[...]
                  + b_ref[...]).astype(o_ref.dtype)


def _mha_kernel(q_ref, k_ref, v_ref, mask_ref, o_ref, *,
                n_heads, head_dim, scale, causal):
    q = q_ref[0]                       # (Sq, H*Dh) bf16
    k = k_ref[0]                       # (Sk, H*Dh) bf16
    v = v_ref[0]                       # (Sk, H*Dh) bf16
    sq = q.shape[0]
    sk = k.shape[0]

    # Additive mask built in-kernel: no (B,H,Sq,Sk) bias is materialized in HBM.
    bias = jnp.broadcast_to((1.0 - mask_ref[0].astype(jnp.float32)) * NEG_INF,
                            (sq, sk))
    if causal:
        row = jax.lax.broadcasted_iota(jnp.int32, (sq, sk), 0)
        col = jax.lax.broadcasted_iota(jnp.int32, (sq, sk), 1)
        bias = jnp.where(col <= row, bias, NEG_INF)

    outs = []
    for h in range(n_heads):
        sl = slice(h * head_dim, (h + 1) * head_dim)
        s = jax.lax.dot_general(q[:, sl], k[:, sl], (((1,), (1,)), ((), ())),
                                preferred_element_type=jnp.float32)
        s = s * scale + bias
        m = jnp.max(s, axis=-1, keepdims=True)
        p = jnp.exp(s - m)
        p = p * pl.reciprocal(jnp.sum(p, axis=-1, keepdims=True), approx=True)
        outs.append(jnp.dot(p.astype(v.dtype), v[:, sl],
                            preferred_element_type=jnp.float32))
    # Single lane-dense store of all heads.
    o_ref[0] = jnp.concatenate(outs, axis=-1).astype(o_ref.dtype)


# ----------------------------- kernel wrappers ------------------------------
def _linear_call(kernel, x, w, b, out_dtype, transc_per_out=0):
    M, K = x.shape
    N = w.shape[1]
    tm = _tile(M, TM_TARGET, 8)
    tn = _tile(N, TN_TARGET, 128)
    tk = _tile(K, TK_TARGET, 128)
    xb, wb = x.dtype.itemsize, w.dtype.itemsize
    ob = jnp.dtype(out_dtype).itemsize
    vmem = 2 * (tm * tk * xb + tk * tn * wb + tm * tn * ob) + tm * tn * 4 + 4 * tn * 4
    return pl.pallas_call(
        kernel,
        out_shape=jax.ShapeDtypeStruct((M, N), out_dtype),
        grid_spec=pltpu.PrefetchScalarGridSpec(
            num_scalar_prefetch=0,
            grid=(M // tm, N // tn, K // tk),
            in_specs=[pl.BlockSpec((tm, tk), lambda i, j, k: (i, k)),
                      pl.BlockSpec((tk, tn), lambda i, j, k: (k, j)),
                      pl.BlockSpec((1, tn), lambda i, j, k: (0, j))],
            out_specs=pl.BlockSpec((tm, tn), lambda i, j, k: (i, j)),
            scratch_shapes=[pltpu.VMEM((tm, tn), jnp.float32)]),
        compiler_params=pltpu.CompilerParams(
            dimension_semantics=("parallel", "parallel", "arbitrary"),
            vmem_limit_bytes=_clamp_vmem(vmem)),
        cost_estimate=pl.CostEstimate(
            flops=2 * M * N * K,
            transcendentals=transc_per_out * M * N,
            bytes_accessed=M * K * xb + K * N * wb + M * N * ob),
    )(x, w, b.reshape(1, N).astype(jnp.float32))


def linear_bias(x, w, b, out_dtype=None):
    return _linear_call(_mm_bias_kernel, x, w, b, out_dtype or x.dtype)


def linear_gelu(x, w, b):
    return _linear_call(_mm_bias_gelu_kernel, x, w, b, x.dtype, transc_per_out=1)


def linear_res_ln(x, w, b, res, g, beta):
    # Fused projection + bias + residual + LayerNorm.  The LN row reduction needs
    # the full output feature dim, so tn == N here (N = d_model, small).
    M, K = x.shape
    N = w.shape[1]
    tm = _tile(M, TM_TARGET, 8)
    tk = _tile(K, TK_TARGET, 128)
    xb, wb, ob = x.dtype.itemsize, w.dtype.itemsize, x.dtype.itemsize
    vmem = (2 * (tm * tk * xb + tk * N * wb + tm * N * xb + tm * N * ob)
            + tm * N * 4 + 6 * N * 4)
    return pl.pallas_call(
        _mm_bias_res_ln_kernel,
        out_shape=jax.ShapeDtypeStruct((M, N), x.dtype),
        grid_spec=pltpu.PrefetchScalarGridSpec(
            num_scalar_prefetch=0,
            grid=(M // tm, K // tk),
            in_specs=[pl.BlockSpec((tm, tk), lambda i, k: (i, k)),
                      pl.BlockSpec((tk, N), lambda i, k: (k, 0)),
                      pl.BlockSpec((1, N), lambda i, k: (0, 0)),
                      pl.BlockSpec((tm, N), lambda i, k: (i, 0)),
                      pl.BlockSpec((1, N), lambda i, k: (0, 0)),
                      pl.BlockSpec((1, N), lambda i, k: (0, 0))],
            out_specs=pl.BlockSpec((tm, N), lambda i, k: (i, 0)),
            scratch_shapes=[pltpu.VMEM((tm, N), jnp.float32)]),
        compiler_params=pltpu.CompilerParams(
            dimension_semantics=("parallel", "arbitrary"),
            vmem_limit_bytes=_clamp_vmem(vmem)),
        cost_estimate=pl.CostEstimate(
            flops=2 * M * N * K + 10 * M * N,
            transcendentals=M,
            bytes_accessed=M * K * xb + K * N * wb + 2 * M * N * ob),
    )(x, w, b.reshape(1, N).astype(jnp.float32), res,
      g.reshape(1, N).astype(jnp.float32), beta.reshape(1, N).astype(jnp.float32))


def lm_head_matmul(x, emb):
    # emb: (V, D) tied embedding — contracted along D directly (no .T materialization).
    M, K = x.shape
    V = emb.shape[0]
    tm = _tile(M, TM_TARGET, 8)
    tn = _tile(V, TN_TARGET, 128)
    tk = _tile(K, TK_TARGET, 128)
    xb, wb, ob = x.dtype.itemsize, emb.dtype.itemsize, 4
    vmem = 2 * (tm * tk * xb + tn * tk * wb + tm * tn * ob) + tm * tn * 4
    return pl.pallas_call(
        _mm_wt_kernel,
        out_shape=jax.ShapeDtypeStruct((M, V), jnp.float32),
        grid_spec=pltpu.PrefetchScalarGridSpec(
            num_scalar_prefetch=0,
            grid=(M // tm, V // tn, K // tk),
            in_specs=[pl.BlockSpec((tm, tk), lambda i, j, k: (i, k)),
                      pl.BlockSpec((tn, tk), lambda i, j, k: (j, k))],
            out_specs=pl.BlockSpec((tm, tn), lambda i, j, k: (i, j)),
            scratch_shapes=[pltpu.VMEM((tm, tn), jnp.float32)]),
        compiler_params=pltpu.CompilerParams(
            dimension_semantics=("parallel", "parallel", "arbitrary"),
            vmem_limit_bytes=_clamp_vmem(vmem)),
        cost_estimate=pl.CostEstimate(
            flops=2 * M * V * K, transcendentals=0,
            bytes_accessed=M * K * xb + V * K * wb + M * V * ob),
    )(x, emb)


def layer_norm(x2d, g, b):
    M, D = x2d.shape
    tm = _tile(M, TM_TARGET, 8)
    return pl.pallas_call(
        _ln_kernel,
        out_shape=jax.ShapeDtypeStruct((M, D), x2d.dtype),
        grid=(M // tm,),
        in_specs=[pl.BlockSpec((tm, D), lambda i: (i, 0)),
                  pl.BlockSpec((1, D), lambda i: (0, 0)),
                  pl.BlockSpec((1, D), lambda i: (0, 0))],
        out_specs=pl.BlockSpec((tm, D), lambda i: (i, 0)),
        compiler_params=pltpu.CompilerParams(dimension_semantics=("parallel",)),
    )(x2d, g.reshape(1, D), b.reshape(1, D))


def mha(q, k, v, mask, causal):
    # q, k, v: (B, S, H*Dh) lane-dense layout; mask: (B, 1, Sk) float (1 = keep).
    B, Sq, D = q.shape
    Sk = k.shape[1]
    kern = functools.partial(_mha_kernel, n_heads=HEADS, head_dim=HEAD_DIM,
                             scale=1.0 / (HEAD_DIM ** 0.5), causal=causal)
    return pl.pallas_call(
        kern,
        out_shape=jax.ShapeDtypeStruct((B, Sq, D), q.dtype),
        grid=(B,),
        in_specs=[pl.BlockSpec((1, Sq, D), lambda b: (b, 0, 0)),
                  pl.BlockSpec((1, Sk, D), lambda b: (b, 0, 0)),
                  pl.BlockSpec((1, Sk, D), lambda b: (b, 0, 0)),
                  pl.BlockSpec((1, 1, Sk), lambda b: (b, 0, 0))],
        out_specs=pl.BlockSpec((1, Sq, D), lambda b: (b, 0, 0)),
        compiler_params=pltpu.CompilerParams(dimension_semantics=("parallel",)),
    )(q, k, v, mask)


def pointer_generator(dec_last, ctx, w, b):
    # (B, 1) output: plain JAX per perf review — a kernel launch costs more than
    # the ~2*B*D flops this computes.
    concat = jnp.concatenate([dec_last, ctx], axis=-1).astype(jnp.float32)
    return jax.nn.sigmoid(concat @ w.astype(jnp.float32).T + b)


# ------------------------------ model glue ---------------------------------
def encoder_layer(lp, x, mask):
    B, S, D = x.shape
    x2d = x.reshape(-1, D)
    qkv = linear_bias(x2d, lp["sa_qkv_w"], lp["sa_qkv_b"])          # fused Q/K/V
    q = qkv[:, :D].reshape(B, S, D)
    k = qkv[:, D:2 * D].reshape(B, S, D)
    v = qkv[:, 2 * D:].reshape(B, S, D)
    attn = mha(q, k, v, mask, causal=False)
    x2d = linear_res_ln(attn.reshape(-1, D), lp["sa_o_w"], lp["sa_o_b"],
                        x2d, lp["sa_ln_g"], lp["sa_ln_b"])          # out-proj+res+LN
    h = linear_gelu(x2d, lp["fc1_w"], lp["fc1_b"])                  # fc1+bias+GELU
    x2d = linear_res_ln(h, lp["fc2_w"], lp["fc2_b"],
                        x2d, lp["fin_ln_g"], lp["fin_ln_b"])        # fc2+res+LN
    return x2d.reshape(B, S, D)


def decoder_layer(lp, x, enc, self_mask, cross_mask):
    B, S, D = x.shape
    Se = enc.shape[1]
    x2d = x.reshape(-1, D)
    # causal self-attention
    qkv = linear_bias(x2d, lp["sa_qkv_w"], lp["sa_qkv_b"])
    q = qkv[:, :D].reshape(B, S, D)
    k = qkv[:, D:2 * D].reshape(B, S, D)
    v = qkv[:, 2 * D:].reshape(B, S, D)
    attn = mha(q, k, v, self_mask, causal=True)
    x2d = linear_res_ln(attn.reshape(-1, D), lp["sa_o_w"], lp["sa_o_b"],
                        x2d, lp["sa_ln_g"], lp["sa_ln_b"])
    # cross-attention (fused K/V projection of encoder states)
    qc = linear_bias(x2d, lp["ca_q_w"], lp["ca_q_b"]).reshape(B, S, D)
    kv = linear_bias(enc.reshape(-1, D), lp["ca_kv_w"], lp["ca_kv_b"])
    kc = kv[:, :D].reshape(B, Se, D)
    vc = kv[:, D:].reshape(B, Se, D)
    attn = mha(qc, kc, vc, cross_mask, causal=False)
    x2d = linear_res_ln(attn.reshape(-1, D), lp["ca_o_w"], lp["ca_o_b"],
                        x2d, lp["ca_ln_g"], lp["ca_ln_b"])
    # FFN
    h = linear_gelu(x2d, lp["fc1_w"], lp["fc1_b"])
    x2d = linear_res_ln(h, lp["fc2_w"], lp["fc2_b"],
                        x2d, lp["fin_ln_g"], lp["fin_ln_b"])
    return x2d.reshape(B, S, D)


def encode(params, input_ids, attention_mask):
    B, S = input_ids.shape
    # TODO(synk): token/position embedding gather stays in plain JAX (no clean Pallas gather).
    x = params["embed_tokens"][input_ids] + params["embed_pos"][jnp.arange(S) + 2]
    x = layer_norm(x.reshape(-1, D_MODEL),
                   params["enc_ln_emb_g"], params["enc_ln_emb_b"]).reshape(B, S, D_MODEL)
    mask = attention_mask.astype(jnp.float32).reshape(B, 1, S)
    for lp in params["enc_layers"]:
        x = encoder_layer(lp, x, mask)
    return x


def decode(params, decoder_input_ids, encoder_hidden, encoder_attention_mask):
    B, S = decoder_input_ids.shape
    Se = encoder_hidden.shape[1]
    x = params["embed_tokens"][decoder_input_ids] + params["embed_pos"][jnp.arange(S) + 2]
    x = layer_norm(x.reshape(-1, D_MODEL),
                   params["dec_ln_emb_g"], params["dec_ln_emb_b"]).reshape(B, S, D_MODEL)
    self_mask = jnp.ones((B, 1, S), jnp.float32)     # decoder: causal only (mask in-kernel)
    cross_mask = encoder_attention_mask.astype(jnp.float32).reshape(B, 1, Se)
    for lp in params["dec_layers"]:
        x = decoder_layer(lp, x, encoder_hidden, self_mask, cross_mask)
    return x


def bart_with_pointer_generator(params, input_ids, attention_mask, decoder_input_ids):
    enc = encode(params, input_ids, attention_mask)                    # (B, Se, D)
    dec = decode(params, decoder_input_ids, enc, attention_mask)       # (B, Sd, D)
    B, Sd, D = dec.shape
    # tied lm_head (no final_logits_bias: the module calls lm_head directly)
    logits = lm_head_matmul(dec.reshape(-1, D),
                            params["embed_tokens"]).reshape(B, Sd, VOCAB)
    p_gen = pointer_generator(dec[:, -1, :], enc[:, 0, :],
                              params["pointer_w"], params["pointer_b"])  # (B, 1)
    return logits, p_gen


# ------------------------------ parameters ---------------------------------
def init_params(key):
    keys = iter(jax.random.split(key, 64))

    def nrm(shape):
        return (0.02 * jax.random.normal(next(keys), shape, jnp.float32)).astype(jnp.bfloat16)

    def zeros(n):
        return jnp.zeros((n,), jnp.float32)

    def ones(n):
        return jnp.ones((n,), jnp.float32)

    def enc_layer():
        return dict(
            sa_qkv_w=nrm((D_MODEL, 3 * D_MODEL)), sa_qkv_b=zeros(3 * D_MODEL),
            sa_o_w=nrm((D_MODEL, D_MODEL)), sa_o_b=zeros(D_MODEL),
            sa_ln_g=ones(D_MODEL), sa_ln_b=zeros(D_MODEL),
            fc1_w=nrm((D_MODEL, FFN)), fc1_b=zeros(FFN),
            fc2_w=nrm((FFN, D_MODEL)), fc2_b=zeros(D_MODEL),
            fin_ln_g=ones(D_MODEL), fin_ln_b=zeros(D_MODEL))

    def dec_layer():
        d = enc_layer()
        d.update(
            ca_q_w=nrm((D_MODEL, D_MODEL)), ca_q_b=zeros(D_MODEL),
            ca_kv_w=nrm((D_MODEL, 2 * D_MODEL)), ca_kv_b=zeros(2 * D_MODEL),
            ca_o_w=nrm((D_MODEL, D_MODEL)), ca_o_b=zeros(D_MODEL),
            ca_ln_g=ones(D_MODEL), ca_ln_b=zeros(D_MODEL))
        return d

    return dict(
        embed_tokens=nrm((VOCAB, D_MODEL)),
        embed_pos=nrm((MAX_POS + 2, D_MODEL)),    # learned positions, +2 offset
        enc_ln_emb_g=ones(D_MODEL), enc_ln_emb_b=zeros(D_MODEL),
        dec_ln_emb_g=ones(D_MODEL), dec_ln_emb_b=zeros(D_MODEL),
        enc_layers=[enc_layer() for _ in range(ENC_LAYERS)],
        dec_layers=[dec_layer() for _ in range(DEC_LAYERS)],
        pointer_w=0.02 * jax.random.normal(next(keys), (1, 2 * D_MODEL), jnp.float32),
        pointer_b=jnp.zeros((1,), jnp.float32),
    )


# --------------------------------- main -------------------------------------
if __name__ == "__main__":
    key = jax.random.PRNGKey(0)
    kp, k1, k2 = jax.random.split(key, 3)

    params = init_params(kp)

    B, S_ENC, S_DEC = 2, 8, 8
    input_ids = jax.random.randint(k1, (B, S_ENC), 0, VOCAB, dtype=jnp.int32)
    decoder_input_ids = jax.random.randint(k2, (B, S_DEC), 0, VOCAB, dtype=jnp.int32)
    attention_mask = jnp.ones((B, S_ENC), dtype=jnp.int32)
    attention_mask = attention_mask.at[1, -2:].set(0)   # exercise encoder padding mask

    fwd = jax.jit(bart_with_pointer_generator)
    logits, p_gen = fwd(params, input_ids, attention_mask, decoder_input_ids)
    jax.block_until_ready((logits, p_gen))

    assert logits.shape == (B, S_DEC, VOCAB)
    assert p_gen.shape == (B, 1)
    assert bool(jnp.all(jnp.isfinite(logits)))
    assert bool(jnp.all((p_gen > 0.0) & (p_gen < 1.0)))
    print("KERNEL_OK")
</pallas_src>

<mosaic_0001>
module attributes {stable_mosaic.version = 11 : i64} {
  func.func @_ln_kernel(%arg0: i32, %arg1: memref<16x128xbf16, #tpu.memory_space<vmem>>, %arg2: memref<1x128xf32, #tpu.memory_space<vmem>>, %arg3: memref<1x128xf32, #tpu.memory_space<vmem>>, %arg4: memref<16x128xbf16, #tpu.memory_space<vmem>>) attributes {dimension_semantics = [#tpu.dimension_semantics<parallel>], iteration_bounds = array<i64: 1>, scalar_prefetch = 0 : i64, scratch_operands = 0 : i64, tpu.core_type = #tpu.core_type<tc>, window_params = [{transform_indices = @transform_0, window_bounds = array<i64: 16, 128>}, {pipeline_mode = #tpu.pipeline_mode<synchronous>, transform_indices = @transform_1, window_bounds = array<i64: 1, 128>}, {pipeline_mode = #tpu.pipeline_mode<synchronous>, transform_indices = @transform_2, window_bounds = array<i64: 1, 128>}, {transform_indices = @transform_3, window_bounds = array<i64: 16, 128>}]} {
    %c0 = arith.constant 0 : index
    %c0_0 = arith.constant 0 : index
    %0 = vector.load %arg1[%c0, %c0_0] : memref<16x128xbf16, #tpu.memory_space<vmem>>, vector<16x128xbf16>
    %1 = arith.extf %0 : vector<16x128xbf16> to vector<16x128xf32>
    %cst = arith.constant dense<0.000000e+00> : vector<16xf32>
    %2 = vector.multi_reduction <add>, %1, %cst [1] : vector<16x128xf32> to vector<16xf32>
    %3 = vector.shape_cast %2 : vector<16xf32> to vector<16x1xf32>
    %cst_1 = arith.constant 1.280000e+02 : f32
    %4 = vector.broadcast %cst_1 : f32 to vector<16x1xf32>
    %5 = arith.divf %3, %4 : vector<16x1xf32>
    %6 = vector.broadcast %5 : vector<16x1xf32> to vector<16x128xf32>
    %7 = arith.subf %1, %6 : vector<16x128xf32>
    %8 = arith.mulf %7, %7 : vector<16x128xf32>
    %cst_2 = arith.constant dense<0.000000e+00> : vector<16xf32>
    %9 = vector.multi_reduction <add>, %8, %cst_2 [1] : vector<16x128xf32> to vector<16xf32>
    %10 = vector.shape_cast %9 : vector<16xf32> to vector<16x1xf32>
    %cst_3 = arith.constant 1.280000e+02 : f32
    %11 = vector.broadcast %cst_3 : f32 to vector<16x1xf32>
    %12 = arith.divf %10, %11 : vector<16x1xf32>
    %13 = vector.broadcast %5 : vector<16x1xf32> to vector<16x128xf32>
    %14 = arith.subf %1, %13 : vector<16x128xf32>
    %cst_4 = arith.constant 9.99999974E-6 : f32
    %15 = vector.broadcast %cst_4 : f32 to vector<16x1xf32>
    %16 = arith.addf %12, %15 : vector<16x1xf32>
    %17 = math.rsqrt %16 : vector<16x1xf32>
    %18 = vector.broadcast %17 : vector<16x1xf32> to vector<16x128xf32>
    %19 = arith.mulf %14, %18 : vector<16x128xf32>
    %c0_5 = arith.constant 0 : index
    %c0_6 = arith.constant 0 : index
    %20 = vector.load %arg2[%c0_5, %c0_6] : memref<1x128xf32, #tpu.memory_space<vmem>>, vector<1x128xf32>
    %21 = vector.broadcast %20 : vector<1x128xf32> to vector<16x128xf32>
    %22 = arith.mulf %19, %21 : vector<16x128xf32>
    %c0_7 = arith.constant 0 : index
    %c0_8 = arith.constant 0 : index
    %23 = vector.load %arg3[%c0_7, %c0_8] : memref<1x128xf32, #tpu.memory_space<vmem>>, vector<1x128xf32>
    %24 = vector.broadcast %23 : vector<1x128xf32> to vector<16x128xf32>
    %25 = arith.addf %22, %24 : vector<16x128xf32>
    %26 = arith.truncf %25 : vector<16x128xf32> to vector<16x128xbf16>
    %c0_9 = arith.constant 0 : index
    %c0_10 = arith.constant 0 : index
    %27 = vector.load %arg4[%c0_9, %c0_10] : memref<16x128xbf16, #tpu.memory_space<vmem>>, vector<16x128xbf16>
    tpu.vector_store %arg4[%c0_9, %c0_10], %26 {strides = array<i32>} : memref<16x128xbf16, #tpu.memory_space<vmem>>, vector<16x128xbf16>,
    return
  }
  func.func @transform_0(%arg0: i32) -> (i32, i32) {
    %c0_i32 = arith.constant 0 : i32
    %c0_i32_0 = arith.constant 0 : i32
    return %arg0, %c0_i32 : i32, i32
  }
  func.func @transform_1(%arg0: i32) -> (i32, i32) {
    %c0_i32 = arith.constant 0 : i32
    %c0_i32_0 = arith.constant 0 : i32
    %c0_i32_1 = arith.constant 0 : i32
    return %c0_i32, %c0_i32_0 : i32, i32
  }
  func.func @transform_2(%arg0: i32) -> (i32, i32) {
    %c0_i32 = arith.constant 0 : i32
    %c0_i32_0 = arith.constant 0 : i32
    %c0_i32_1 = arith.constant 0 : i32
    return %c0_i32, %c0_i32_0 : i32, i32
  }
  func.func @transform_3(%arg0: i32) -> (i32, i32) {
    %c0_i32 = arith.constant 0 : i32
    %c0_i32_0 = arith.constant 0 : i32
    return %arg0, %c0_i32 : i32, i32
  }
}

module attributes {stable_mosaic.version = 11 : i64} {
  func.func @_mm_bias_kernel(%arg0: i32, %arg1: i32, %arg2: i32, %arg3: memref<16x128xbf16, #tpu.memory_space<vmem>>, %arg4: memref<128x384xbf16, #tpu.memory_space<vmem>>, %arg5: memref<1x384xf32, #tpu.memory_space<vmem>>, %arg6: memref<16x384xbf16, #tpu.memory_space<vmem>>, %arg7: memref<16x384xf32, #tpu.memory_space<vmem>>) attributes {dimension_semantics = [#tpu.dimension_semantics<parallel>, #tpu.dimension_semantics<parallel>, #tpu.dimension_semantics<arbitrary>], iteration_bounds = array<i64: 1, 1, 1>, scalar_prefetch = 0 : i64, scratch_operands = 1 : i64, tpu.core_type = #tpu.core_type<tc>, window_params = [{transform_indices = @transform_0, window_bounds = array<i64: 16, 128>}, {transform_indices = @transform_1, window_bounds = array<i64: 128, 384>}, {transform_indices = @transform_2, window_bounds = array<i64: 1, 384>}, {transform_indices = @transform_3, window_bounds = array<i64: 16, 384>}]} {
    %c0_i32 = arith.constant 0 : i32
    %0 = arith.cmpi eq, %arg2, %c0_i32 : i32
    %1 = arith.extui %0 : i1 to i32
    %c0_i32_0 = arith.constant 0 : i32
    %2 = arith.cmpi ne, %1, %c0_i32_0 : i32
    scf.if %2 {
      %cst_10 = arith.constant 0.000000e+00 : f32
      %12 = vector.broadcast %cst_10 : f32 to vector<16x384xf32>
      %c0_11 = arith.constant 0 : index
      %c0_12 = arith.constant 0 : index
      %13 = vector.load %arg7[%c0_11, %c0_12] : memref<16x384xf32, #tpu.memory_space<vmem>>, vector<16x384xf32>
      tpu.vector_store %arg7[%c0_11, %c0_12], %12 {strides = array<i32>} : memref<16x384xf32, #tpu.memory_space<vmem>>, vector<16x384xf32>,
    } else {
    }
    %c0 = arith.constant 0 : index
    %c0_1 = arith.constant 0 : index
    %3 = vector.load %arg7[%c0, %c0_1] : memref<16x384xf32, #tpu.memory_space<vmem>>, vector<16x384xf32>
    %c0_2 = arith.constant 0 : index
    %c0_3 = arith.constant 0 : index
    %4 = vector.load %arg3[%c0_2, %c0_3] : memref<16x128xbf16, #tpu.memory_space<vmem>>, vector<16x128xbf16>
    %c0_4 = arith.constant 0 : index
    %c0_5 = arith.constant 0 : index
    %5 = vector.load %arg4[%c0_4, %c0_5] : memref<128x384xbf16, #tpu.memory_space<vmem>>, vector<128x384xbf16>
    %cst = arith.constant dense<0.000000e+00> : vector<16x384xf32>
    %6 = tpu.matmul %4, %5, %cst {dimension_numbers = #tpu.dot_dimension_numbers<[1], [0], [0], [1], [0, 0, 1, 1], [], []>} : vector<16x128xbf16>, vector<128x384xbf16>, vector<16x384xf32> -> vector<16x384xf32>
    %7 = arith.addf %3, %6 : vector<16x384xf32>
    %c0_6 = arith.constant 0 : index
    %c0_7 = arith.constant 0 : index
    %8 = vector.load %arg7[%c0_6, %c0_7] : memref<16x384xf32, #tpu.memory_space<vmem>>, vector<16x384xf32>
    tpu.vector_store %arg7[%c0_6, %c0_7], %7 {strides = array<i32>} : memref<16x384xf32, #tpu.memory_space<vmem>>, vector<16x384xf32>,
    %c0_i32_8 = arith.constant 0 : i32
    %9 = arith.cmpi eq, %arg2, %c0_i32_8 : i32
    %10 = arith.extui %9 : i1 to i32
    %c0_i32_9 = arith.constant 0 : i32
    %11 = arith.cmpi ne, %10, %c0_i32_9 : i32
    scf.if %11 {
      %c0_10 = arith.constant 0 : index
      %c0_11 = arith.constant 0 : index
      %12 = vector.load %arg7[%c0_10, %c0_11] : memref<16x384xf32, #tpu.memory_space<vmem>>, vector<16x384xf32>
      %c0_12 = arith.constant 0 : index
      %c0_13 = arith.constant 0 : index
      %13 = vector.load %arg5[%c0_12, %c0_13] : memref<1x384xf32, #tpu.memory_space<vmem>>, vector<1x384xf32>
      %14 = vector.broadcast %13 : vector<1x384xf32> to vector<16x384xf32>
      %15 = arith.addf %12, %14 : vector<16x384xf32>
      %16 = arith.truncf %15 : vector<16x384xf32> to vector<16x384xbf16>
      %c0_14 = arith.constant 0 : index
      %c0_15 = arith.constant 0 : index
      %17 = vector.load %arg6[%c0_14, %c0_15] : memref<16x384xbf16, #tpu.memory_space<vmem>>, vector<16x384xbf16>
      tpu.vector_store %arg6[%c0_14, %c0_15], %16 {strides = array<i32>} : memref<16x384xbf16, #tpu.memory_space<vmem>>, vector<16x384xbf16>,
    } else {
    }
    return
  }
  func.func @transform_0(%arg0: i32, %arg1: i32, %arg2: i32) -> (i32, i32) {
    %c0_i32 = arith.constant 0 : i32
    return %arg0, %arg2 : i32, i32
  }
  func.func @transform_1(%arg0: i32, %arg1: i32, %arg2: i32) -> (i32, i32) {
    %c0_i32 = arith.constant 0 : i32
    return %arg2, %arg1 : i32, i32
  }
  func.func @transform_2(%arg0: i32, %arg1: i32, %arg2: i32) -> (i32, i32) {
    %c0_i32 = arith.constant 0 : i32
    %c0_i32_0 = arith.constant 0 : i32
    return %c0_i32, %arg1 : i32, i32
  }
  func.func @transform_3(%arg0: i32, %arg1: i32, %arg2: i32) -> (i32, i32) {
    %c0_i32 = arith.constant 0 : i32
    return %arg0, %arg1 : i32, i32
  }
}

module attributes {stable_mosaic.version = 11 : i64} {
  func.func @_mm_bias_res_ln_kernel(%arg0: i32, %arg1: i32, %arg2: memref<16x128xbf16, #tpu.memory_space<vmem>>, %arg3: memref<128x128xbf16, #tpu.memory_space<vmem>>, %arg4: memref<1x128xf32, #tpu.memory_space<vmem>>, %arg5: memref<16x128xbf16, #tpu.memory_space<vmem>>, %arg6: memref<1x128xf32, #tpu.memory_space<vmem>>, %arg7: memref<1x128xf32, #tpu.memory_space<vmem>>, %arg8: memref<16x128xbf16, #tpu.memory_space<vmem>>, %arg9: memref<16x128xf32, #tpu.memory_space<vmem>>) attributes {dimension_semantics = [#tpu.dimension_semantics<parallel>, #tpu.dimension_semantics<arbitrary>], iteration_bounds = array<i64: 1, 1>, scalar_prefetch = 0 : i64, scratch_operands = 1 : i64, tpu.core_type = #tpu.core_type<tc>, window_params = [{transform_indices = @transform_0, window_bounds = array<i64: 16, 128>}, {transform_indices = @transform_1, window_bounds = array<i64: 128, 128>}, {pipeline_mode = #tpu.pipeline_mode<synchronous>, transform_indices = @transform_2, window_bounds = array<i64: 1, 128>}, {transform_indices = @transform_3, window_bounds = array<i64: 16, 128>}, {pipeline_mode = #tpu.pipeline_mode<synchronous>, transform_indices = @transform_4, window_bounds = array<i64: 1, 128>}, {pipeline_mode = #tpu.pipeline_mode<synchronous>, transform_indices = @transform_5, window_bounds = array<i64: 1, 128>}, {transform_indices = @transform_6, window_bounds = array<i64: 16, 128>}]} {
    %c0_i32 = arith.constant 0 : i32
    %0 = arith.cmpi eq, %arg1, %c0_i32 : i32
    %1 = arith.extui %0 : i1 to i32
    %c0_i32_0 = arith.constant 0 : i32
    %2 = arith.cmpi ne, %1, %c0_i32_0 : i32
    scf.if %2 {
      %cst_10 = arith.constant 0.000000e+00 : f32
      %12 = vector.broadcast %cst_10 : f32 to vector<16x128xf32>
      %c0_11 = arith.constant 0 : index
      %c0_12 = arith.constant 0 : index
      %13 = vector.load %arg9[%c0_11, %c0_12] : memref<16x128xf32, #tpu.memory_space<vmem>>, vector<16x128xf32>
      tpu.vector_store %arg9[%c0_11, %c0_12], %12 {strides = array<i32>} : memref<16x128xf32, #tpu.memory_space<vmem>>, vector<16x128xf32>,
    } else {
    }
    %c0 = arith.constant 0 : index
    %c0_1 = arith.constant 0 : index
    %3 = vector.load %arg9[%c0, %c0_1] : memref<16x128xf32, #tpu.memory_space<vmem>>, vector<16x128xf32>
    %c0_2 = arith.constant 0 : index
    %c0_3 = arith.constant 0 : index
    %4 = vector.load %arg2[%c0_2, %c0_3] : memref<16x128xbf16, #tpu.memory_space<vmem>>, vector<16x128xbf16>
    %c0_4 = arith.constant 0 : index
    %c0_5 = arith.constant 0 : index
    %5 = vector.load %arg3[%c0_4, %c0_5] : memref<128x128xbf16, #tpu.memory_space<vmem>>, vector<128x128xbf16>
    %cst = arith.constant dense<0.000000e+00> : vector<16x128xf32>
    %6 = tpu.matmul %4, %5, %cst {dimension_numbers = #tpu.dot_dimension_numbers<[1], [0], [0], [1], [0, 0, 1, 1], [], []>} : vector<16x128xbf16>, vector<128x128xbf16>, vector<16x128xf32> -> vector<16x128xf32>
    %7 = arith.addf %3, %6 : vector<16x128xf32>
    %c0_6 = arith.constant 0 : index
    %c0_7 = arith.constant 0 : index
    %8 = vector.load %arg9[%c0_6, %c0_7] : memref<16x128xf32, #tpu.memory_space<vmem>>, vector<16x128xf32>
    tpu.vector_store %arg9[%c0_6, %c0_7], %7 {strides = array<i32>} : memref<16x128xf32, #tpu.memory_space<vmem>>, vector<16x128xf32>,
    %c0_i32_8 = arith.constant 0 : i32
    %9 = arith.cmpi eq, %arg1, %c0_i32_8 : i32
    %10 = arith.extui %9 : i1 to i32
    %c0_i32_9 = arith.constant 0 : i32
    %11 = arith.cmpi ne, %10, %c0_i32_9 : i32
    scf.if %11 {
      %c0_10 = arith.constant 0 : index
      %c0_11 = arith.constant 0 : index
      %12 = vector.load %arg9[%c0_10, %c0_11] : memref<16x128xf32, #tpu.memory_space<vmem>>, vector<16x128xf32>
      %c0_12 = arith.constant 0 : index
      %c0_13 = arith.constant 0 : index
      %13 = vector.load %arg4[%c0_12, %c0_13] : memref<1x128xf32, #tpu.memory_space<vmem>>, vector<1x128xf32>
      %14 = vector.broadcast %13 : vector<1x128xf32> to vector<16x128xf32>
      %15 = arith.addf %12, %14 : vector<16x128xf32>
      %c0_14 = arith.constant 0 : index
      %c0_15 = arith.constant 0 : index
      %16 = vector.load %arg5[%c0_14, %c0_15] : memref<16x128xbf16, #tpu.memory_space<vmem>>, vector<16x128xbf16>
      %17 = arith.extf %16 : vector<16x128xbf16> to vector<16x128xf32>
      %18 = arith.addf %15, %17 : vector<16x128xf32>
      %cst_16 = arith.constant dense<0.000000e+00> : vector<16xf32>
      %19 = vector.multi_reduction <add>, %18, %cst_16 [1] : vector<16x128xf32> to vector<16xf32>
      %20 = vector.shape_cast %19 : vector<16xf32> to vector<16x1xf32>
      %cst_17 = arith.constant 1.280000e+02 : f32
      %21 = vector.broadcast %cst_17 : f32 to vector<16x1xf32>
      %22 = arith.divf %20, %21 : vector<16x1xf32>
      %23 = vector.broadcast %22 : vector<16x1xf32> to vector<16x128xf32>
      %24 = arith.subf %18, %23 : vector<16x128xf32>
      %25 = arith.mulf %24, %24 : vector<16x128xf32>
      %cst_18 = arith.constant dense<0.000000e+00> : vector<16xf32>
      %26 = vector.multi_reduction <add>, %25, %cst_18 [1] : vector<16x128xf32> to vector<16xf32>
      %27 = vector.shape_cast %26 : vector<16xf32> to vector<16x1xf32>
      %cst_19 = arith.constant 1.280000e+02 : f32
      %28 = vector.broadcast %cst_19 : f32 to vector<16x1xf32>
      %29 = arith.divf %27, %28 : vector<16x1xf32>
      %30 = vector.broadcast %22 : vector<16x1xf32> to vector<16x128xf32>
      %31 = arith.subf %18, %30 : vector<16x128xf32>
      %cst_20 = arith.constant 9.99999974E-6 : f32
      %32 = vector.broadcast %cst_20 : f32 to vector<16x1xf32>
      %33 = arith.addf %29, %32 : vector<16x1xf32>
      %34 = math.rsqrt %33 : vector<16x1xf32>
      %35 = vector.broadcast %34 : vector<16x1xf32> to vector<16x128xf32>
      %36 = arith.mulf %31, %35 : vector<16x128xf32>
      %c0_21 = arith.constant 0 : index
      %c0_22 = arith.constant 0 : index
      %37 = vector.load %arg6[%c0_21, %c0_22] : memref<1x128xf32, #tpu.memory_space<vmem>>, vector<1x128xf32>
      %38 = vector.broadcast %37 : vector<1x128xf32> to vector<16x128xf32>
      %39 = arith.mulf %36, %38 : vector<16x128xf32>
      %c0_23 = arith.constant 0 : index
      %c0_24 = arith.constant 0 : index
      %40 = vector.load %arg7[%c0_23, %c0_24] : memref<1x128xf32, #tpu.memory_space<vmem>>, vector<1x128xf32>
      %41 = vector.broadcast %40 : vector<1x128xf32> to vector<16x128xf32>
      %42 = arith.addf %39, %41 : vector<16x128xf32>
      %43 = arith.truncf %42 : vector<16x128xf32> to vector<16x128xbf16>
      %c0_25 = arith.constant 0 : index
      %c0_26 = arith.constant 0 : index
      %44 = vector.load %arg8[%c0_25, %c0_26] : memref<16x128xbf16, #tpu.memory_space<vmem>>, vector<16x128xbf16>
      tpu.vector_store %arg8[%c0_25, %c0_26], %43 {strides = array<i32>} : memref<16x128xbf16, #tpu.memory_space<vmem>>, vector<16x128xbf16>,
    } else {
    }
    return
  }
  func.func @transform_0(%arg0: i32, %arg1: i32) -> (i32, i32) {
    %c0_i32 = arith.constant 0 : i32
    return %arg0, %arg1 : i32, i32
  }
  func.func @transform_1(%arg0: i32, %arg1: i32) -> (i32, i32) {
    %c0_i32 = arith.constant 0 : i32
    %c0_i32_0 = arith.constant 0 : i32
    return %arg1, %c0_i32 : i32, i32
  }
  func.func @transform_2(%arg0: i32, %arg1: i32) -> (i32, i32) {
    %c0_i32 = arith.constant 0 : i32
    %c0_i32_0 = arith.constant 0 : i32
    %c0_i32_1 = arith.constant 0 : i32
    return %c0_i32, %c0_i32_0 : i32, i32
  }
  func.func @transform_3(%arg0: i32, %arg1: i32) -> (i32, i32) {
    %c0_i32 = arith.constant 0 : i32
    %c0_i32_0 = arith.constant 0 : i32
    return %arg0, %c0_i32 : i32, i32
  }
  func.func @transform_4(%arg0: i32, %arg1: i32) -> (i32, i32) {
    %c0_i32 = arith.constant 0 : i32
    %c0_i32_0 = arith.constant 0 : i32
    %c0_i32_1 = arith.constant 0 : i32
    return %c0_i32, %c0_i32_0 : i32, i32
  }
  func.func @transform_5(%arg0: i32, %arg1: i32) -> (i32, i32) {
    %c0_i32 = arith.constant 0 : i32
    %c0_i32_0 = arith.constant 0 : i32
    %c0_i32_1 = arith.constant 0 : i32
    return %c0_i32, %c0_i32_0 : i32, i32
  }
  func.func @transform_6(%arg0: i32, %arg1: i32) -> (i32, i32) {
    %c0_i32 = arith.constant 0 : i32
    %c0_i32_0 = arith.constant 0 : i32
    return %arg0, %c0_i32 : i32, i32
  }
}

module attributes {stable_mosaic.version = 11 : i64} {
  func.func @_mha_kernel(%arg0: i32, %arg1: memref<1x8x128xbf16, #tpu.memory_space<vmem>>, %arg2: memref<1x8x128xbf16, #tpu.memory_space<vmem>>, %arg3: memref<1x8x128xbf16, #tpu.memory_space<vmem>>, %arg4: memref<1x1x8xf32, #tpu.memory_space<vmem>>, %arg5: memref<1x8x128xbf16, #tpu.memory_space<vmem>>) attributes {dimension_semantics = [#tpu.dimension_semantics<parallel>], iteration_bounds = array<i64: 2>, scalar_prefetch = 0 : i64, scratch_operands = 0 : i64, tpu.core_type = #tpu.core_type<tc>, window_params = [{transform_indices = @transform_0, window_bounds = array<i64: 1, 8, 128>}, {transform_indices = @transform_1, window_bounds = array<i64: 1, 8, 128>}, {transform_indices = @transform_2, window_bounds = array<i64: 1, 8, 128>}, {transform_indices = @transform_3, window_bounds = array<i64: 1, 1, 8>}, {transform_indices = @transform_4, window_bounds = array<i64: 1, 8, 128>}]} {
    %c0 = arith.constant 0 : index
    %c0_0 = arith.constant 0 : index
    %c0_1 = arith.constant 0 : index
    %0 = vector.load %arg1[%c0, %c0_0, %c0_1] : memref<1x8x128xbf16, #tpu.memory_space<vmem>>, vector<1x8x128xbf16>
    %1 = vector.shape_cast %0 : vector<1x8x128xbf16> to vector<8x128xbf16>
    %c0_2 = arith.constant 0 : index
    %c0_3 = arith.constant 0 : index
    %c0_4 = arith.constant 0 : index
    %2 = vector.load %arg2[%c0_2, %c0_3, %c0_4] : memref<1x8x128xbf16, #tpu.memory_space<vmem>>, vector<1x8x128xbf16>
    %3 = vector.shape_cast %2 : vector<1x8x128xbf16> to vector<8x128xbf16>
    %c0_5 = arith.constant 0 : index
    %c0_6 = arith.constant 0 : index
    %c0_7 = arith.constant 0 : index
    %4 = vector.load %arg3[%c0_5, %c0_6, %c0_7] : memref<1x8x128xbf16, #tpu.memory_space<vmem>>, vector<1x8x128xbf16>
    %5 = vector.shape_cast %4 : vector<1x8x128xbf16> to vector<8x128xbf16>
    %c0_8 = arith.constant 0 : index
    %c0_9 = arith.constant 0 : index
    %c0_10 = arith.constant 0 : index
    %6 = vector.load %arg4[%c0_8, %c0_9, %c0_10] : memref<1x1x8xf32, #tpu.memory_space<vmem>>, vector<1x1x8xf32>
    %7 = vector.shape_cast %6 : vector<1x1x8xf32> to vector<1x8xf32>
    %cst = arith.constant 1.000000e+00 : f32
    %8 = vector.broadcast %cst : f32 to vector<1x8xf32>
    %9 = arith.subf %8, %7 : vector<1x8xf32>
    %cst_11 = arith.constant -1.000000e+09 : f32
    %10 = vector.broadcast %cst_11 : f32 to vector<1x8xf32>
    %11 = arith.mulf %9, %10 : vector<1x8xf32>
    %12 = vector.shape_cast %11 : vector<1x8xf32> to vector<1x8xf32>
    %13 = vector.broadcast %12 : vector<1x8xf32> to vector<8x8xf32>
    %14 = tpu.iota {dimensions = array<i32: 0>} : vector<8x8xi32>
    %15 = tpu.iota {dimensions = array<i32: 1>} : vector<8x8xi32>
    %16 = arith.cmpi sle, %15, %14 : vector<8x8xi32>
    %cst_12 = arith.constant -1.000000e+09 : f32
    %17 = vector.broadcast %cst_12 : f32 to vector<8x8xf32>
    %18 = arith.select %16, %13, %17 : vector<8x8xi1>, vector<8x8xf32>
    %19 = vector.extract_strided_slice %1 {offsets = [0, 0], sizes = [8, 32], strides = [1, 1]} : vector<8x128xbf16> to vector<8x32xbf16>
    %20 = vector.extract_strided_slice %3 {offsets = [0, 0], sizes = [8, 32], strides = [1, 1]} : vector<8x128xbf16> to vector<8x32xbf16>
    %cst_13 = arith.constant dense<0.000000e+00> : vector<8x8xf32>
    %21 = tpu.matmul %19, %20, %cst_13 {dimension_numbers = #tpu.dot_dimension_numbers<[1], [1], [0], [0], [0, 0, 1, 0], [], []>} : vector<8x32xbf16>, vector<8x32xbf16>, vector<8x8xf32> -> vector<8x8xf32>
    %cst_14 = arith.constant 0.176776692 : f32
    %22 = vector.broadcast %cst_14 : f32 to vector<8x8xf32>
    %23 = arith.mulf %21, %22 : vector<8x8xf32>
    %24 = arith.addf %23, %18 : vector<8x8xf32>
    %cst_15 = arith.constant dense<0xFF800000> : vector<8xf32>
    %25 = vector.multi_reduction <maximumf>, %24, %cst_15 [1] : vector<8x8xf32> to vector<8xf32>
    %26 = vector.shape_cast %25 : vector<8xf32> to vector<8x1xf32>
    %27 = vector.broadcast %26 : vector<8x1xf32> to vector<8x8xf32>
    %28 = arith.subf %24, %27 : vector<8x8xf32>
    %29 = math.exp %28 : vector<8x8xf32>
    %cst_16 = arith.constant dense<0.000000e+00> : vector<8xf32>
    %30 = vector.multi_reduction <add>, %29, %cst_16 [1] : vector<8x8xf32> to vector<8xf32>
    %31 = vector.shape_cast %30 : vector<8xf32> to vector<8x1xf32>
    %32 = tpu.reciprocal %31 {approx = true} : vector<8x1xf32> -> vector<8x1xf32>
    %33 = vector.broadcast %32 : vector<8x1xf32> to vector<8x8xf32>
    %34 = arith.mulf %29, %33 : vector<8x8xf32>
    %35 = arith.truncf %34 : vector<8x8xf32> to vector<8x8xbf16>
    %36 = vector.extract_strided_slice %5 {offsets = [0, 0], sizes = [8, 32], strides = [1, 1]} : vector<8x128xbf16> to vector<8x32xbf16>
    %cst_17 = arith.constant dense<0.000000e+00> : vector<8x32xf32>
    %37 = tpu.matmul %35, %36, %cst_17 {dimension_numbers = #tpu.dot_dimension_numbers<[1], [0], [0], [1], [0, 0, 1, 1], [], []>} : vector<8x8xbf16>, vector<8x32xbf16>, vector<8x32xf32> -> vector<8x32xf32>
    %38 = vector.extract_strided_slice %1 {offsets = [0, 32], sizes = [8, 32], strides = [1, 1]} : vector<8x128xbf16> to vector<8x32xbf16>
    %39 = vector.extract_strided_slice %3 {offsets = [0, 32], sizes = [8, 32], strides = [1, 1]} : vector<8x128xbf16> to vector<8x32xbf16>
    %cst_18 = arith.constant dense<0.000000e+00> : vector<8x8xf32>
    %40 = tpu.matmul %38, %39, %cst_18 {dimension_numbers = #tpu.dot_dimension_numbers<[1], [1], [0], [0], [0, 0, 1, 0], [], []>} : vector<8x32xbf16>, vector<8x32xbf16>, vector<8x8xf32> -> vector<8x8xf32>
    %cst_19 = arith.constant 0.176776692 : f32
    %41 = vector.broadcast %cst_19 : f32 to vector<8x8xf32>
    %42 = arith.mulf %40, %41 : vector<8x8xf32>
    %43 = arith.addf %42, %18 : vector<8x8xf32>
    %cst_20 = arith.constant dense<0xFF800000> : vector<8xf32>
    %44 = vector.multi_reduction <maximumf>, %43, %cst_20 [1] : vector<8x8xf32> to vector<8xf32>
    %45 = vector.shape_cast %44 : vector<8xf32> to vector<8x1xf32>
    %46 = vector.broadcast %45 : vector<8x1xf32> to vector<8x8xf32>
    %47 = arith.subf %43, %46 : vector<8x8xf32>
    %48 = math.exp %47 : vector<8x8xf32>
    %cst_21 = arith.constant dense<0.000000e+00> : vector<8xf32>
    %49 = vector.multi_reduction <add>, %48, %cst_21 [1] : vector<8x8xf32> to vector<8xf32>
    %50 = vector.shape_cast %49 : vector<8xf32> to vector<8x1xf32>
    %51 = tpu.reciprocal %50 {approx = true} : vector<8x1xf32> -> vector<8x1xf32>
    %52 = vector.broadcast %51 : vector<8x1xf32> to vector<8x8xf32>
    %53 = arith.mulf %48, %52 : vector<8x8xf32>
    %54 = arith.truncf %53 : vector<8x8xf32> to vector<8x8xbf16>
    %55 = vector.extract_strided_slice %5 {offsets = [0, 32], sizes = [8, 32], strides = [1, 1]} : vector<8x128xbf16> to vector<8x32xbf16>
    %cst_22 = arith.constant dense<0.000000e+00> : vector<8x32xf32>
    %56 = tpu.matmul %54, %55, %cst_22 {dimension_numbers = #tpu.dot_dimension_numbers<[1], [0], [0], [1], [0, 0, 1, 1], [], []>} : vector<8x8xbf16>, vector<8x32xbf16>, vector<8x32xf32> -> vector<8x32xf32>
    %57 = vector.extract_strided_slice %1 {offsets = [0, 64], sizes = [8, 32], strides = [1, 1]} : vector<8x128xbf16> to vector<8x32xbf16>
    %58 = vector.extract_strided_slice %3 {offsets = [0, 64], sizes = [8, 32], strides = [1, 1]} : vector<8x128xbf16> to vector<8x32xbf16>
    %cst_23 = arith.constant dense<0.000000e+00> : vector<8x8xf32>
    %59 = tpu.matmul %57, %58, %cst_23 {dimension_numbers = #tpu.dot_dimension_numbers<[1], [1], [0], [0], [0, 0, 1, 0], [], []>} : vector<8x32xbf16>, vector<8x32xbf16>, vector<8x8xf32> -> vector<8x8xf32>
    %cst_24 = arith.constant 0.176776692 : f32
    %60 = vector.broadcast %cst_24 : f32 to vector<8x8xf32>
    %61 = arith.mulf %59, %60 : vector<8x8xf32>
    %62 = arith.addf %61, %18 : vector<8x8xf32>
    %cst_25 = arith.constant dense<0xFF800000> : vector<8xf32>
    %63 = vector.multi_reduction <maximumf>, %62, %cst_25 [1] : vector<8x8xf32> to vector<8xf32>
    %64 = vector.shape_cast %63 : vector<8xf32> to vector<8x1xf32>
    %65 = vector.broadcast %64 : vector<8x1xf32> to vector<8x8xf32>
    %66 = arith.subf %62, %65 : vector<8x8xf32>
    %67 = math.exp %66 : vector<8x8xf32>
    %cst_26 = arith.constant dense<0.000000e+00> : vector<8xf32>
    %68 = vector.multi_reduction <add>, %67, %cst_26 [1] : vector<8x8xf32> to vector<8xf32>
    %69 = vector.shape_cast %68 : vector<8xf32> to vector<8x1xf32>
    %70 = tpu.reciprocal %69 {approx = true} : vector<8x1xf32> -> vector<8x1xf32>
    %71 = vector.broadcast %70 : vector<8x1xf32> to vector<8x8xf32>
    %72 = arith.mulf %67, %71 : vector<8x8xf32>
    %73 = arith.truncf %72 : vector<8x8xf32> to vector<8x8xbf16>
    %74 = vector.extract_strided_slice %5 {offsets = [0, 64], sizes = [8, 32], strides = [1, 1]} : vector<8x128xbf16> to vector<8x32xbf16>
    %cst_27 = arith.constant dense<0.000000e+00> : vector<8x32xf32>
    %75 = tpu.matmul %73, %74, %cst_27 {dimension_numbers = #tpu.dot_dimension_numbers<[1], [0], [0], [1], [0, 0, 1, 1], [], []>} : vector<8x8xbf16>, vector<8x32xbf16>, vector<8x32xf32> -> vector<8x32xf32>
    %76 = vector.extract_strided_slice %1 {offsets = [0, 96], sizes = [8, 32], strides = [1, 1]} : vector<8x128xbf16> to vector<8x32xbf16>
    %77 = vector.extract_strided_slice %3 {offsets = [0, 96], sizes = [8, 32], strides = [1, 1]} : vector<8x128xbf16> to vector<8x32xbf16>
    %cst_28 = arith.constant dense<0.000000e+00> : vector<8x8xf32>
    %78 = tpu.matmul %76, %77, %cst_28 {dimension_numbers = #tpu.dot_dimension_numbers<[1], [1], [0], [0], [0, 0, 1, 0], [], []>} : vector<8x32xbf16>, vector<8x32xbf16>, vector<8x8xf32> -> vector<8x8xf32>
    %cst_29 = arith.constant 0.176776692 : f32
    %79 = vector.broadcast %cst_29 : f32 to vector<8x8xf32>
    %80 = arith.mulf %78, %79 : vector<8x8xf32>
    %81 = arith.addf %80, %18 : vector<8x8xf32>
    %cst_30 = arith.constant dense<0xFF800000> : vector<8xf32>
    %82 = vector.multi_reduction <maximumf>, %81, %cst_30 [1] : vector<8x8xf32> to vector<8xf32>
    %83 = vector.shape_cast %82 : vector<8xf32> to vector<8x1xf32>
    %84 = vector.broadcast %83 : vector<8x1xf32> to vector<8x8xf32>
    %85 = arith.subf %81, %84 : vector<8x8xf32>
    %86 = math.exp %85 : vector<8x8xf32>
    %cst_31 = arith.constant dense<0.000000e+00> : vector<8xf32>
    %87 = vector.multi_reduction <add>, %86, %cst_31 [1] : vector<8x8xf32> to vector<8xf32>
    %88 = vector.shape_cast %87 : vector<8xf32> to vector<8x1xf32>
    %89 = tpu.reciprocal %88 {approx = true} : vector<8x1xf32> -> vector<8x1xf32>
    %90 = vector.broadcast %89 : vector<8x1xf32> to vector<8x8xf32>
    %91 = arith.mulf %86, %90 : vector<8x8xf32>
    %92 = arith.truncf %91 : vector<8x8xf32> to vector<8x8xbf16>
    %93 = vector.extract_strided_slice %5 {offsets = [0, 96], sizes = [8, 32], strides = [1, 1]} : vector<8x128xbf16> to vector<8x32xbf16>
    %cst_32 = arith.constant dense<0.000000e+00> : vector<8x32xf32>
    %94 = tpu.matmul %92, %93, %cst_32 {dimension_numbers = #tpu.dot_dimension_numbers<[1], [0], [0], [1], [0, 0, 1, 1], [], []>} : vector<8x8xbf16>, vector<8x32xbf16>, vector<8x32xf32> -> vector<8x32xf32>
    %95 = tpu.concatenate %37, %56, %75, %94 in 1 : vector<8x32xf32>, vector<8x32xf32>, vector<8x32xf32>, vector<8x32xf32> -> vector<8x128xf32>
    %96 = arith.truncf %95 : vector<8x128xf32> to vector<8x128xbf16>
    %c0_33 = arith.constant 0 : index
    %c0_34 = arith.constant 0 : index
    %c0_35 = arith.constant 0 : index
    %97 = vector.load %arg5[%c0_33, %c0_34, %c0_35] : memref<1x8x128xbf16, #tpu.memory_space<vmem>>, vector<1x8x128xbf16>
    %98 = vector.shape_cast %97 : vector<1x8x128xbf16> to vector<8x128xbf16>
    %99 = vector.shape_cast %96 : vector<8x128xbf16> to vector<1x8x128xbf16>
    tpu.vector_store %arg5[%c0_33, %c0_34, %c0_35], %99 {strides = array<i32>} : memref<1x8x128xbf16, #tpu.memory_space<vmem>>, vector<1x8x128xbf16>,
    return
  }
  func.func @transform_0(%arg0: i32) -> (i32, i32, i32) {
    %c0_i32 = arith.constant 0 : i32
    %c0_i32_0 = arith.constant 0 : i32
    %c0_i32_1 = arith.constant 0 : i32
    return %arg0, %c0_i32, %c0_i32_0 : i32, i32, i32
  }
  func.func @transform_1(%arg0: i32) -> (i32, i32, i32) {
    %c0_i32 = arith.constant 0 : i32
    %c0_i32_0 = arith.constant 0 : i32
    %c0_i32_1 = arith.constant 0 : i32
    return %arg0, %c0_i32, %c0_i32_0 : i32, i32, i32
  }
  func.func @transform_2(%arg0: i32) -> (i32, i32, i32) {
    %c0_i32 = arith.constant 0 : i32
    %c0_i32_0 = arith.constant 0 : i32
    %c0_i32_1 = arith.constant 0 : i32
    return %arg0, %c0_i32, %c0_i32_0 : i32, i32, i32
  }
  func.func @transform_3(%arg0: i32) -> (i32, i32, i32) {
    %c0_i32 = arith.constant 0 : i32
    %c0_i32_0 = arith.constant 0 : i32
    %c0_i32_1 = arith.constant 0 : i32
    return %arg0, %c0_i32, %c0_i32_0 : i32, i32, i32
  }
  func.func @transform_4(%arg0: i32) -> (i32, i32, i32) {
    %c0_i32 = arith.constant 0 : i32
    %c0_i32_0 = arith.constant 0 : i32
    %c0_i32_1 = arith.constant 0 : i32
    return %arg0, %c0_i32, %c0_i32_0 : i32, i32, i32
  }
}

module attributes {stable_mosaic.version = 11 : i64} {
  func.func @_mm_bias_gelu_kernel(%arg0: i32, %arg1: i32, %arg2: i32, %arg3: memref<16x128xbf16, #tpu.memory_space<vmem>>, %arg4: memref<128x512xbf16, #tpu.memory_space<vmem>>, %arg5: memref<1x512xf32, #tpu.memory_space<vmem>>, %arg6: memref<16x512xbf16, #tpu.memory_space<vmem>>, %arg7: memref<16x512xf32, #tpu.memory_space<vmem>>) attributes {dimension_semantics = [#tpu.dimension_semantics<parallel>, #tpu.dimension_semantics<parallel>, #tpu.dimension_semantics<arbitrary>], iteration_bounds = array<i64: 1, 1, 1>, scalar_prefetch = 0 : i64, scratch_operands = 1 : i64, tpu.core_type = #tpu.core_type<tc>, window_params = [{transform_indices = @transform_0, window_bounds = array<i64: 16, 128>}, {transform_indices = @transform_1, window_bounds = array<i64: 128, 512>}, {transform_indices = @transform_2, window_bounds = array<i64: 1, 512>}, {transform_indices = @transform_3, window_bounds = array<i64: 16, 512>}]} {
    %c0_i32 = arith.constant 0 : i32
    %0 = arith.cmpi eq, %arg2, %c0_i32 : i32
    %1 = arith.extui %0 : i1 to i32
    %c0_i32_0 = arith.constant 0 : i32
    %2 = arith.cmpi ne, %1, %c0_i32_0 : i32
    scf.if %2 {
      %cst_10 = arith.constant 0.000000e+00 : f32
      %12 = vector.broadcast %cst_10 : f32 to vector<16x512xf32>
      %c0_11 = arith.constant 0 : index
      %c0_12 = arith.constant 0 : index
      %13 = vector.load %arg7[%c0_11, %c0_12] : memref<16x512xf32, #tpu.memory_space<vmem>>, vector<16x512xf32>
      tpu.vector_store %arg7[%c0_11, %c0_12], %12 {strides = array<i32>} : memref<16x512xf32, #tpu.memory_space<vmem>>, vector<16x512xf32>,
    } else {
    }
    %c0 = arith.constant 0 : index
    %c0_1 = arith.constant 0 : index
    %3 = vector.load %arg7[%c0, %c0_1] : memref<16x512xf32, #tpu.memory_space<vmem>>, vector<16x512xf32>
    %c0_2 = arith.constant 0 : index
    %c0_3 = arith.constant 0 : index
    %4 = vector.load %arg3[%c0_2, %c0_3] : memref<16x128xbf16, #tpu.memory_space<vmem>>, vector<16x128xbf16>
    %c0_4 = arith.constant 0 : index
    %c0_5 = arith.constant 0 : index
    %5 = vector.load %arg4[%c0_4, %c0_5] : memref<128x512xbf16, #tpu.memory_space<vmem>>, vector<128x512xbf16>
    %cst = arith.constant dense<0.000000e+00> : vector<16x512xf32>
    %6 = tpu.matmul %4, %5, %cst {dimension_numbers = #tpu.dot_dimension_numbers<[1], [0], [0], [1], [0, 0, 1, 1], [], []>} : vector<16x128xbf16>, vector<128x512xbf16>, vector<16x512xf32> -> vector<16x512xf32>
    %7 = arith.addf %3, %6 : vector<16x512xf32>
    %c0_6 = arith.constant 0 : index
    %c0_7 = arith.constant 0 : index
    %8 = vector.load %arg7[%c0_6, %c0_7] : memref<16x512xf32, #tpu.memory_space<vmem>>, vector<16x512xf32>
    tpu.vector_store %arg7[%c0_6, %c0_7], %7 {strides = array<i32>} : memref<16x512xf32, #tpu.memory_space<vmem>>, vector<16x512xf32>,
    %c0_i32_8 = arith.constant 0 : i32
    %9 = arith.cmpi eq, %arg2, %c0_i32_8 : i32
    %10 = arith.extui %9 : i1 to i32
    %c0_i32_9 = arith.constant 0 : i32
    %11 = arith.cmpi ne, %10, %c0_i32_9 : i32
    scf.if %11 {
      %c0_10 = arith.constant 0 : index
      %c0_11 = arith.constant 0 : index
      %12 = vector.load %arg7[%c0_10, %c0_11] : memref<16x512xf32, #tpu.memory_space<vmem>>, vector<16x512xf32>
      %c0_12 = arith.constant 0 : index
      %c0_13 = arith.constant 0 : index
      %13 = vector.load %arg5[%c0_12, %c0_13] : memref<1x512xf32, #tpu.memory_space<vmem>>, vector<1x512xf32>
      %14 = vector.broadcast %13 : vector<1x512xf32> to vector<16x512xf32>
      %15 = arith.addf %12, %14 : vector<16x512xf32>
      %cst_14 = arith.constant 5.000000e-01 : f32
      %16 = vector.broadcast %cst_14 : f32 to vector<16x512xf32>
      %17 = arith.mulf %16, %15 : vector<16x512xf32>
      %cst_15 = arith.constant 4.471500e-02 : f32
      %18 = vector.broadcast %cst_15 : f32 to vector<16x512xf32>
      %19 = arith.mulf %18, %15 : vector<16x512xf32>
      %20 = arith.mulf %19, %15 : vector<16x512xf32>
      %21 = arith.mulf %20, %15 : vector<16x512xf32>
      %22 = arith.addf %15, %21 : vector<16x512xf32>
      %cst_16 = arith.constant 0.797884583 : f32
      %23 = vector.broadcast %cst_16 : f32 to vector<16x512xf32>
      %24 = arith.mulf %23, %22 : vector<16x512xf32>
      %25 = math.tanh %24 : vector<16x512xf32>
      %cst_17 = arith.constant 1.000000e+00 : f32
      %26 = vector.broadcast %cst_17 : f32 to vector<16x512xf32>
      %27 = arith.addf %26, %25 : vector<16x512xf32>
      %28 = arith.mulf %17, %27 : vector<16x512xf32>
      %29 = arith.truncf %28 : vector<16x512xf32> to vector<16x512xbf16>
      %c0_18 = arith.constant 0 : index
      %c0_19 = arith.constant 0 : index
      %30 = vector.load %arg6[%c0_18, %c0_19] : memref<16x512xbf16, #tpu.memory_space<vmem>>, vector<16x512xbf16>
      tpu.vector_store %arg6[%c0_18, %c0_19], %29 {strides = array<i32>} : memref<16x512xbf16, #tpu.memory_space<vmem>>, vector<16x512xbf16>,
    } else {
    }
    return
  }
  func.func @transform_0(%arg0: i32, %arg1: i32, %arg2: i32) -> (i32, i32) {
    %c0_i32 = arith.constant 0 : i32
    return %arg0, %arg2 : i32, i32
  }
  func.func @transform_1(%arg0: i32, %arg1: i32, %arg2: i32) -> (i32, i32) {
    %c0_i32 = arith.constant 0 : i32
    return %arg2, %arg1 : i32, i32
  }
  func.func @transform_2(%arg0: i32, %arg1: i32, %arg2: i32) -> (i32, i32) {
    %c0_i32 = arith.constant 0 : i32
    %c0_i32_0 = arith.constant 0 : i32
    return %c0_i32, %arg1 : i32, i32
  }
  func.func @transform_3(%arg0: i32, %arg1: i32, %arg2: i32) -> (i32, i32) {
    %c0_i32 = arith.constant 0 : i32
    return %arg0, %arg1 : i32, i32
  }
}

module attributes {stable_mosaic.version = 11 : i64} {
  func.func @_mm_bias_kernel(%arg0: i32, %arg1: i32, %arg2: i32, %arg3: memref<16x128xbf16, #tpu.memory_space<vmem>>, %arg4: memref<128x128xbf16, #tpu.memory_space<vmem>>, %arg5: memref<1x128xf32, #tpu.memory_space<vmem>>, %arg6: memref<16x128xbf16, #tpu.memory_space<vmem>>, %arg7: memref<16x128xf32, #tpu.memory_space<vmem>>) attributes {dimension_semantics = [#tpu.dimension_semantics<parallel>, #tpu.dimension_semantics<parallel>, #tpu.dimension_semantics<arbitrary>], iteration_bounds = array<i64: 1, 1, 1>, scalar_prefetch = 0 : i64, scratch_operands = 1 : i64, tpu.core_type = #tpu.core_type<tc>, window_params = [{transform_indices = @transform_0, window_bounds = array<i64: 16, 128>}, {transform_indices = @transform_1, window_bounds = array<i64: 128, 128>}, {transform_indices = @transform_2, window_bounds = array<i64: 1, 128>}, {transform_indices = @transform_3, window_bounds = array<i64: 16, 128>}]} {
    %c0_i32 = arith.constant 0 : i32
    %0 = arith.cmpi eq, %arg2, %c0_i32 : i32
    %1 = arith.extui %0 : i1 to i32
    %c0_i32_0 = arith.constant 0 : i32
    %2 = arith.cmpi ne, %1, %c0_i32_0 : i32
    scf.if %2 {
      %cst_10 = arith.constant 0.000000e+00 : f32
      %12 = vector.broadcast %cst_10 : f32 to vector<16x128xf32>
      %c0_11 = arith.constant 0 : index
      %c0_12 = arith.constant 0 : index
      %13 = vector.load %arg7[%c0_11, %c0_12] : memref<16x128xf32, #tpu.memory_space<vmem>>, vector<16x128xf32>
      tpu.vector_store %arg7[%c0_11, %c0_12], %12 {strides = array<i32>} : memref<16x128xf32, #tpu.memory_space<vmem>>, vector<16x128xf32>,
    } else {
    }
    %c0 = arith.constant 0 : index
    %c0_1 = arith.constant 0 : index
    %3 = vector.load %arg7[%c0, %c0_1] : memref<16x128xf32, #tpu.memory_space<vmem>>, vector<16x128xf32>
    %c0_2 = arith.constant 0 : index
    %c0_3 = arith.constant 0 : index
    %4 = vector.load %arg3[%c0_2, %c0_3] : memref<16x128xbf16, #tpu.memory_space<vmem>>, vector<16x128xbf16>
    %c0_4 = arith.constant 0 : index
    %c0_5 = arith.constant 0 : index
    %5 = vector.load %arg4[%c0_4, %c0_5] : memref<128x128xbf16, #tpu.memory_space<vmem>>, vector<128x128xbf16>
    %cst = arith.constant dense<0.000000e+00> : vector<16x128xf32>
    %6 = tpu.matmul %4, %5, %cst {dimension_numbers = #tpu.dot_dimension_numbers<[1], [0], [0], [1], [0, 0, 1, 1], [], []>} : vector<16x128xbf16>, vector<128x128xbf16>, vector<16x128xf32> -> vector<16x128xf32>
    %7 = arith.addf %3, %6 : vector<16x128xf32>
    %c0_6 = arith.constant 0 : index
    %c0_7 = arith.constant 0 : index
    %8 = vector.load %arg7[%c0_6, %c0_7] : memref<16x128xf32, #tpu.memory_space<vmem>>, vector<16x128xf32>
    tpu.vector_store %arg7[%c0_6, %c0_7], %7 {strides = array<i32>} : memref<16x128xf32, #tpu.memory_space<vmem>>, vector<16x128xf32>,
    %c0_i32_8 = arith.constant 0 : i32
    %9 = arith.cmpi eq, %arg2, %c0_i32_8 : i32
    %10 = arith.extui %9 : i1 to i32
    %c0_i32_9 = arith.constant 0 : i32
    %11 = arith.cmpi ne, %10, %c0_i32_9 : i32
    scf.if %11 {
      %c0_10 = arith.constant 0 : index
      %c0_11 = arith.constant 0 : index
      %12 = vector.load %arg7[%c0_10, %c0_11] : memref<16x128xf32, #tpu.memory_space<vmem>>, vector<16x128xf32>
      %c0_12 = arith.constant 0 : index
      %c0_13 = arith.constant 0 : index
      %13 = vector.load %arg5[%c0_12, %c0_13] : memref<1x128xf32, #tpu.memory_space<vmem>>, vector<1x128xf32>
      %14 = vector.broadcast %13 : vector<1x128xf32> to vector<16x128xf32>
      %15 = arith.addf %12, %14 : vector<16x128xf32>
      %16 = arith.truncf %15 : vector<16x128xf32> to vector<16x128xbf16>
      %c0_14 = arith.constant 0 : index
      %c0_15 = arith.constant 0 : index
      %17 = vector.load %arg6[%c0_14, %c0_15] : memref<16x128xbf16, #tpu.memory_space<vmem>>, vector<16x128xbf16>
      tpu.vector_store %arg6[%c0_14, %c0_15], %16 {strides = array<i32>} : memref<16x128xbf16, #tpu.memory_space<vmem>>, vector<16x128xbf16>,
    } else {
    }
    return
  }
  func.func @transform_0(%arg0: i32, %arg1: i32, %arg2: i32) -> (i32, i32) {
    %c0_i32 = arith.constant 0 : i32
    return %arg0, %arg2 : i32, i32
  }
  func.func @transform_1(%arg0: i32, %arg1: i32, %arg2: i32) -> (i32, i32) {
    %c0_i32 = arith.constant 0 : i32
    return %arg2, %arg1 : i32, i32
  }
  func.func @transform_2(%arg0: i32, %arg1: i32, %arg2: i32) -> (i32, i32) {
    %c0_i32 = arith.constant 0 : i32
    %c0_i32_0 = arith.constant 0 : i32
    return %c0_i32, %arg1 : i32, i32
  }
  func.func @transform_3(%arg0: i32, %arg1: i32, %arg2: i32) -> (i32, i32) {
    %c0_i32 = arith.constant 0 : i32
    return %arg0, %arg1 : i32, i32
  }
}

module attributes {stable_mosaic.version = 11 : i64} {
  func.func @_mha_kernel(%arg0: i32, %arg1: memref<1x8x128xbf16, #tpu.memory_space<vmem>>, %arg2: memref<1x8x128xbf16, #tpu.memory_space<vmem>>, %arg3: memref<1x8x128xbf16, #tpu.memory_space<vmem>>, %arg4: memref<1x1x8xf32, #tpu.memory_space<vmem>>, %arg5: memref<1x8x128xbf16, #tpu.memory_space<vmem>>) attributes {dimension_semantics = [#tpu.dimension_semantics<parallel>], iteration_bounds = array<i64: 2>, scalar_prefetch = 0 : i64, scratch_operands = 0 : i64, tpu.core_type = #tpu.core_type<tc>, window_params = [{transform_indices = @transform_0, window_bounds = array<i64: 1, 8, 128>}, {transform_indices = @transform_1, window_bounds = array<i64: 1, 8, 128>}, {transform_indices = @transform_2, window_bounds = array<i64: 1, 8, 128>}, {transform_indices = @transform_3, window_bounds = array<i64: 1, 1, 8>}, {transform_indices = @transform_4, window_bounds = array<i64: 1, 8, 128>}]} {
    %c0 = arith.constant 0 : index
    %c0_0 = arith.constant 0 : index
    %c0_1 = arith.constant 0 : index
    %0 = vector.load %arg1[%c0, %c0_0, %c0_1] : memref<1x8x128xbf16, #tpu.memory_space<vmem>>, vector<1x8x128xbf16>
    %1 = vector.shape_cast %0 : vector<1x8x128xbf16> to vector<8x128xbf16>
    %c0_2 = arith.constant 0 : index
    %c0_3 = arith.constant 0 : index
    %c0_4 = arith.constant 0 : index
    %2 = vector.load %arg2[%c0_2, %c0_3, %c0_4] : memref<1x8x128xbf16, #tpu.memory_space<vmem>>, vector<1x8x128xbf16>
    %3 = vector.shape_cast %2 : vector<1x8x128xbf16> to vector<8x128xbf16>
    %c0_5 = arith.constant 0 : index
    %c0_6 = arith.constant 0 : index
    %c0_7 = arith.constant 0 : index
    %4 = vector.load %arg3[%c0_5, %c0_6, %c0_7] : memref<1x8x128xbf16, #tpu.memory_space<vmem>>, vector<1x8x128xbf16>
    %5 = vector.shape_cast %4 : vector<1x8x128xbf16> to vector<8x128xbf16>
    %c0_8 = arith.constant 0 : index
    %c0_9 = arith.constant 0 : index
    %c0_10 = arith.constant 0 : index
    %6 = vector.load %arg4[%c0_8, %c0_9, %c0_10] : memref<1x1x8xf32, #tpu.memory_space<vmem>>, vector<1x1x8xf32>
    %7 = vector.shape_cast %6 : vector<1x1x8xf32> to vector<1x8xf32>
    %cst = arith.constant 1.000000e+00 : f32
    %8 = vector.broadcast %cst : f32 to vector<1x8xf32>
    %9 = arith.subf %8, %7 : vector<1x8xf32>
    %cst_11 = arith.constant -1.000000e+09 : f32
    %10 = vector.broadcast %cst_11 : f32 to vector<1x8xf32>
    %11 = arith.mulf %9, %10 : vector<1x8xf32>
    %12 = vector.shape_cast %11 : vector<1x8xf32> to vector<1x8xf32>
    %13 = vector.broadcast %12 : vector<1x8xf32> to vector<8x8xf32>
    %14 = vector.extract_strided_slice %1 {offsets = [0, 0], sizes = [8, 32], strides = [1, 1]} : vector<8x128xbf16> to vector<8x32xbf16>
    %15 = vector.extract_strided_slice %3 {offsets = [0, 0], sizes = [8, 32], strides = [1, 1]} : vector<8x128xbf16> to vector<8x32xbf16>
    %cst_12 = arith.constant dense<0.000000e+00> : vector<8x8xf32>
    %16 = tpu.matmul %14, %15, %cst_12 {dimension_numbers = #tpu.dot_dimension_numbers<[1], [1], [0], [0], [0, 0, 1, 0], [], []>} : vector<8x32xbf16>, vector<8x32xbf16>, vector<8x8xf32> -> vector<8x8xf32>
    %cst_13 = arith.constant 0.176776692 : f32
    %17 = vector.broadcast %cst_13 : f32 to vector<8x8xf32>
    %18 = arith.mulf %16, %17 : vector<8x8xf32>
    %19 = arith.addf %18, %13 : vector<8x8xf32>
    %cst_14 = arith.constant dense<0xFF800000> : vector<8xf32>
    %20 = vector.multi_reduction <maximumf>, %19, %cst_14 [1] : vector<8x8xf32> to vector<8xf32>
    %21 = vector.shape_cast %20 : vector<8xf32> to vector<8x1xf32>
    %22 = vector.broadcast %21 : vector<8x1xf32> to vector<8x8xf32>
    %23 = arith.subf %19, %22 : vector<8x8xf32>
    %24 = math.exp %23 : vector<8x8xf32>
    %cst_15 = arith.constant dense<0.000000e+00> : vector<8xf32>
    %25 = vector.multi_reduction <add>, %24, %cst_15 [1] : vector<8x8xf32> to vector<8xf32>
    %26 = vector.shape_cast %25 : vector<8xf32> to vector<8x1xf32>
    %27 = tpu.reciprocal %26 {approx = true} : vector<8x1xf32> -> vector<8x1xf32>
    %28 = vector.broadcast %27 : vector<8x1xf32> to vector<8x8xf32>
    %29 = arith.mulf %24, %28 : vector<8x8xf32>
    %30 = arith.truncf %29 : vector<8x8xf32> to vector<8x8xbf16>
    %31 = vector.extract_strided_slice %5 {offsets = [0, 0], sizes = [8, 32], strides = [1, 1]} : vector<8x128xbf16> to vector<8x32xbf16>
    %cst_16 = arith.constant dense<0.000000e+00> : vector<8x32xf32>
    %32 = tpu.matmul %30, %31, %cst_16 {dimension_numbers = #tpu.dot_dimension_numbers<[1], [0], [0], [1], [0, 0, 1, 1], [], []>} : vector<8x8xbf16>, vector<8x32xbf16>, vector<8x32xf32> -> vector<8x32xf32>
    %33 = vector.extract_strided_slice %1 {offsets = [0, 32], sizes = [8, 32], strides = [1, 1]} : vector<8x128xbf16> to vector<8x32xbf16>
    %34 = vector.extract_strided_slice %3 {offsets = [0, 32], sizes = [8, 32], strides = [1, 1]} : vector<8x128xbf16> to vector<8x32xbf16>
    %cst_17 = arith.constant dense<0.000000e+00> : vector<8x8xf32>
    %35 = tpu.matmul %33, %34, %cst_17 {dimension_numbers = #tpu.dot_dimension_numbers<[1], [1], [0], [0], [0, 0, 1, 0], [], []>} : vector<8x32xbf16>, vector<8x32xbf16>, vector<8x8xf32> -> vector<8x8xf32>
    %cst_18 = arith.constant 0.176776692 : f32
    %36 = vector.broadcast %cst_18 : f32 to vector<8x8xf32>
    %37 = arith.mulf %35, %36 : vector<8x8xf32>
    %38 = arith.addf %37, %13 : vector<8x8xf32>
    %cst_19 = arith.constant dense<0xFF800000> : vector<8xf32>
    %39 = vector.multi_reduction <maximumf>, %38, %cst_19 [1] : vector<8x8xf32> to vector<8xf32>
    %40 = vector.shape_cast %39 : vector<8xf32> to vector<8x1xf32>
    %41 = vector.broadcast %40 : vector<8x1xf32> to vector<8x8xf32>
    %42 = arith.subf %38, %41 : vector<8x8xf32>
    %43 = math.exp %42 : vector<8x8xf32>
    %cst_20 = arith.constant dense<0.000000e+00> : vector<8xf32>
    %44 = vector.multi_reduction <add>, %43, %cst_20 [1] : vector<8x8xf32> to vector<8xf32>
    %45 = vector.shape_cast %44 : vector<8xf32> to vector<8x1xf32>
    %46 = tpu.reciprocal %45 {approx = true} : vector<8x1xf32> -> vector<8x1xf32>
    %47 = vector.broadcast %46 : vector<8x1xf32> to vector<8x8xf32>
    %48 = arith.mulf %43, %47 : vector<8x8xf32>
    %49 = arith.truncf %48 : vector<8x8xf32> to vector<8x8xbf16>
    %50 = vector.extract_strided_slice %5 {offsets = [0, 32], sizes = [8, 32], strides = [1, 1]} : vector<8x128xbf16> to vector<8x32xbf16>
    %cst_21 = arith.constant dense<0.000000e+00> : vector<8x32xf32>
    %51 = tpu.matmul %49, %50, %cst_21 {dimension_numbers = #tpu.dot_dimension_numbers<[1], [0], [0], [1], [0, 0, 1, 1], [], []>} : vector<8x8xbf16>, vector<8x32xbf16>, vector<8x32xf32> -> vector<8x32xf32>
    %52 = vector.extract_strided_slice %1 {offsets = [0, 64], sizes = [8, 32], strides = [1, 1]} : vector<8x128xbf16> to vector<8x32xbf16>
    %53 = vector.extract_strided_slice %3 {offsets = [0, 64], sizes = [8, 32], strides = [1, 1]} : vector<8x128xbf16> to vector<8x32xbf16>
    %cst_22 = arith.constant dense<0.000000e+00> : vector<8x8xf32>
    %54 = tpu.matmul %52, %53, %cst_22 {dimension_numbers = #tpu.dot_dimension_numbers<[1], [1], [0], [0], [0, 0, 1, 0], [], []>} : vector<8x32xbf16>, vector<8x32xbf16>, vector<8x8xf32> -> vector<8x8xf32>
    %cst_23 = arith.constant 0.176776692 : f32
    %55 = vector.broadcast %cst_23 : f32 to vector<8x8xf32>
    %56 = arith.mulf %54, %55 : vector<8x8xf32>
    %57 = arith.addf %56, %13 : vector<8x8xf32>
    %cst_24 = arith.constant dense<0xFF800000> : vector<8xf32>
    %58 = vector.multi_reduction <maximumf>, %57, %cst_24 [1] : vector<8x8xf32> to vector<8xf32>
    %59 = vector.shape_cast %58 : vector<8xf32> to vector<8x1xf32>
    %60 = vector.broadcast %59 : vector<8x1xf32> to vector<8x8xf32>
    %61 = arith.subf %57, %60 : vector<8x8xf32>
    %62 = math.exp %61 : vector<8x8xf32>
    %cst_25 = arith.constant dense<0.000000e+00> : vector<8xf32>
    %63 = vector.multi_reduction <add>, %62, %cst_25 [1] : vector<8x8xf32> to vector<8xf32>
    %64 = vector.shape_cast %63 : vector<8xf32> to vector<8x1xf32>
    %65 = tpu.reciprocal %64 {approx = true} : vector<8x1xf32> -> vector<8x1xf32>
    %66 = vector.broadcast %65 : vector<8x1xf32> to vector<8x8xf32>
    %67 = arith.mulf %62, %66 : vector<8x8xf32>
    %68 = arith.truncf %67 : vector<8x8xf32> to vector<8x8xbf16>
    %69 = vector.extract_strided_slice %5 {offsets = [0, 64], sizes = [8, 32], strides = [1, 1]} : vector<8x128xbf16> to vector<8x32xbf16>
    %cst_26 = arith.constant dense<0.000000e+00> : vector<8x32xf32>
    %70 = tpu.matmul %68, %69, %cst_26 {dimension_numbers = #tpu.dot_dimension_numbers<[1], [0], [0], [1], [0, 0, 1, 1], [], []>} : vector<8x8xbf16>, vector<8x32xbf16>, vector<8x32xf32> -> vector<8x32xf32>
    %71 = vector.extract_strided_slice %1 {offsets = [0, 96], sizes = [8, 32], strides = [1, 1]} : vector<8x128xbf16> to vector<8x32xbf16>
    %72 = vector.extract_strided_slice %3 {offsets = [0, 96], sizes = [8, 32], strides = [1, 1]} : vector<8x128xbf16> to vector<8x32xbf16>
    %cst_27 = arith.constant dense<0.000000e+00> : vector<8x8xf32>
    %73 = tpu.matmul %71, %72, %cst_27 {dimension_numbers = #tpu.dot_dimension_numbers<[1], [1], [0], [0], [0, 0, 1, 0], [], []>} : vector<8x32xbf16>, vector<8x32xbf16>, vector<8x8xf32> -> vector<8x8xf32>
    %cst_28 = arith.constant 0.176776692 : f32
    %74 = vector.broadcast %cst_28 : f32 to vector<8x8xf32>
    %75 = arith.mulf %73, %74 : vector<8x8xf32>
    %76 = arith.addf %75, %13 : vector<8x8xf32>
    %cst_29 = arith.constant dense<0xFF800000> : vector<8xf32>
    %77 = vector.multi_reduction <maximumf>, %76, %cst_29 [1] : vector<8x8xf32> to vector<8xf32>
    %78 = vector.shape_cast %77 : vector<8xf32> to vector<8x1xf32>
    %79 = vector.broadcast %78 : vector<8x1xf32> to vector<8x8xf32>
    %80 = arith.subf %76, %79 : vector<8x8xf32>
    %81 = math.exp %80 : vector<8x8xf32>
    %cst_30 = arith.constant dense<0.000000e+00> : vector<8xf32>
    %82 = vector.multi_reduction <add>, %81, %cst_30 [1] : vector<8x8xf32> to vector<8xf32>
    %83 = vector.shape_cast %82 : vector<8xf32> to vector<8x1xf32>
    %84 = tpu.reciprocal %83 {approx = true} : vector<8x1xf32> -> vector<8x1xf32>
    %85 = vector.broadcast %84 : vector<8x1xf32> to vector<8x8xf32>
    %86 = arith.mulf %81, %85 : vector<8x8xf32>
    %87 = arith.truncf %86 : vector<8x8xf32> to vector<8x8xbf16>
    %88 = vector.extract_strided_slice %5 {offsets = [0, 96], sizes = [8, 32], strides = [1, 1]} : vector<8x128xbf16> to vector<8x32xbf16>
    %cst_31 = arith.constant dense<0.000000e+00> : vector<8x32xf32>
    %89 = tpu.matmul %87, %88, %cst_31 {dimension_numbers = #tpu.dot_dimension_numbers<[1], [0], [0], [1], [0, 0, 1, 1], [], []>} : vector<8x8xbf16>, vector<8x32xbf16>, vector<8x32xf32> -> vector<8x32xf32>
    %90 = tpu.concatenate %32, %51, %70, %89 in 1 : vector<8x32xf32>, vector<8x32xf32>, vector<8x32xf32>, vector<8x32xf32> -> vector<8x128xf32>
    %91 = arith.truncf %90 : vector<8x128xf32> to vector<8x128xbf16>
    %c0_32 = arith.constant 0 : index
    %c0_33 = arith.constant 0 : index
    %c0_34 = arith.constant 0 : index
    %92 = vector.load %arg5[%c0_32, %c0_33, %c0_34] : memref<1x8x128xbf16, #tpu.memory_space<vmem>>, vector<1x8x128xbf16>
    %93 = vector.shape_cast %92 : vector<1x8x128xbf16> to vector<8x128xbf16>
    %94 = vector.shape_cast %91 : vector<8x128xbf16> to vector<1x8x128xbf16>
    tpu.vector_store %arg5[%c0_32, %c0_33, %c0_34], %94 {strides = array<i32>} : memref<1x8x128xbf16, #tpu.memory_space<vmem>>, vector<1x8x128xbf16>,
    return
  }
  func.func @transform_0(%arg0: i32) -> (i32, i32, i32) {
    %c0_i32 = arith.constant 0 : i32
    %c0_i32_0 = arith.constant 0 : i32
    %c0_i32_1 = arith.constant 0 : i32
    return %arg0, %c0_i32, %c0_i32_0 : i32, i32, i32
  }
  func.func @transform_1(%arg0: i32) -> (i32, i32, i32) {
    %c0_i32 = arith.constant 0 : i32
    %c0_i32_0 = arith.constant 0 : i32
    %c0_i32_1 = arith.constant 0 : i32
    return %arg0, %c0_i32, %c0_i32_0 : i32, i32, i32
  }
  func.func @transform_2(%arg0: i32) -> (i32, i32, i32) {
    %c0_i32 = arith.constant 0 : i32
    %c0_i32_0 = arith.constant 0 : i32
    %c0_i32_1 = arith.constant 0 : i32
    return %arg0, %c0_i32, %c0_i32_0 : i32, i32, i32
  }
  func.func @transform_3(%arg0: i32) -> (i32, i32, i32) {
    %c0_i32 = arith.constant 0 : i32
    %c0_i32_0 = arith.constant 0 : i32
    %c0_i32_1 = arith.constant 0 : i32
    return %arg0, %c0_i32, %c0_i32_0 : i32, i32, i32
  }
  func.func @transform_4(%arg0: i32) -> (i32, i32, i32) {
    %c0_i32 = arith.constant 0 : i32
    %c0_i32_0 = arith.constant 0 : i32
    %c0_i32_1 = arith.constant 0 : i32
    return %arg0, %c0_i32, %c0_i32_0 : i32, i32, i32
  }
}

module attributes {stable_mosaic.version = 11 : i64} {
  func.func @_mm_bias_res_ln_kernel(%arg0: i32, %arg1: i32, %arg2: memref<16x256xbf16, #tpu.memory_space<vmem>>, %arg3: memref<256x128xbf16, #tpu.memory_space<vmem>>, %arg4: memref<1x128xf32, #tpu.memory_space<vmem>>, %arg5: memref<16x128xbf16, #tpu.memory_space<vmem>>, %arg6: memref<1x128xf32, #tpu.memory_space<vmem>>, %arg7: memref<1x128xf32, #tpu.memory_space<vmem>>, %arg8: memref<16x128xbf16, #tpu.memory_space<vmem>>, %arg9: memref<16x128xf32, #tpu.memory_space<vmem>>) attributes {dimension_semantics = [#tpu.dimension_semantics<parallel>, #tpu.dimension_semantics<arbitrary>], iteration_bounds = array<i64: 1, 2>, scalar_prefetch = 0 : i64, scratch_operands = 1 : i64, tpu.core_type = #tpu.core_type<tc>, window_params = [{transform_indices = @transform_0, window_bounds = array<i64: 16, 256>}, {transform_indices = @transform_1, window_bounds = array<i64: 256, 128>}, {pipeline_mode = #tpu.pipeline_mode<synchronous>, transform_indices = @transform_2, window_bounds = array<i64: 1, 128>}, {transform_indices = @transform_3, window_bounds = array<i64: 16, 128>}, {pipeline_mode = #tpu.pipeline_mode<synchronous>, transform_indices = @transform_4, window_bounds = array<i64: 1, 128>}, {pipeline_mode = #tpu.pipeline_mode<synchronous>, transform_indices = @transform_5, window_bounds = array<i64: 1, 128>}, {transform_indices = @transform_6, window_bounds = array<i64: 16, 128>}]} {
    %c0_i32 = arith.constant 0 : i32
    %0 = arith.cmpi eq, %arg1, %c0_i32 : i32
    %1 = arith.extui %0 : i1 to i32
    %c0_i32_0 = arith.constant 0 : i32
    %2 = arith.cmpi ne, %1, %c0_i32_0 : i32
    scf.if %2 {
      %cst_9 = arith.constant 0.000000e+00 : f32
      %12 = vector.broadcast %cst_9 : f32 to vector<16x128xf32>
      %c0_10 = arith.constant 0 : index
      %c0_11 = arith.constant 0 : index
      %13 = vector.load %arg9[%c0_10, %c0_11] : memref<16x128xf32, #tpu.memory_space<vmem>>, vector<16x128xf32>
      tpu.vector_store %arg9[%c0_10, %c0_11], %12 {strides = array<i32>} : memref<16x128xf32, #tpu.memory_space<vmem>>, vector<16x128xf32>,
    } else {
    }
    %c0 = arith.constant 0 : index
    %c0_1 = arith.constant 0 : index
    %3 = vector.load %arg9[%c0, %c0_1] : memref<16x128xf32, #tpu.memory_space<vmem>>, vector<16x128xf32>
    %c0_2 = arith.constant 0 : index
    %c0_3 = arith.constant 0 : index
    %4 = vector.load %arg2[%c0_2, %c0_3] : memref<16x256xbf16, #tpu.memory_space<vmem>>, vector<16x256xbf16>
    %c0_4 = arith.constant 0 : index
    %c0_5 = arith.constant 0 : index
    %5 = vector.load %arg3[%c0_4, %c0_5] : memref<256x128xbf16, #tpu.memory_space<vmem>>, vector<256x128xbf16>
    %cst = arith.constant dense<0.000000e+00> : vector<16x128xf32>
    %6 = tpu.matmul %4, %5, %cst {dimension_numbers = #tpu.dot_dimension_numbers<[1], [0], [0], [1], [0, 0, 1, 1], [], []>} : vector<16x256xbf16>, vector<256x128xbf16>, vector<16x128xf32> -> vector<16x128xf32>
    %7 = arith.addf %3, %6 : vector<16x128xf32>
    %c0_6 = arith.constant 0 : index
    %c0_7 = arith.constant 0 : index
    %8 = vector.load %arg9[%c0_6, %c0_7] : memref<16x128xf32, #tpu.memory_space<vmem>>, vector<16x128xf32>
    tpu.vector_store %arg9[%c0_6, %c0_7], %7 {strides = array<i32>} : memref<16x128xf32, #tpu.memory_space<vmem>>, vector<16x128xf32>,
    %c1_i32 = arith.constant 1 : i32
    %9 = arith.cmpi eq, %arg1, %c1_i32 : i32
    %10 = arith.extui %9 : i1 to i32
    %c0_i32_8 = arith.constant 0 : i32
    %11 = arith.cmpi ne, %10, %c0_i32_8 : i32
    scf.if %11 {
      %c0_9 = arith.constant 0 : index
      %c0_10 = arith.constant 0 : index
      %12 = vector.load %arg9[%c0_9, %c0_10] : memref<16x128xf32, #tpu.memory_space<vmem>>, vector<16x128xf32>
      %c0_11 = arith.constant 0 : index
      %c0_12 = arith.constant 0 : index
      %13 = vector.load %arg4[%c0_11, %c0_12] : memref<1x128xf32, #tpu.memory_space<vmem>>, vector<1x128xf32>
      %14 = vector.broadcast %13 : vector<1x128xf32> to vector<16x128xf32>
      %15 = arith.addf %12, %14 : vector<16x128xf32>
      %c0_13 = arith.constant 0 : index
      %c0_14 = arith.constant 0 : index
      %16 = vector.load %arg5[%c0_13, %c0_14] : memref<16x128xbf16, #tpu.memory_space<vmem>>, vector<16x128xbf16>
      %17 = arith.extf %16 : vector<16x128xbf16> to vector<16x128xf32>
      %18 = arith.addf %15, %17 : vector<16x128xf32>
      %cst_15 = arith.constant dense<0.000000e+00> : vector<16xf32>
      %19 = vector.multi_reduction <add>, %18, %cst_15 [1] : vector<16x128xf32> to vector<16xf32>
      %20 = vector.shape_cast %19 : vector<16xf32> to vector<16x1xf32>
      %cst_16 = arith.constant 1.280000e+02 : f32
      %21 = vector.broadcast %cst_16 : f32 to vector<16x1xf32>
      %22 = arith.divf %20, %21 : vector<16x1xf32>
      %23 = vector.broadcast %22 : vector<16x1xf32> to vector<16x128xf32>
      %24 = arith.subf %18, %23 : vector<16x128xf32>
      %25 = arith.mulf %24, %24 : vector<16x128xf32>
      %cst_17 = arith.constant dense<0.000000e+00> : vector<16xf32>
      %26 = vector.multi_reduction <add>, %25, %cst_17 [1] : vector<16x128xf32> to vector<16xf32>
      %27 = vector.shape_cast %26 : vector<16xf32> to vector<16x1xf32>
      %cst_18 = arith.constant 1.280000e+02 : f32
      %28 = vector.broadcast %cst_18 : f32 to vector<16x1xf32>
      %29 = arith.divf %27, %28 : vector<16x1xf32>
      %30 = vector.broadcast %22 : vector<16x1xf32> to vector<16x128xf32>
      %31 = arith.subf %18, %30 : vector<16x128xf32>
      %cst_19 = arith.constant 9.99999974E-6 : f32
      %32 = vector.broadcast %cst_19 : f32 to vector<16x1xf32>
      %33 = arith.addf %29, %32 : vector<16x1xf32>
      %34 = math.rsqrt %33 : vector<16x1xf32>
      %35 = vector.broadcast %34 : vector<16x1xf32> to vector<16x128xf32>
      %36 = arith.mulf %31, %35 : vector<16x128xf32>
      %c0_20 = arith.constant 0 : index
      %c0_21 = arith.constant 0 : index
      %37 = vector.load %arg6[%c0_20, %c0_21] : memref<1x128xf32, #tpu.memory_space<vmem>>, vector<1x128xf32>
      %38 = vector.broadcast %37 : vector<1x128xf32> to vector<16x128xf32>
      %39 = arith.mulf %36, %38 : vector<16x128xf32>
      %c0_22 = arith.constant 0 : index
      %c0_23 = arith.constant 0 : index
      %40 = vector.load %arg7[%c0_22, %c0_23] : memref<1x128xf32, #tpu.memory_space<vmem>>, vector<1x128xf32>
      %41 = vector.broadcast %40 : vector<1x128xf32> to vector<16x128xf32>
      %42 = arith.addf %39, %41 : vector<16x128xf32>
      %43 = arith.truncf %42 : vector<16x128xf32> to vector<16x128xbf16>
      %c0_24 = arith.constant 0 : index
      %c0_25 = arith.constant 0 : index
      %44 = vector.load %arg8[%c0_24, %c0_25] : memref<16x128xbf16, #tpu.memory_space<vmem>>, vector<16x128xbf16>
      tpu.vector_store %arg8[%c0_24, %c0_25], %43 {strides = array<i32>} : memref<16x128xbf16, #tpu.memory_space<vmem>>, vector<16x128xbf16>,
    } else {
    }
    return
  }
  func.func @transform_0(%arg0: i32, %arg1: i32) -> (i32, i32) {
    %c0_i32 = arith.constant 0 : i32
    return %arg0, %arg1 : i32, i32
  }
  func.func @transform_1(%arg0: i32, %arg1: i32) -> (i32, i32) {
    %c0_i32 = arith.constant 0 : i32
    %c0_i32_0 = arith.constant 0 : i32
    return %arg1, %c0_i32 : i32, i32
  }
  func.func @transform_2(%arg0: i32, %arg1: i32) -> (i32, i32) {
    %c0_i32 = arith.constant 0 : i32
    %c0_i32_0 = arith.constant 0 : i32
    %c0_i32_1 = arith.constant 0 : i32
    return %c0_i32, %c0_i32_0 : i32, i32
  }
  func.func @transform_3(%arg0: i32, %arg1: i32) -> (i32, i32) {
    %c0_i32 = arith.constant 0 : i32
    %c0_i32_0 = arith.constant 0 : i32
    return %arg0, %c0_i32 : i32, i32
  }
  func.func @transform_4(%arg0: i32, %arg1: i32) -> (i32, i32) {
    %c0_i32 = arith.constant 0 : i32
    %c0_i32_0 = arith.constant 0 : i32
    %c0_i32_1 = arith.constant 0 : i32
    return %c0_i32, %c0_i32_0 : i32, i32
  }
  func.func @transform_5(%arg0: i32, %arg1: i32) -> (i32, i32) {
    %c0_i32 = arith.constant 0 : i32
    %c0_i32_0 = arith.constant 0 : i32
    %c0_i32_1 = arith.constant 0 : i32
    return %c0_i32, %c0_i32_0 : i32, i32
  }
  func.func @transform_6(%arg0: i32, %arg1: i32) -> (i32, i32) {
    %c0_i32 = arith.constant 0 : i32
    %c0_i32_0 = arith.constant 0 : i32
    return %arg0, %c0_i32 : i32, i32
  }
}

module attributes {stable_mosaic.version = 11 : i64} {
  func.func @_mm_bias_kernel(%arg0: i32, %arg1: i32, %arg2: i32, %arg3: memref<16x128xbf16, #tpu.memory_space<vmem>>, %arg4: memref<128x256xbf16, #tpu.memory_space<vmem>>, %arg5: memref<1x256xf32, #tpu.memory_space<vmem>>, %arg6: memref<16x256xbf16, #tpu.memory_space<vmem>>, %arg7: memref<16x256xf32, #tpu.memory_space<vmem>>) attributes {dimension_semantics = [#tpu.dimension_semantics<parallel>, #tpu.dimension_semantics<parallel>, #tpu.dimension_semantics<arbitrary>], iteration_bounds = array<i64: 1, 1, 1>, scalar_prefetch = 0 : i64, scratch_operands = 1 : i64, tpu.core_type = #tpu.core_type<tc>, window_params = [{transform_indices = @transform_0, window_bounds = array<i64: 16, 128>}, {transform_indices = @transform_1, window_bounds = array<i64: 128, 256>}, {transform_indices = @transform_2, window_bounds = array<i64: 1, 256>}, {transform_indices = @transform_3, window_bounds = array<i64: 16, 256>}]} {
    %c0_i32 = arith.constant 0 : i32
    %0 = arith.cmpi eq, %arg2, %c0_i32 : i32
    %1 = arith.extui %0 : i1 to i32
    %c0_i32_0 = arith.constant 0 : i32
    %2 = arith.cmpi ne, %1, %c0_i32_0 : i32
    scf.if %2 {
      %cst_10 = arith.constant 0.000000e+00 : f32
      %12 = vector.broadcast %cst_10 : f32 to vector<16x256xf32>
      %c0_11 = arith.constant 0 : index
      %c0_12 = arith.constant 0 : index
      %13 = vector.load %arg7[%c0_11, %c0_12] : memref<16x256xf32, #tpu.memory_space<vmem>>, vector<16x256xf32>
      tpu.vector_store %arg7[%c0_11, %c0_12], %12 {strides = array<i32>} : memref<16x256xf32, #tpu.memory_space<vmem>>, vector<16x256xf32>,
    } else {
    }
    %c0 = arith.constant 0 : index
    %c0_1 = arith.constant 0 : index
    %3 = vector.load %arg7[%c0, %c0_1] : memref<16x256xf32, #tpu.memory_space<vmem>>, vector<16x256xf32>
    %c0_2 = arith.constant 0 : index
    %c0_3 = arith.constant 0 : index
    %4 = vector.load %arg3[%c0_2, %c0_3] : memref<16x128xbf16, #tpu.memory_space<vmem>>, vector<16x128xbf16>
    %c0_4 = arith.constant 0 : index
    %c0_5 = arith.constant 0 : index
    %5 = vector.load %arg4[%c0_4, %c0_5] : memref<128x256xbf16, #tpu.memory_space<vmem>>, vector<128x256xbf16>
    %cst = arith.constant dense<0.000000e+00> : vector<16x256xf32>
    %6 = tpu.matmul %4, %5, %cst {dimension_numbers = #tpu.dot_dimension_numbers<[1], [0], [0], [1], [0, 0, 1, 1], [], []>} : vector<16x128xbf16>, vector<128x256xbf16>, vector<16x256xf32> -> vector<16x256xf32>
    %7 = arith.addf %3, %6 : vector<16x256xf32>
    %c0_6 = arith.constant 0 : index
    %c0_7 = arith.constant 0 : index
    %8 = vector.load %arg7[%c0_6, %c0_7] : memref<16x256xf32, #tpu.memory_space<vmem>>, vector<16x256xf32>
    tpu.vector_store %arg7[%c0_6, %c0_7], %7 {strides = array<i32>} : memref<16x256xf32, #tpu.memory_space<vmem>>, vector<16x256xf32>,
    %c0_i32_8 = arith.constant 0 : i32
    %9 = arith.cmpi eq, %arg2, %c0_i32_8 : i32
    %10 = arith.extui %9 : i1 to i32
    %c0_i32_9 = arith.constant 0 : i32
    %11 = arith.cmpi ne, %10, %c0_i32_9 : i32
    scf.if %11 {
      %c0_10 = arith.constant 0 : index
      %c0_11 = arith.constant 0 : index
      %12 = vector.load %arg7[%c0_10, %c0_11] : memref<16x256xf32, #tpu.memory_space<vmem>>, vector<16x256xf32>
      %c0_12 = arith.constant 0 : index
      %c0_13 = arith.constant 0 : index
      %13 = vector.load %arg5[%c0_12, %c0_13] : memref<1x256xf32, #tpu.memory_space<vmem>>, vector<1x256xf32>
      %14 = vector.broadcast %13 : vector<1x256xf32> to vector<16x256xf32>
      %15 = arith.addf %12, %14 : vector<16x256xf32>
      %16 = arith.truncf %15 : vector<16x256xf32> to vector<16x256xbf16>
      %c0_14 = arith.constant 0 : index
      %c0_15 = arith.constant 0 : index
      %17 = vector.load %arg6[%c0_14, %c0_15] : memref<16x256xbf16, #tpu.memory_space<vmem>>, vector<16x256xbf16>
      tpu.vector_store %arg6[%c0_14, %c0_15], %16 {strides = array<i32>} : memref<16x256xbf16, #tpu.memory_space<vmem>>, vector<16x256xbf16>,
    } else {
    }
    return
  }
  func.func @transform_0(%arg0: i32, %arg1: i32, %arg2: i32) -> (i32, i32) {
    %c0_i32 = arith.constant 0 : i32
    return %arg0, %arg2 : i32, i32
  }
  func.func @transform_1(%arg0: i32, %arg1: i32, %arg2: i32) -> (i32, i32) {
    %c0_i32 = arith.constant 0 : i32
    return %arg2, %arg1 : i32, i32
  }
  func.func @transform_2(%arg0: i32, %arg1: i32, %arg2: i32) -> (i32, i32) {
    %c0_i32 = arith.constant 0 : i32
    %c0_i32_0 = arith.constant 0 : i32
    return %c0_i32, %arg1 : i32, i32
  }
  func.func @transform_3(%arg0: i32, %arg1: i32, %arg2: i32) -> (i32, i32) {
    %c0_i32 = arith.constant 0 : i32
    return %arg0, %arg1 : i32, i32
  }
}

module attributes {stable_mosaic.version = 11 : i64} {
  func.func @_mm_wt_kernel(%arg0: i32, %arg1: i32, %arg2: i32, %arg3: memref<16x128xbf16, #tpu.memory_space<vmem>>, %arg4: memref<512x128xbf16, #tpu.memory_space<vmem>>, %arg5: memref<16x512xf32, #tpu.memory_space<vmem>>, %arg6: memref<16x512xf32, #tpu.memory_space<vmem>>) attributes {dimension_semantics = [#tpu.dimension_semantics<parallel>, #tpu.dimension_semantics<parallel>, #tpu.dimension_semantics<arbitrary>], iteration_bounds = array<i64: 1, 2, 1>, scalar_prefetch = 0 : i64, scratch_operands = 1 : i64, tpu.core_type = #tpu.core_type<tc>, window_params = [{transform_indices = @transform_0, window_bounds = array<i64: 16, 128>}, {transform_indices = @transform_1, window_bounds = array<i64: 512, 128>}, {transform_indices = @transform_2, window_bounds = array<i64: 16, 512>}]} {
    %c0_i32 = arith.constant 0 : i32
    %0 = arith.cmpi eq, %arg2, %c0_i32 : i32
    %1 = arith.extui %0 : i1 to i32
    %c0_i32_0 = arith.constant 0 : i32
    %2 = arith.cmpi ne, %1, %c0_i32_0 : i32
    scf.if %2 {
      %cst_10 = arith.constant 0.000000e+00 : f32
      %12 = vector.broadcast %cst_10 : f32 to vector<16x512xf32>
      %c0_11 = arith.constant 0 : index
      %c0_12 = arith.constant 0 : index
      %13 = vector.load %arg6[%c0_11, %c0_12] : memref<16x512xf32, #tpu.memory_space<vmem>>, vector<16x512xf32>
      tpu.vector_store %arg6[%c0_11, %c0_12], %12 {strides = array<i32>} : memref<16x512xf32, #tpu.memory_space<vmem>>, vector<16x512xf32>,
    } else {
    }
    %c0 = arith.constant 0 : index
    %c0_1 = arith.constant 0 : index
    %3 = vector.load %arg6[%c0, %c0_1] : memref<16x512xf32, #tpu.memory_space<vmem>>, vector<16x512xf32>
    %c0_2 = arith.constant 0 : index
    %c0_3 = arith.constant 0 : index
    %4 = vector.load %arg3[%c0_2, %c0_3] : memref<16x128xbf16, #tpu.memory_space<vmem>>, vector<16x128xbf16>
    %c0_4 = arith.constant 0 : index
    %c0_5 = arith.constant 0 : index
    %5 = vector.load %arg4[%c0_4, %c0_5] : memref<512x128xbf16, #tpu.memory_space<vmem>>, vector<512x128xbf16>
    %cst = arith.constant dense<0.000000e+00> : vector<16x512xf32>
    %6 = tpu.matmul %4, %5, %cst {dimension_numbers = #tpu.dot_dimension_numbers<[1], [1], [0], [0], [0, 0, 1, 0], [], []>} : vector<16x128xbf16>, vector<512x128xbf16>, vector<16x512xf32> -> vector<16x512xf32>
    %7 = arith.addf %3, %6 : vector<16x512xf32>
    %c0_6 = arith.constant 0 : index
    %c0_7 = arith.constant 0 : index
    %8 = vector.load %arg6[%c0_6, %c0_7] : memref<16x512xf32, #tpu.memory_space<vmem>>, vector<16x512xf32>
    tpu.vector_store %arg6[%c0_6, %c0_7], %7 {strides = array<i32>} : memref<16x512xf32, #tpu.memory_space<vmem>>, vector<16x512xf32>,
    %c0_i32_8 = arith.constant 0 : i32
    %9 = arith.cmpi eq, %arg2, %c0_i32_8 : i32
    %10 = arith.extui %9 : i1 to i32
    %c0_i32_9 = arith.constant 0 : i32
    %11 = arith.cmpi ne, %10, %c0_i32_9 : i32
    scf.if %11 {
      %c0_10 = arith.constant 0 : index
      %c0_11 = arith.constant 0 : index
      %12 = vector.load %arg6[%c0_10, %c0_11] : memref<16x512xf32, #tpu.memory_space<vmem>>, vector<16x512xf32>
      %c0_12 = arith.constant 0 : index
      %c0_13 = arith.constant 0 : index
      %13 = vector.load %arg5[%c0_12, %c0_13] : memref<16x512xf32, #tpu.memory_space<vmem>>, vector<16x512xf32>
      tpu.vector_store %arg5[%c0_12, %c0_13], %12 {strides = array<i32>} : memref<16x512xf32, #tpu.memory_space<vmem>>, vector<16x512xf32>,
    } else {
    }
    return
  }
  func.func @transform_0(%arg0: i32, %arg1: i32, %arg2: i32) -> (i32, i32) {
    %c0_i32 = arith.constant 0 : i32
    return %arg0, %arg2 : i32, i32
  }
  func.func @transform_1(%arg0: i32, %arg1: i32, %arg2: i32) -> (i32, i32) {
    %c0_i32 = arith.constant 0 : i32
    return %arg1, %arg2 : i32, i32
  }
  func.func @transform_2(%arg0: i32, %arg1: i32, %arg2: i32) -> (i32, i32) {
    %c0_i32 = arith.constant 0 : i32
    return %arg0, %arg1 : i32, i32
  }
}

</mosaic_0001>

<bundles_post_ra>
// kernel: bart_with_pointer_generator.45
= control target key start
LH: loop header
LB: loop body
LE: loop exit
PB: predicated region body
PF: predicated region fallthrough
CT: control target
= control target key end

     0   :  { %v293_v0 = vmov 0.0   ;;  %vm294_vm0 = vmmov 0   ;;  %s372_s1 = inlined_call_operand.vmem [shape: bf16[128,128], index: 1, kind: input, shape index: {}]   ;;  %s373_s0 = inlined_call_operand.vmem [shape: bf16[16,128], index: 0, kind: input, shape index: {}]   ;;  %s374_s3 = inlined_call_operand.vmem [shape: bf16[16,128], index: 3, kind: input, shape index: {}]   ;;  %s375_s2 = inlined_call_operand.vmem [shape: f32[1,128], index: 2, kind: input, shape index: {}]   ;;  %s376_s4 = inlined_call_operand.vmem [shape: f32[1,128], index: 4, kind: input, shape index: {}]   ;;  %s377_s5 = inlined_call_operand.vmem [shape: f32[1,128], index: 5, kind: input, shape index: {}]   ;;  %s378_s6 = inlined_call_operand.vmem [shape: bf16[16,128], index: 6, kind: output, shape index: {}]  }
   0x1   :  { %258 = vmatprep.subr.bf16.mxu0 %v293_v0  ;;  %v280_v1 = vld [vmem:[%s372_s1] sm:$0xff]   ;;  %274 = vmatprep.mubr.msk.bf16.mxu0 %vm294_vm0, %v293_v0  ;;  %v281_v2 = vld [vmem:[%s372_s1 + $0x8] sm:$0xff]   ;;  %v282_v3 = vld [vmem:[%s372_s1 + $0x10] sm:$0xff]  }
   0x2   :  { %259 = vmatpush3.bf16.msra.mxu0 %v280_v1  ;;  %v283_v4 = vld [vmem:[%s372_s1 + $0x18] sm:$0xff]   ;;  %v284_v5 = vld [vmem:[%s372_s1 + $0x20] sm:$0xff]   ;;  %v285_v6 = vld [vmem:[%s372_s1 + $0x28] sm:$0xff]  }
   0x3   :  { %260 = vmatprep.subr.bf16.mxu0 %v293_v0  ;;  %v286_v7 = vld [vmem:[%s372_s1 + $0x30] sm:$0xff]   ;;  %v287_v8 = vld [vmem:[%s372_s1 + $0x38] sm:$0xff]   ;;  %v288_v9 = vld [vmem:[%s373_s0] sm:$0xff]  }
   0x4   :  { %v241_v10 = vld [vmem:[%s374_s3] sm:$0xff]  }
   0x5   :  { %v233_v11 = vld [vmem:[%s375_s2] ss:$0 sm:$0xff]  ;;  %v242_v12 = vunpack.c.l.bf16 %v241_v10  ;;  %v243_v20 = vunpack.c.h.bf16 %v241_v10 }
   0x6   :  { %261 = vmatpush3.bf16.msra.mxu0 %v281_v2  ;;  %v234_v38 = vld [vmem:[%s376_s4] ss:$0 sm:$0xff] }
   0x7   :  { %262 = vmatprep.subr.bf16.mxu0 %v293_v0  ;;  %v235_v42 = vld [vmem:[%s377_s5] ss:$0 sm:$0xff] }
   0xa   :  { %263 = vmatpush3.bf16.msra.mxu0 %v282_v3 }
   0xb   :  { %264 = vmatprep.subr.bf16.mxu0 %v293_v0 }
   0xe   :  { %265 = vmatpush3.bf16.msra.mxu0 %v283_v4 }
   0xf   :  { %266 = vmatprep.subr.bf16.mxu0 %v293_v0 }
  0x12   :  { %267 = vmatpush3.bf16.msra.mxu0 %v284_v5 }
  0x13   :  { %268 = vmatprep.subr.bf16.mxu0 %v293_v0 }
  0x16   :  { %269 = vmatpush3.bf16.msra.mxu0 %v285_v6 }
  0x17   :  { %270 = vmatprep.subr.bf16.mxu0 %v293_v0 }
  0x1a   :  { %271 = vmatpush3.bf16.msra.mxu0 %v286_v7 }
  0x1b   :  { %272 = vmatprep.subr.bf16.mxu0 %v293_v0 }
  0x1e   :  { %273 = vmatpush3.bf16.msra.mxu0 %v287_v8 }
  0x21   :  { %275 = vmatmul.mubr.bf16.vlgmr.msra.gmra.mrb[0].mxu0 %v288_v9 }
  0xf4   :  { %v138_v13 = vpop.f32.mrb[0].mxu0 }
  0xf5   :  { %v161_v14 = vadd.f32 %v233_v11, %v138_v13  ;;  %v276_v15 = vpop.f32.mrb[1].mxu0 }
  0xf6   :  { %v141_v16 = vpop.f32.mrb[2].mxu0 }
  0xf7   :  { %v162_v17 = vadd.f32 %v233_v11, %v141_v16  ;;  %v277_v18 = vpop.f32.mrb[3].mxu0  ;;  %v167_v19 = vadd.f32 %v242_v12, %v161_v14 }
  0xf9   :  { %169 = vadd.xlane.f32.xlu0 %v167_v19  ;;  %v168_v21 = vadd.f32 %v243_v20, %v162_v17 }
  0xfd   :  { %171 = vadd.xlane.f32.xlu0 %v168_v21 }
 0x186   :  { %v170_v22 = vpop.xlane.xlu0 %169 }
 0x187   :  { %v174_v23 = vmul.f32 0.0078125, %v170_v22 }
 0x189   :  { %v176_v24 = vsub.f32 %v167_v19, %v174_v23 }
 0x18a   :  { %v172_v25 = vpop.xlane.xlu0 %171 }
 0x18b   :  { %v175_v26 = vmul.f32 0.0078125, %v172_v25  ;;  %v178_v27 = vmul.f32 %v176_v24, %v176_v24 }
 0x18d   :  { %v177_v28 = vsub.f32 %v168_v21, %v175_v26  ;;  %180 = vadd.xlane.f32.xlu1 %v178_v27 }
 0x18f   :  { %v179_v29 = vmul.f32 %v177_v28, %v177_v28 }
 0x191   :  { %182 = vadd.xlane.f32.xlu1 %v179_v29 }
 0x21a   :  { %v181_v30 = vpop.xlane.xlu1 %180 }
 0x21b   :  { %v184_v31 = vmul.f32 0.0078125, %v181_v30 }
 0x21d   :  { %v186_v32 = vadd.f32 1e-05, %v184_v31 }
 0x21e   :  { %v183_v33 = vpop.xlane.xlu1 %182 }
 0x21f   :  { %289 = vrsqrt.f32 %v186_v32  ;;  %v185_v34 = vmul.f32 0.0078125, %v183_v33 }
 0x221   :  { %v187_v35 = vadd.f32 1e-05, %v185_v34 }
 0x223   :  { %291 = vrsqrt.f32 %v187_v35 }
 0x229   :  { %v290_v36 = vpop.eup %289 }
 0x22a   :  { %v190_v37 = vmul.f32 %v290_v36, %v176_v24 }
 0x22c   :  { %v199_v40 = vmul.f32 %v234_v38, %v190_v37 }
 0x22d   :  { %v292_v39 = vpop.eup %291 }
 0x22e   :  { %v191_v41 = vmul.f32 %v292_v39, %v177_v28  ;;  %v208_v44 = vadd.f32 %v235_v42, %v199_v40 }
 0x230   :  { %v200_v43 = vmul.f32 %v234_v38, %v191_v41 }
 0x232   :  { %v209_v45 = vadd.f32 %v235_v42, %v200_v43 }
 0x234   :  { %v247_v46 = vpack.c.bf16 %v209_v45, %v208_v44 }
 0x236   :  { %248 = vst [vmem:[%s378_s6] sm:$0xff] %v247_v46  }

// kernel: bart_with_pointer_generator.31
= control target key start
LH: loop header
LB: loop body
LE: loop exit
PB: predicated region body
PF: predicated region fallthrough
CT: control target
= control target key end

     0   :  { %s124_s0 = inlined_call_operand.vmem [shape: bf16[16,128], index: 0, kind: input, shape index: {}]   ;;  %s125_s1 = inlined_call_operand.vmem [shape: f32[1,128], index: 1, kind: input, shape index: {}]   ;;  %s126_s2 = inlined_call_operand.vmem [shape: f32[1,128], index: 2, kind: input, shape index: {}]   ;;  %s127_s3 = inlined_call_operand.vmem [shape: bf16[16,128], index: 3, kind: output, shape index: {}]  }
   0x1   :  { %v80_v0 = vld [vmem:[%s124_s0] sm:$0xff]  }
   0x2   :  { %v81_v1 = vunpack.c.l.bf16 %v80_v0  ;;  %v82_v2 = vunpack.c.h.bf16 %v80_v0  ;;  %v73_v19 = vld [vmem:[%s125_s1] ss:$0 sm:$0xff] }
   0x3   :  { %v74_v23 = vld [vmem:[%s126_s2] ss:$0 sm:$0xff] }
   0x4   :  { %18 = vadd.xlane.f32.xlu0 %v81_v1 }
   0x8   :  { %20 = vadd.xlane.f32.xlu0 %v82_v2 }
  0x91   :  { %v19_v3 = vpop.xlane.xlu0 %18 }
  0x92   :  { %v23_v4 = vmul.f32 0.0078125, %v19_v3 }
  0x94   :  { %v25_v5 = vsub.f32 %v81_v1, %v23_v4 }
  0x95   :  { %v21_v6 = vpop.xlane.xlu0 %20 }
  0x96   :  { %v24_v7 = vmul.f32 0.0078125, %v21_v6  ;;  %v27_v8 = vmul.f32 %v25_v5, %v25_v5 }
  0x98   :  { %v26_v9 = vsub.f32 %v82_v2, %v24_v7  ;;  %29 = vadd.xlane.f32.xlu1 %v27_v8 }
  0x9a   :  { %v28_v10 = vmul.f32 %v26_v9, %v26_v9 }
  0x9c   :  { %31 = vadd.xlane.f32.xlu1 %v28_v10 }
 0x125   :  { %v30_v11 = vpop.xlane.xlu1 %29 }
 0x126   :  { %v33_v12 = vmul.f32 0.0078125, %v30_v11 }
 0x128   :  { %v35_v13 = vadd.f32 1e-05, %v33_v12 }
 0x129   :  { %v32_v14 = vpop.xlane.xlu1 %31 }
 0x12a   :  { %88 = vrsqrt.f32 %v35_v13  ;;  %v34_v15 = vmul.f32 0.0078125, %v32_v14 }
 0x12c   :  { %v36_v16 = vadd.f32 1e-05, %v34_v15 }
 0x12e   :  { %90 = vrsqrt.f32 %v36_v16 }
 0x134   :  { %v89_v17 = vpop.eup %88 }
 0x135   :  { %v39_v18 = vmul.f32 %v89_v17, %v25_v5 }
 0x137   :  { %v48_v21 = vmul.f32 %v73_v19, %v39_v18 }
 0x138   :  { %v91_v20 = vpop.eup %90 }
 0x139   :  { %v40_v22 = vmul.f32 %v91_v20, %v26_v9  ;;  %v57_v25 = vadd.f32 %v74_v23, %v48_v21 }
 0x13b   :  { %v49_v24 = vmul.f32 %v73_v19, %v40_v22 }
 0x13d   :  { %v58_v26 = vadd.f32 %v74_v23, %v49_v24 }
 0x13f   :  { %v86_v27 = vpack.c.bf16 %v58_v26, %v57_v25 }
 0x141   :  { %87 = vst [vmem:[%s127_s3] sm:$0xff] %v86_v27  }

// kernel: bart_with_pointer_generator.43
= control target key start
LH: loop header
LB: loop body
LE: loop exit
PB: predicated region body
PF: predicated region fallthrough
CT: control target
= control target key end

     0   :  { %v453_v0 = vmov 0.0   ;;  %vm454_vm0 = vmmov 0   ;;  %v455_v3 = vmov 0   ;;  %v306_v27 = vlaneseq  ;;  %s566_s1 = inlined_call_operand.vmem [shape: bf16[128,384], index: 1, kind: input, shape index: {}]   ;;  %s567_s0 = inlined_call_operand.vmem [shape: bf16[16,128], index: 0, kind: input, shape index: {}]   ;;  %s568_s2 = inlined_call_operand.vmem [shape: f32[1,384], index: 2, kind: input, shape index: {}]   ;;  %s569_s3 = inlined_call_operand.vmem [shape: bf16[16,384], index: 3, kind: output, shape index: {}]  }
   0x1   :  { %397 = vmatprep.subr.bf16.mxu1 %v453_v0  ;;  %v420_v1 = vld [vmem:[%s566_s1 + $0x4] ss:$12 sps:$4 sm:$0xff]   ;;  %413 = vmatprep.mubr.msk.bf16.mxu1 %vm454_vm0, %v453_v0  ;;  %v422_v2 = vld [vmem:[%s566_s1 + $0x8] ss:$12 sps:$4 sm:$0xff]   ;;  %v423_v4 = vld [vmem:[%s566_s1] ss:$12 sps:$4 sm:$0xff]  }
   0x2   :  { %231 = vmatprep.mubr.bf16.mxu0 %v455_v3  ;;  %199 = vmatprep.subr.bf16.mxu0 %v420_v1  ;;  %v424_v5 = vld [vmem:[%s566_s1 + $0x1c] ss:$12 sps:$4 sm:$0xff]   ;;  %v426_v6 = vld [vmem:[%s566_s1 + $0x20] ss:$12 sps:$4 sm:$0xff]   ;;  %v427_v7 = vld [vmem:[%s566_s1 + $0x18] ss:$12 sps:$4 sm:$0xff]  }
   0x3   :  { %398 = vmatpush3.bf16.msra.mxu1 %v422_v2  ;;  %200 = vmatpush1.bf16.msra.mxu0 %v423_v4  ;;  %v428_v8 = vld [vmem:[%s566_s1 + $0x34] ss:$12 sps:$4 sm:$0xff]   ;;  %v430_v9 = vld [vmem:[%s566_s1 + $0x38] ss:$12 sps:$4 sm:$0xff]   ;;  %v431_v10 = vld [vmem:[%s566_s1 + $0x30] ss:$12 sps:$4 sm:$0xff]  }
   0x4   :  { %399 = vmatprep.subr.bf16.mxu1 %v453_v0  ;;  %201 = vmatprep.subr.bf16.mxu0 %v424_v5  ;;  %v432_v11 = vld [vmem:[%s566_s1 + $0x4c] ss:$12 sps:$4 sm:$0xff]   ;;  %v434_v12 = vld [vmem:[%s566_s1 + $0x50] ss:$12 sps:$4 sm:$0xff]   ;;  %v435_v13 = vld [vmem:[%s566_s1 + $0x48] ss:$12 sps:$4 sm:$0xff]  }
   0x5   :  { %v436_v14 = vld [vmem:[%s566_s1 + $0x64] ss:$12 sps:$4 sm:$0xff]   ;;  %v438_v15 = vld [vmem:[%s566_s1 + $0x68] ss:$12 sps:$4 sm:$0xff]   ;;  %v439_v16 = vld [vmem:[%s566_s1 + $0x60] ss:$12 sps:$4 sm:$0xff]  }
   0x6   :  { %v440_v17 = vld [vmem:[%s566_s1 + $0x7c] ss:$12 sps:$4 sm:$0xff]   ;;  %v442_v18 = vld [vmem:[%s566_s1 + $0x80] ss:$12 sps:$4 sm:$0xff]   ;;  %v443_v19 = vld [vmem:[%s566_s1 + $0x78] ss:$12 sps:$4 sm:$0xff]  }
   0x7   :  { %400 = vmatpush3.bf16.msra.mxu1 %v426_v6  ;;  %202 = vmatpush1.bf16.msra.mxu0 %v427_v7  ;;  %v444_v20 = vld [vmem:[%s566_s1 + $0x94] ss:$12 sps:$4 sm:$0xff]   ;;  %v446_v21 = vld [vmem:[%s566_s1 + $0x98] ss:$12 sps:$4 sm:$0xff]   ;;  %v447_v22 = vld [vmem:[%s566_s1 + $0x90] ss:$12 sps:$4 sm:$0xff]  }
   0x8   :  { %401 = vmatprep.subr.bf16.mxu1 %v453_v0  ;;  %203 = vmatprep.subr.bf16.mxu0 %v428_v8  ;;  %v448_v23 = vld [vmem:[%s566_s1 + $0xac] ss:$12 sps:$4 sm:$0xff]   ;;  %v450_v24 = vld [vmem:[%s566_s1 + $0xb0] ss:$12 sps:$4 sm:$0xff]   ;;  %v451_v25 = vld [vmem:[%s566_s1 + $0xa8] ss:$12 sps:$4 sm:$0xff]  }
   0x9   :  { %v452_v26 = vld [vmem:[%s567_s0] sm:$0xff]   ;;  %v307_v28 = vshrl.u32 %v306_v27, 7 }
   0xa   :  { %v304_v30 = vld [vmem:[%s568_s2] sm:$0x7] }
   0xb   :  { %402 = vmatpush3.bf16.msra.mxu1 %v430_v9  ;;  %204 = vmatpush1.bf16.msra.mxu0 %v431_v10  ;;  %v316_v29 = vsub.s32 2, %v307_v28  ;;  %v308_v31 = vsub.s32 0, %v307_v28  ;;  %v312_v32 = vsub.s32 1, %v307_v28 }
   0xc   :  { %403 = vmatprep.subr.bf16.mxu1 %v453_v0  ;;  %205 = vmatprep.subr.bf16.mxu0 %v432_v11 }
   0xd   :  { %v317_v33 = vrot.slane %v304_v30, %v316_v29  ;;  %v309_v34 = vrot.slane %v304_v30, %v308_v31  ;;  %v313_v35 = vrot.slane %v304_v30, %v312_v32 }
   0xf   :  { %404 = vmatpush3.bf16.msra.mxu1 %v434_v12  ;;  %206 = vmatpush1.bf16.msra.mxu0 %v435_v13 }
  0x10   :  { %405 = vmatprep.subr.bf16.mxu1 %v453_v0  ;;  %207 = vmatprep.subr.bf16.mxu0 %v436_v14 }
  0x13   :  { %406 = vmatpush3.bf16.msra.mxu1 %v438_v15  ;;  %208 = vmatpush1.bf16.msra.mxu0 %v439_v16 }
  0x14   :  { %407 = vmatprep.subr.bf16.mxu1 %v453_v0  ;;  %209 = vmatprep.subr.bf16.mxu0 %v440_v17 }
  0x17   :  { %408 = vmatpush3.bf16.msra.mxu1 %v442_v18  ;;  %210 = vmatpush1.bf16.msra.mxu0 %v443_v19 }
  0x18   :  { %409 = vmatprep.subr.bf16.mxu1 %v453_v0  ;;  %211 = vmatprep.subr.bf16.mxu0 %v444_v20 }
  0x1b   :  { %410 = vmatpush3.bf16.msra.mxu1 %v446_v21  ;;  %212 = vmatpush1.bf16.msra.mxu0 %v447_v22 }
  0x1c   :  { %411 = vmatprep.subr.bf16.mxu1 %v453_v0  ;;  %213 = vmatprep.subr.bf16.mxu0 %v448_v23 }
  0x1f   :  { %412 = vmatpush3.bf16.msra.mxu1 %v450_v24  ;;  %214 = vmatpush1.bf16.msra.mxu0 %v451_v25 }
  0x22   :  { %414 = vmatmul.mubr.bf16.vlgmr.msra.gmra.mrb[0].mxu1 %v452_v26  ;;  %232 = vmatmul.mubr.bf16.vlgmr.msra.gmra.mrb[0].mxu0 %v452_v26 }
  0xf5   :  { %v276_v36 = vpop.f32.mrb[0].mxu1  ;;  %v233_v38 = vpop.f32.mrb[0].mxu0 }
  0xf6   :  { %v323_v37 = vadd.f32 %v317_v33, %v276_v36  ;;  %v415_v39 = vpop.f32.mrb[1].mxu1  ;;  %v321_v40 = vadd.f32 %v309_v34, %v233_v38  ;;  %v235_v41 = vpop.f32.mrb[1].mxu0 }
  0xf7   :  { %v279_v42 = vpop.f32.mrb[2].mxu1  ;;  %v322_v44 = vadd.f32 %v313_v35, %v235_v41  ;;  %v237_v46 = vpop.f32.mrb[2].mxu0 }
  0xf8   :  { %v385_v43 = vpack.c.bf16 %v323_v37, %v323_v37  ;;  %v326_v45 = vadd.f32 %v317_v33, %v279_v42  ;;  %v416_v47 = vpop.f32.mrb[3].mxu1  ;;  %v324_v48 = vadd.f32 %v309_v34, %v237_v46  ;;  %v239_v49 = vpop.f32.mrb[3].mxu0 }
  0xf9   :  { %v384_v50 = vpack.c.bf16 %v322_v44, %v321_v40  ;;  %v325_v52 = vadd.f32 %v313_v35, %v239_v49 }
  0xfa   :  { %348 = vst [vmem:[%s569_s3 + $0x8] sm:$0xf] %v385_v43  ;;  %v387_v51 = vpack.c.bf16 %v326_v45, %v326_v45 }
  0xfb   :  { %347 = vst [vmem:[%s569_s3] sm:$0xff] %v384_v50  ;;  %v386_v53 = vpack.c.bf16 %v325_v52, %v324_v48 }
  0xfc   :  { %350 = vst [vmem:[%s569_s3 + $0x14] sm:$0xf] %v387_v51 }
  0xfd   :  { %349 = vst [vmem:[%s569_s3 + $0xc] sm:$0xff] %v386_v53 }

// kernel: bart_with_pointer_generator.44
= control target key start
LH: loop header
LB: loop body
LE: loop exit
PB: predicated region body
PF: predicated region fallthrough
CT: control target
= control target key end

     0   :  { %s975_s15 = smov 0   ;;  %s1082_s0 = inlined_call_operand.vmem [shape: bf16[2,8,128], index: 0, kind: input, shape index: {}]   ;;  %s1083_s1 = inlined_call_operand.vmem [shape: bf16[2,8,128], index: 1, kind: input, shape index: {}]   ;;  %s1084_s2 = inlined_call_operand.vmem [shape: bf16[2,8,128], index: 2, kind: input, shape index: {}]   ;;  %s1085_s3 = inlined_call_operand.vmem [shape: f32[2,1,8], index: 3, kind: input, shape index: {}]   ;;  %s1086_s4 = inlined_call_operand.vmem [shape: bf16[2,8,128], index: 4, kind: output, shape index: {}]  }
   0x1 LB: > { %s819_s16 = sadd.s32 4294967295, %s943_s15   ;;  %p823_p0 = scmp.ge.s32.totalorder %s943_s15, 1  ;;  %s943_s15 = sphi %s975_s15, %s14_s15  }
   0x2   : > { %p187_p1 = scmp.lt.s32.totalorder %s943_s15, 3 }
   0x4   : > { %p188_p2 = pnand %p823_p0, %p187_p1 }
   0x5   : > { %p222_p3 = scmp.lt.s32.totalorder (!%p188_p2), %s819_s16, 1  ;;  %v945_v0 = vmov (!%p188_p2), 0.0   ;;  %vm946_vm0 = vmmov (!%p188_p2), 0   ;;  %vm260_vm1 = vcmask (!%p188_p2), 261120   ;;  %v249_v4 = vlaneseq (!%p188_p2)  ;;  %s947_s27 = smov (!%p188_p2), 96  }
   0x6   : > { %191 = sbr.rel (%p188_p2) target bundleno = 1481 (0x5c9), region = 36  ;;  %857 = vmatprep.subr.bf16.mxu0 (!%p188_p2), %v945_v0  ;;  %859 = vmatprep.mubr.msk.bf16.mxu0 (!%p188_p2), %vm946_vm0, %v945_v0  ;;  %vm309_vm3 = vcmask (!%p188_p2), 64512   ;;  %s948_s28 = smov (!%p188_p2), 64   ;;  %vm325_vm4 = vcmask (!%p188_p2), 1043456   ;;  %vm727_vm5 = vcmask (!%p188_p2), 523264   ;;  %vm729_vm6 = vcmask (!%p188_p2), 785408  }
   0x7   : > { %863 = vmatprep.subr.bf16.mxu1 (!%p188_p2), %v945_v0  ;;  %865 = vmatprep.mubr.msk.bf16.mxu1 (!%p188_p2), %vm946_vm0, %v945_v0  ;;  %v250_v7 = vshrl.u32 (!%p188_p2), %v249_v4, 7  ;;  %v257_v10 = vand.u32 (!%p188_p2), 127, %v249_v4  ;;  %s949_s29 = smov (!%p188_p2), 32  }
   0x9   : > { %v251_v9 = vsub.s32 (!%p188_p2), 0, %v250_v7  ;;  %vm258_vm2 = vcmp.le.s32.totalorder (!%p188_p2), %v257_v10, %v250_v7 }
   0xd   : > { %s1088_s16 = smov (!%p222_p3, %s819_s16), 1 }
   0xe   : > { %s989_s17 = sshll.u32 %s1088_s16, 2  ;;  %s236_s26 = scalar_lea.vmem %s1085_s3, %s1088_s16 }
   0xf   : > { %s229_s20 = scalar_lea.vmem %s1083_s1, %s989_s17  ;;  %s225_s23 = scalar_lea.vmem %s1082_s0, %s989_s17  ;;  %v245_v5 = vld [vmem:[%s236_s26] sm:$0x1] }
  0x10   : > { %v243_v1 = vld [vmem:[%s229_s20] sm:$0xf]  ;;  %v246_v6 = vsub.f32 1.0, %v245_v5  ;;  %s233_s6 = scalar_lea.vmem %s1084_s2, %s989_s17  ;;  %s240_s9 = scalar_lea.vmem %s1086_s4, %s989_s17 }
  0x11   : > { %v265_v2 = vsel %vm260_vm1, %v243_v1, 0  ;;  %v242_v3 = vld [vmem:[%s225_s23] sm:$0xf]  ;;  %v831_v20 = vcombine.low %v243_v1, %v243_v1 }
  0x12   : > { %858 = vmatpush3.bf16.xpose.msra.mxu0 %v265_v2  ;;  %v247_v8 = vmul.f32 -1e+09, %v246_v6  ;;  %v830_v21 = vcombine.low %v242_v3, %v242_v3  ;;  %v1021_v27 = vld [vmem:[%s233_s6] sm:$0xf] }
  0x13   : > { %875 = vmatprep.subr.bf16.mxu0 %v945_v0  ;;  %377 = vrot.lane.b32.xlu1 %v831_v20, %s947_s27  ;;  %v327_v28 = vsel %vm325_vm4, %v1021_v27, 0 }
  0x14   : > { %v252_v11 = vrot.slane %v247_v8, %v251_v9  ;;  %864 = vmatpush3.bf16.msra.mxu1 %v327_v28 }
  0x15   : > { %869 = vmatprep.subr.bf16.mxu1 %v945_v0 }
  0x16   : > { %v1007_v13 = vsel %vm258_vm2, %v252_v11, -1e+09 }
  0x17   : > { %372 = vrot.lane.b32.xlu1 %v830_v21, %s947_s27 }
  0x19   : > { %860 = vmatmul.mubr.msk.bf16.vlgmr.msra.gmra.mrb[0].mxu0 %vm260_vm1, %v242_v3 }
  0x1a   : > { %877 = vmatprep.mubr.msk.bf16.mxu0 %vm946_vm0, %v945_v0 }
  0x1b   : > { %490 = vrot.lane.b32.xlu1 %v830_v21, %s948_s28 }
  0x1f   : > { %604 = vrot.lane.b32.xlu1 %v831_v20, %s949_s29 }
  0x23   : > { %602 = vrot.lane.b32.xlu1 %v830_v21, %s949_s29 }
  0x85   : > { %v378_v31 = vpop.permute.xlu1 %377 }
  0x86   : > { %v383_v33 = vsel %vm260_vm1, %v378_v31, 0 }
  0x89   : > { %v373_v35 = vpop.permute.xlu1 %372 }
  0x8d   : > { %v491_v37 = vpop.permute.xlu1 %490 }
  0x91   : > { %v605_v39 = vpop.permute.xlu1 %604 }
  0x92   : > { %v610_v40 = vsel %vm260_vm1, %v605_v39, 0 }
  0x95   : > { %v603_v41 = vpop.permute.xlu1 %602 }
  0xec   : > { %v301_v12 = vpop.f32.mrb[0].mxu0 }
  0xed   : > { %v307_v14 = vmul.f32 0.17677669, %v301_v12  ;;  %v861_v15 = vpop.f32.mrb[1].mxu0 }
  0xee   : > { %v304_v16 = vpop.f32.mrb[2].mxu0 }
  0xef   : > { %v862_v17 = vpop.f32.mrb[3].mxu0  ;;  %v308_v18 = vadd.f32 %v307_v14, %v1007_v13 }
  0xf1   : > { %v310_v19 = vsel %vm309_vm3, %v308_v18, -inf }
  0xf2   : > { %311 = vmax.xlane.f32.xlu0 %v310_v19 }
 0x17f   : > { %v312_v22 = vpop.xlane.xlu0 %311 }
 0x180   : > { %v313_v23 = vsub.f32 %v308_v18, %v312_v22 }
 0x182   : > { %v314_v24 = vmul.f32 1.442695, %v313_v23 }
 0x184   : > { %921 = vpow2.f32 %v314_v24 }
 0x18e   : > { %v922_v25 = vpop.eup %921 }
 0x18f   : > { %v316_v26 = vsel %vm309_vm3, %v922_v25, 0.0 }
 0x190   : > { %317 = vadd.xlane.f32.xlu0 %v316_v26 }
 0x1a6   : > { %492 = vrot.lane.b32.xlu0 %v831_v20, %s948_s28 }
 0x21d   : > { %v318_v29 = vpop.xlane.xlu0 %317 }
 0x21e   : > { %923 = vrcp.f32 %v318_v29 }
 0x221   : > { %v493_v36 = vpop.permute.xlu0 %492 }
 0x222   : > { %v498_v38 = vsel %vm260_vm1, %v493_v36, 0 }
 0x228   : > { %v924_v30 = vpop.eup %923 }
 0x229   : > { %v320_v32 = vmul.f32 %v924_v30, %v922_v25 }
 0x22b   : > { %v321_v34 = vpack.c.bf16 %v320_v32, %v320_v32 }
 0x22d   : > { %866 = vmatmul.mubr.msk.bf16.vlgmr.msra.gmra.mrb[0].mxu1 %vm309_vm3, %v321_v34 }
 0x22e   : > { %870 = vmatpush3.bf16.xpose.msra.mxu1 %v383_v33  ;;  %871 = vmatprep.mubr.msk.bf16.mxu1 %vm946_vm0, %v945_v0 }
 0x22f   : > { %881 = vmatprep.subr.bf16.mxu1 %v945_v0 }
 0x235   : > { %872 = vmatmul.mubr.msk.bf16.vlgmr.msra.gmra.mrb[4].mxu1 %vm260_vm1, %v373_v35 }
 0x236   : > { %882 = vmatpush3.bf16.xpose.msra.mxu1 %v498_v38  ;;  %883 = vmatprep.mubr.msk.bf16.mxu1 %vm946_vm0, %v945_v0 }
 0x237   : > { %893 = vmatprep.subr.bf16.mxu1 %v945_v0 }
 0x23d   : > { %884 = vmatmul.mubr.msk.bf16.vlgmr.msra.gmra.mrb[8].mxu1 %vm260_vm1, %v491_v37 }
 0x23e   : > { %894 = vmatpush3.bf16.xpose.msra.mxu1 %v610_v40  ;;  %895 = vmatprep.mubr.msk.bf16.mxu1 %vm946_vm0, %v945_v0 }
 0x245   : > { %896 = vmatmul.mubr.msk.bf16.vlgmr.msra.gmra.mrb[12].mxu1 %vm260_vm1, %v603_v41 }
 0x300   : > { %v1042_v42 = vpop.f32.mrb[0].mxu1 }
 0x301   : > { %v867_v43 = vpop.f32.mrb[1].mxu1 }
 0x302   : > { %v366_v44 = vpop.f32.mrb[2].mxu1 }
 0x303   : > { %v868_v45 = vpop.f32.mrb[3].mxu1 }
 0x308   : > { %v419_v46 = vpop.f32.mrb[4].mxu1 }
 0x309   : > { %v425_v47 = vmul.f32 0.17677669, %v419_v46  ;;  %v873_v48 = vpop.f32.mrb[5].mxu1 }
 0x30a   : > { %v422_v49 = vpop.f32.mrb[6].mxu1 }
 0x30b   : > { %v874_v50 = vpop.f32.mrb[7].mxu1  ;;  %v426_v51 = vadd.f32 %v425_v47, %v1007_v13 }
 0x30d   : > { %v427_v52 = vsel %vm309_vm3, %v426_v51, -inf }
 0x30e   : > { %428 = vmax.xlane.f32.xlu1 %v427_v52 }
 0x310   : > { %v534_v53 = vpop.f32.mrb[8].mxu1 }
 0x311   : > { %v540_v54 = vmul.f32 0.17677669, %v534_v53  ;;  %v885_v55 = vpop.f32.mrb[9].mxu1 }
 0x312   : > { %v537_v56 = vpop.f32.mrb[10].mxu1 }
 0x313   : > { %v541_v57 = vadd.f32 %v540_v54, %v1007_v13  ;;  %v886_v58 = vpop.f32.mrb[11].mxu1 }
 0x315   : > { %v542_v59 = vsel %vm309_vm3, %v541_v57, -inf }
 0x316   : > { %543 = vmax.xlane.f32.xlu0 %v542_v59 }
 0x318   : > { %v646_v60 = vpop.f32.mrb[12].mxu1 }
 0x319   : > { %v652_v61 = vmul.f32 0.17677669, %v646_v60  ;;  %v897_v62 = vpop.f32.mrb[13].mxu1 }
 0x31a   : > { %v649_v63 = vpop.f32.mrb[14].mxu1 }
 0x31b   : > { %v653_v1 = vadd.f32 %v652_v61, %v1007_v13  ;;  %v898_v2 = vpop.f32.mrb[15].mxu1  ;;  %v833_v13 = vcombine.low %v1021_v27, %v1021_v27 }
 0x31d   : > { %v654_v3 = vsel %vm309_vm3, %v653_v1, -inf }
 0x31e   : > { %655 = vmax.xlane.f32.xlu1 %v654_v3 }
 0x39b   : > { %v429_v4 = vpop.xlane.xlu1 %428 }
 0x39c   : > { %v430_v5 = vsub.f32 %v426_v51, %v429_v4 }
 0x39e   : > { %v431_v6 = vmul.f32 1.442695, %v430_v5 }
 0x3a0   : > { %925 = vpow2.f32 %v431_v6 }
 0x3a3   : > { %v544_v7 = vpop.xlane.xlu0 %543 }
 0x3a4   : > { %v545_v8 = vsub.f32 %v541_v57, %v544_v7 }
 0x3a6   : > { %v546_v9 = vmul.f32 1.442695, %v545_v8 }
 0x3a8   : > { %927 = vpow2.f32 %v546_v9 }
 0x3aa   : > { %v926_v10 = vpop.eup %925 }
 0x3ab   : > { %v433_v11 = vsel %vm309_vm3, %v926_v10, 0.0  ;;  %v656_v15 = vpop.xlane.xlu1 %655 }
 0x3ac   : > { %434 = vadd.xlane.f32.xlu1 %v433_v11  ;;  %v657_v16 = vsub.f32 %v653_v1, %v656_v15 }
 0x3ae   : > { %v658_v17 = vmul.f32 1.442695, %v657_v16 }
 0x3b0   : > { %929 = vpow2.f32 %v658_v17 }
 0x3b2   : > { %v928_v12 = vpop.eup %927 }
 0x3b3   : > { %v548_v14 = vsel %vm309_vm3, %v928_v12, 0.0 }
 0x3b4   : > { %549 = vadd.xlane.f32.xlu0 %v548_v14 }
 0x3ba   : > { %v930_v18 = vpop.eup %929 }
 0x3bb   : > { %v660_v19 = vsel %vm309_vm3, %v930_v18, 0.0 }
 0x3bd   : > { %554 = vrot.lane.b32.xlu1 %v833_v13, %s948_s28 }
 0x3ca   : > { %442 = vrot.lane.b32.xlu0 %v833_v13, %s947_s27 }
 0x3e1   : > { %661 = vadd.xlane.f32.xlu1 %v660_v19 }
 0x3f2   : > { %666 = vrot.lane.b32.xlu1 %v833_v13, %s949_s29 }
 0x439   : > { %v435_v20 = vpop.xlane.xlu1 %434 }
 0x43a   : > { %931 = vrcp.f32 %v435_v20 }
 0x43d   : > { %v555_v26 = vpop.permute.xlu1 %554 }
 0x43e   : > { %v560_v28 = vsel %vm325_vm4, %v555_v26, 0 }
 0x441   : > { %v550_v21 = vpop.xlane.xlu0 %549 }
 0x442   : > { %933 = vrcp.f32 %v550_v21 }
 0x444   : > { %v932_v22 = vpop.eup %931 }
 0x445   : > { %v437_v23 = vmul.f32 %v932_v22, %v926_v10  ;;  %v443_v24 = vpop.permute.xlu0 %442 }
 0x446   : > { %v448_v25 = vsel %vm325_vm4, %v443_v24, 0 }
 0x447   : > { %876 = vmatpush3.bf16.msra.mxu0 %v448_v25  ;;  %v438_v27 = vpack.c.bf16 %v437_v23, %v437_v23 }
 0x448   : > { %887 = vmatprep.subr.bf16.mxu0 %v945_v0 }
 0x44a   : > { %878 = vmatmul.mubr.msk.bf16.vlgmr.msra.gmra.mrb[4].mxu0 %vm309_vm3, %v438_v27 }
 0x44b   : > { %888 = vmatpush3.bf16.msra.mxu0 %v560_v28  ;;  %889 = vmatprep.mubr.msk.bf16.mxu0 %vm946_vm0, %v945_v0 }
 0x44c   : > { %v934_v29 = vpop.eup %933  ;;  %899 = vmatprep.subr.bf16.mxu0 %v945_v0 }
 0x44d   : > { %v552_v30 = vmul.f32 %v934_v29, %v928_v12 }
 0x44f   : > { %v553_v31 = vpack.c.bf16 %v552_v30, %v552_v30 }
 0x452   : > { %890 = vmatmul.mubr.msk.bf16.vlgmr.msra.gmra.mrb[8].mxu0 %vm309_vm3, %v553_v31 }
 0x453   : > { %901 = vmatprep.mubr.msk.bf16.mxu0 %vm946_vm0, %v945_v0 }
 0x46e   : > { %v662_v32 = vpop.xlane.xlu1 %661 }
 0x46f   : > { %935 = vrcp.f32 %v662_v32 }
 0x472   : > { %v667_v33 = vpop.permute.xlu1 %666 }
 0x473   : > { %v672_v34 = vsel %vm325_vm4, %v667_v33, 0 }
 0x474   : > { %900 = vmatpush3.bf16.msra.mxu0 %v672_v34 }
 0x479   : > { %v936_v35 = vpop.eup %935 }
 0x47a   : > { %v664_v36 = vmul.f32 %v936_v35, %v930_v18 }
 0x47c   : > { %v665_v37 = vpack.c.bf16 %v664_v36, %v664_v36 }
 0x47e   : > { %902 = vmatmul.mubr.msk.bf16.vlgmr.msra.gmra.mrb[12].mxu0 %vm309_vm3, %v665_v37 }
 0x51d   : > { %v484_v38 = vpop.f32.mrb[4].mxu0 }
 0x51e   : > { %715 = vrot.lane.b32.xlu0 %v484_v38, %s949_s29  ;;  %v879_v39 = vpop.f32.mrb[5].mxu0 }
 0x51f   : > { %v487_v40 = vpop.f32.mrb[6].mxu0 }
 0x520   : > { %v880_v41 = vpop.f32.mrb[7].mxu0 }
 0x525   : > { %v596_v43 = vpop.f32.mrb[8].mxu0 }
 0x526   : > { %719 = vrot.lane.b32.xlu1 %v596_v43, %s948_s28  ;;  %v891_v0 = vpop.f32.mrb[9].mxu0 }
 0x527   : > { %v599_v44 = vpop.f32.mrb[10].mxu0 }
 0x528   : > { %v892_v45 = vpop.f32.mrb[11].mxu0 }
 0x551   : > { %v708_v46 = vpop.f32.mrb[12].mxu0 }
 0x552   : > { %723 = vrot.lane.b32.xlu0 %v708_v46, %s947_s27  ;;  %v903_v47 = vpop.f32.mrb[13].mxu0 }
 0x553   : > { %v711_v48 = vpop.f32.mrb[14].mxu0 }
 0x554   : > { %v904_v49 = vpop.f32.mrb[15].mxu0 }
 0x590   : > { %v716_v50 = vpop.permute.xlu0 %715 }
 0x591   : > { %v726_v52 = vsel %vm260_vm1, %v1042_v42, %v716_v50 }
 0x598   : > { %v720_v51 = vpop.permute.xlu1 %719 }
 0x599   : > { %v728_v53 = vsel %vm727_vm5, %v726_v52, %v720_v51 }
 0x5c4   : > { %v724_v54 = vpop.permute.xlu0 %723 }
 0x5c5   : > { %v730_v55 = vsel %vm729_vm6, %v728_v53, %v724_v54 }
 0x5c6   : > { %v731_v56 = vpack.c.bf16 %v730_v55, %v730_v55 }
 0x5c8   : > { %732 = vst [vmem:[%s240_s9] sm:$0xf] %v731_v56 }
 0x5c9 PF: > { %s14_s15 = sadd.s32 1, %s943_s15  }
 0x5ca   : > { %p11_p4 = scmp.ge.s32.totalorder %s14_s15, 4  }
 0x5cc   :  { %13 = sbr.rel (!%p11_p4) target bundleno = 1 (0x1), region = 75 }

// kernel: bart_with_pointer_generator.46
= control target key start
LH: loop header
LB: loop body
LE: loop exit
PB: predicated region body
PF: predicated region fallthrough
CT: control target
= control target key end

     0   :  { %v227_v0 = vmov 0.0   ;;  %vm228_vm0 = vmmov 0   ;;  %s282_s1 = inlined_call_operand.vmem [shape: bf16[128,128], index: 1, kind: input, shape index: {}]   ;;  %s283_s0 = inlined_call_operand.vmem [shape: bf16[16,128], index: 0, kind: input, shape index: {}]   ;;  %s284_s2 = inlined_call_operand.vmem [shape: f32[1,128], index: 2, kind: input, shape index: {}]   ;;  %s285_s3 = inlined_call_operand.vmem [shape: bf16[16,128], index: 3, kind: output, shape index: {}]  }
   0x1   :  { %196 = vmatprep.subr.bf16.mxu0 %v227_v0  ;;  %v218_v1 = vld [vmem:[%s282_s1] sm:$0xff]   ;;  %212 = vmatprep.mubr.msk.bf16.mxu0 %vm228_vm0, %v227_v0  ;;  %v219_v2 = vld [vmem:[%s282_s1 + $0x8] sm:$0xff]   ;;  %v220_v3 = vld [vmem:[%s282_s1 + $0x10] sm:$0xff]  }
   0x2   :  { %197 = vmatpush3.bf16.msra.mxu0 %v218_v1  ;;  %v221_v4 = vld [vmem:[%s282_s1 + $0x18] sm:$0xff]   ;;  %v222_v5 = vld [vmem:[%s282_s1 + $0x20] sm:$0xff]   ;;  %v223_v6 = vld [vmem:[%s282_s1 + $0x28] sm:$0xff]  }
   0x3   :  { %198 = vmatprep.subr.bf16.mxu0 %v227_v0  ;;  %v224_v7 = vld [vmem:[%s282_s1 + $0x30] sm:$0xff]   ;;  %v225_v8 = vld [vmem:[%s282_s1 + $0x38] sm:$0xff]   ;;  %v226_v9 = vld [vmem:[%s283_s0] sm:$0xff]  }
   0x4   :  { %v177_v11 = vld [vmem:[%s284_s2] ss:$0 sm:$0xff] }
   0x6   :  { %199 = vmatpush3.bf16.msra.mxu0 %v219_v2 }
   0x7   :  { %200 = vmatprep.subr.bf16.mxu0 %v227_v0 }
   0xa   :  { %201 = vmatpush3.bf16.msra.mxu0 %v220_v3 }
   0xb   :  { %202 = vmatprep.subr.bf16.mxu0 %v227_v0 }
   0xe   :  { %203 = vmatpush3.bf16.msra.mxu0 %v221_v4 }
   0xf   :  { %204 = vmatprep.subr.bf16.mxu0 %v227_v0 }
  0x12   :  { %205 = vmatpush3.bf16.msra.mxu0 %v222_v5 }
  0x13   :  { %206 = vmatprep.subr.bf16.mxu0 %v227_v0 }
  0x16   :  { %207 = vmatpush3.bf16.msra.mxu0 %v223_v6 }
  0x17   :  { %208 = vmatprep.subr.bf16.mxu0 %v227_v0 }
  0x1a   :  { %209 = vmatpush3.bf16.msra.mxu0 %v224_v7 }
  0x1b   :  { %210 = vmatprep.subr.bf16.mxu0 %v227_v0 }
  0x1e   :  { %211 = vmatpush3.bf16.msra.mxu0 %v225_v8 }
  0x21   :  { %213 = vmatmul.mubr.bf16.vlgmr.msra.gmra.mrb[0].mxu0 %v226_v9 }
  0xf4   :  { %v129_v10 = vpop.f32.mrb[0].mxu0 }
  0xf5   :  { %v214_v12 = vpop.f32.mrb[1].mxu0  ;;  %v152_v14 = vadd.f32 %v177_v11, %v129_v10 }
  0xf6   :  { %v132_v13 = vpop.f32.mrb[2].mxu0 }
  0xf7   :  { %v153_v15 = vadd.f32 %v177_v11, %v132_v13  ;;  %v215_v16 = vpop.f32.mrb[3].mxu0 }
  0xf9   :  { %v185_v17 = vpack.c.bf16 %v153_v15, %v152_v14 }
  0xfb   :  { %186 = vst [vmem:[%s285_s3] sm:$0xff] %v185_v17  }

// kernel: bart_with_pointer_generator.35
= control target key start
LH: loop header
LB: loop body
LE: loop exit
PB: predicated region body
PF: predicated region fallthrough
CT: control target
= control target key end

     0   :  { %v589_v1 = vmov 0   ;;  %v350_v34 = vlaneseq  ;;  %s780_s1 = inlined_call_operand.vmem [shape: bf16[128,512], index: 1, kind: input, shape index: {}]   ;;  %s781_s0 = inlined_call_operand.vmem [shape: bf16[16,128], index: 0, kind: input, shape index: {}]   ;;  %s782_s2 = inlined_call_operand.vmem [shape: f32[1,512], index: 2, kind: input, shape index: {}]   ;;  %s783_s3 = inlined_call_operand.vmem [shape: bf16[16,512], index: 3, kind: output, shape index: {}]  }
   0x1   :  { %v524_v0 = vld [vmem:[%s780_s1 + $0x4] ss:$16 sps:$4 sm:$0xff]   ;;  %267 = vmatprep.mubr.bf16.mxu0 %v589_v1  ;;  %310 = vmatprep.mubr.bf16.mxu1 %v589_v1  ;;  %v526_v2 = vld [vmem:[%s780_s1 + $0xc] ss:$16 sps:$4 sm:$0xff]   ;;  %v528_v3 = vld [vmem:[%s780_s1] ss:$16 sps:$4 sm:$0xff]  }
   0x2   :  { %235 = vmatprep.subr.bf16.mxu0 %v524_v0  ;;  %v529_v4 = vld [vmem:[%s780_s1 + $0x8] ss:$16 sps:$4 sm:$0xff]   ;;  %278 = vmatprep.subr.bf16.mxu1 %v526_v2  ;;  %v530_v5 = vld [vmem:[%s780_s1 + $0x24] ss:$16 sps:$4 sm:$0xff]   ;;  %v532_v6 = vld [vmem:[%s780_s1 + $0x2c] ss:$16 sps:$4 sm:$0xff]  }
   0x3   :  { %236 = vmatpush1.bf16.msra.mxu0 %v528_v3  ;;  %279 = vmatpush1.bf16.msra.mxu1 %v529_v4  ;;  %v534_v7 = vld [vmem:[%s780_s1 + $0x20] ss:$16 sps:$4 sm:$0xff]   ;;  %v535_v8 = vld [vmem:[%s780_s1 + $0x28] ss:$16 sps:$4 sm:$0xff]   ;;  %v536_v9 = vld [vmem:[%s780_s1 + $0x44] ss:$16 sps:$4 sm:$0xff]  }
   0x4   :  { %237 = vmatprep.subr.bf16.mxu0 %v530_v5  ;;  %280 = vmatprep.subr.bf16.mxu1 %v532_v6  ;;  %v538_v10 = vld [vmem:[%s780_s1 + $0x4c] ss:$16 sps:$4 sm:$0xff]   ;;  %v540_v11 = vld [vmem:[%s780_s1 + $0x40] ss:$16 sps:$4 sm:$0xff]   ;;  %v541_v12 = vld [vmem:[%s780_s1 + $0x48] ss:$16 sps:$4 sm:$0xff]  }
   0x5   :  { %v542_v13 = vld [vmem:[%s780_s1 + $0x64] ss:$16 sps:$4 sm:$0xff]   ;;  %v544_v14 = vld [vmem:[%s780_s1 + $0x6c] ss:$16 sps:$4 sm:$0xff]   ;;  %v546_v15 = vld [vmem:[%s780_s1 + $0x60] ss:$16 sps:$4 sm:$0xff]  }
   0x6   :  { %v547_v16 = vld [vmem:[%s780_s1 + $0x68] ss:$16 sps:$4 sm:$0xff]   ;;  %v548_v17 = vld [vmem:[%s780_s1 + $0x84] ss:$16 sps:$4 sm:$0xff]   ;;  %v550_v18 = vld [vmem:[%s780_s1 + $0x8c] ss:$16 sps:$4 sm:$0xff]  }
   0x7   :  { %238 = vmatpush1.bf16.msra.mxu0 %v534_v7  ;;  %281 = vmatpush1.bf16.msra.mxu1 %v535_v8  ;;  %v552_v19 = vld [vmem:[%s780_s1 + $0x80] ss:$16 sps:$4 sm:$0xff]   ;;  %v553_v20 = vld [vmem:[%s780_s1 + $0x88] ss:$16 sps:$4 sm:$0xff]   ;;  %v554_v21 = vld [vmem:[%s780_s1 + $0xa4] ss:$16 sps:$4 sm:$0xff]  }
   0x8   :  { %239 = vmatprep.subr.bf16.mxu0 %v536_v9  ;;  %282 = vmatprep.subr.bf16.mxu1 %v538_v10  ;;  %v556_v22 = vld [vmem:[%s780_s1 + $0xac] ss:$16 sps:$4 sm:$0xff]   ;;  %v558_v23 = vld [vmem:[%s780_s1 + $0xa0] ss:$16 sps:$4 sm:$0xff]   ;;  %v559_v24 = vld [vmem:[%s780_s1 + $0xa8] ss:$16 sps:$4 sm:$0xff]  }
   0x9   :  { %v560_v25 = vld [vmem:[%s780_s1 + $0xc4] ss:$16 sps:$4 sm:$0xff]   ;;  %v562_v26 = vld [vmem:[%s780_s1 + $0xcc] ss:$16 sps:$4 sm:$0xff]   ;;  %v564_v27 = vld [vmem:[%s780_s1 + $0xc0] ss:$16 sps:$4 sm:$0xff]  }
   0xa   :  { %v565_v28 = vld [vmem:[%s780_s1 + $0xc8] ss:$16 sps:$4 sm:$0xff]   ;;  %v566_v29 = vld [vmem:[%s780_s1 + $0xe4] ss:$16 sps:$4 sm:$0xff]   ;;  %v568_v30 = vld [vmem:[%s780_s1 + $0xec] ss:$16 sps:$4 sm:$0xff]  }
   0xb   :  { %240 = vmatpush1.bf16.msra.mxu0 %v540_v11  ;;  %283 = vmatpush1.bf16.msra.mxu1 %v541_v12  ;;  %v570_v31 = vld [vmem:[%s780_s1 + $0xe0] ss:$16 sps:$4 sm:$0xff]   ;;  %v571_v32 = vld [vmem:[%s780_s1 + $0xe8] ss:$16 sps:$4 sm:$0xff]   ;;  %v351_v35 = vshrl.u32 %v350_v34, 7 }
   0xc   :  { %241 = vmatprep.subr.bf16.mxu0 %v542_v13  ;;  %284 = vmatprep.subr.bf16.mxu1 %v544_v14  ;;  %v572_v33 = vld [vmem:[%s781_s0] sm:$0xff]  }
   0xd   :  { %v352_v36 = vsub.s32 0, %v351_v35  ;;  %v360_v37 = vsub.s32 2, %v351_v35  ;;  %v348_v38 = vld [vmem:[%s782_s2] sm:$0xf]  ;;  %v356_v39 = vsub.s32 1, %v351_v35  ;;  %v364_v40 = vsub.s32 3, %v351_v35 }
   0xf   :  { %242 = vmatpush1.bf16.msra.mxu0 %v546_v15  ;;  %285 = vmatpush1.bf16.msra.mxu1 %v547_v16  ;;  %v353_v41 = vrot.slane %v348_v38, %v352_v36  ;;  %v361_v42 = vrot.slane %v348_v38, %v360_v37  ;;  %v357_v43 = vrot.slane %v348_v38, %v356_v39 }
  0x10   :  { %243 = vmatprep.subr.bf16.mxu0 %v548_v17  ;;  %286 = vmatprep.subr.bf16.mxu1 %v550_v18  ;;  %v365_v44 = vrot.slane %v348_v38, %v364_v40 }
  0x13   :  { %244 = vmatpush1.bf16.msra.mxu0 %v552_v19  ;;  %287 = vmatpush1.bf16.msra.mxu1 %v553_v20 }
  0x14   :  { %245 = vmatprep.subr.bf16.mxu0 %v554_v21  ;;  %288 = vmatprep.subr.bf16.mxu1 %v556_v22 }
  0x17   :  { %246 = vmatpush1.bf16.msra.mxu0 %v558_v23  ;;  %289 = vmatpush1.bf16.msra.mxu1 %v559_v24 }
  0x18   :  { %247 = vmatprep.subr.bf16.mxu0 %v560_v25  ;;  %290 = vmatprep.subr.bf16.mxu1 %v562_v26 }
  0x1b   :  { %248 = vmatpush1.bf16.msra.mxu0 %v564_v27  ;;  %291 = vmatpush1.bf16.msra.mxu1 %v565_v28 }
  0x1c   :  { %249 = vmatprep.subr.bf16.mxu0 %v566_v29  ;;  %292 = vmatprep.subr.bf16.mxu1 %v568_v30 }
  0x1f   :  { %250 = vmatpush1.bf16.msra.mxu0 %v570_v31  ;;  %293 = vmatpush1.bf16.msra.mxu1 %v571_v32 }
  0x22   :  { %268 = vmatmul.mubr.bf16.vlgmr.msra.gmra.mrb[0].mxu0 %v572_v33  ;;  %311 = vmatmul.mubr.bf16.vlgmr.msra.gmra.mrb[0].mxu1 %v572_v33 }
  0xf5   :  { %v269_v45 = vpop.f32.mrb[0].mxu0  ;;  %v312_v46 = vpop.f32.mrb[0].mxu1 }
  0xf6   :  { %v712_v47 = vadd.f32 %v353_v41, %v269_v45  ;;  %v714_v48 = vadd.f32 %v361_v42, %v312_v46  ;;  %v271_v49 = vpop.f32.mrb[1].mxu0  ;;  %v314_v50 = vpop.f32.mrb[1].mxu1 }
  0xf7   :  { %v716_v51 = vadd.f32 %v357_v43, %v271_v49  ;;  %v718_v52 = vadd.f32 %v365_v44, %v314_v50  ;;  %v273_v53 = vpop.f32.mrb[2].mxu0  ;;  %v316_v54 = vpop.f32.mrb[2].mxu1 }
  0xf8   :  { %v386_v55 = vmul.f32 0.044715, %v712_v47  ;;  %v388_v56 = vmul.f32 0.044715, %v714_v48  ;;  %v726_v61 = vadd.f32 %v353_v41, %v273_v53  ;;  %v728_v62 = vadd.f32 %v361_v42, %v316_v54  ;;  %v275_v63 = vpop.f32.mrb[3].mxu0  ;;  %v318_v0 = vpop.f32.mrb[3].mxu1 }
  0xf9   :  { %v387_v57 = vmul.f32 0.044715, %v716_v51  ;;  %v389_v58 = vmul.f32 0.044715, %v718_v52  ;;  %v732_v3 = vadd.f32 %v357_v43, %v275_v63  ;;  %v743_v13 = vadd.f32 %v365_v44, %v318_v0 }
  0xfa   :  { %v394_v59 = vmul.f32 %v386_v55, %v712_v47  ;;  %v396_v60 = vmul.f32 %v388_v56, %v714_v48  ;;  %v390_v6 = vmul.f32 0.044715, %v726_v61  ;;  %v392_v9 = vmul.f32 0.044715, %v728_v62 }
  0xfb   :  { %v395_v1 = vmul.f32 %v387_v57, %v716_v51  ;;  %v397_v2 = vmul.f32 %v389_v58, %v718_v52  ;;  %v391_v17 = vmul.f32 0.044715, %v732_v3  ;;  %v393_v26 = vmul.f32 0.044715, %v743_v13 }
  0xfc   :  { %v402_v4 = vmul.f32 %v394_v59, %v712_v47  ;;  %v404_v5 = vmul.f32 %v396_v60, %v714_v48  ;;  %v398_v12 = vmul.f32 %v390_v6, %v726_v61  ;;  %v400_v16 = vmul.f32 %v392_v9, %v728_v62 }
  0xfd   :  { %v403_v7 = vmul.f32 %v395_v1, %v716_v51  ;;  %v405_v8 = vmul.f32 %v397_v2, %v718_v52  ;;  %v399_v24 = vmul.f32 %v391_v17, %v732_v3  ;;  %v401_v30 = vmul.f32 %v393_v26, %v743_v13 }
  0xfe   :  { %v410_v10 = vadd.f32 %v402_v4, %v712_v47  ;;  %v412_v11 = vadd.f32 %v404_v5, %v714_v48  ;;  %v406_v20 = vmul.f32 %v398_v12, %v726_v61  ;;  %v408_v23 = vmul.f32 %v400_v16, %v728_v62 }
  0xff   :  { %v411_v14 = vadd.f32 %v403_v7, %v716_v51  ;;  %v413_v15 = vadd.f32 %v405_v8, %v718_v52  ;;  %v407_v28 = vmul.f32 %v399_v24, %v732_v3  ;;  %v409_v33 = vmul.f32 %v401_v30, %v743_v13 }
 0x100   :  { %v418_v18 = vmul.f32 0.7978846, %v410_v10  ;;  %v420_v19 = vmul.f32 0.7978846, %v412_v11  ;;  %v414_v25 = vadd.f32 %v406_v20, %v726_v61  ;;  %v416_v27 = vadd.f32 %v408_v23, %v728_v62 }
 0x101   :  { %v419_v21 = vmul.f32 0.7978846, %v411_v14  ;;  %v421_v22 = vmul.f32 0.7978846, %v413_v15  ;;  %v415_v32 = vadd.f32 %v407_v28, %v732_v3  ;;  %v417_v35 = vadd.f32 %v409_v33, %v743_v13 }
 0x102   :  { %573 = vtanh.f32 %v418_v18  ;;  %v422_v29 = vmul.f32 0.7978846, %v414_v25  ;;  %v424_v31 = vmul.f32 0.7978846, %v416_v27  ;;  %v378_v39 = vmul.f32 0.5, %v712_v47 }
 0x103   :  { %575 = vtanh.f32 %v420_v19  ;;  %v423_v34 = vmul.f32 0.7978846, %v415_v32  ;;  %v425_v36 = vmul.f32 0.7978846, %v417_v35  ;;  %v380_v42 = vmul.f32 0.5, %v714_v48 }
 0x104   :  { %577 = vtanh.f32 %v419_v21  ;;  %v379_v46 = vmul.f32 0.5, %v716_v51  ;;  %v381_v54 = vmul.f32 0.5, %v718_v52  ;;  %v382_v47 = vmul.f32 0.5, %v726_v61 }
 0x105   :  { %579 = vtanh.f32 %v421_v22  ;;  %v383_v2 = vmul.f32 0.5, %v732_v3  ;;  %v384_v52 = vmul.f32 0.5, %v728_v62  ;;  %v385_v6 = vmul.f32 0.5, %v743_v13 }
 0x106   :  { %581 = vtanh.f32 %v422_v29 }
 0x107   :  { %583 = vtanh.f32 %v424_v31 }
 0x108   :  { %585 = vtanh.f32 %v423_v34 }
 0x109   :  { %587 = vtanh.f32 %v425_v36 }
 0x10c   :  { %v574_v37 = vpop.eup %573 }
 0x10d   :  { %v576_v38 = vpop.eup %575  ;;  %v434_v40 = vadd.f32 1.0, %v574_v37 }
 0x10e   :  { %v578_v41 = vpop.eup %577  ;;  %v436_v43 = vadd.f32 1.0, %v576_v38 }
 0x10f   :  { %v580_v44 = vpop.eup %579  ;;  %v442_v45 = vmul.f32 %v434_v40, %v378_v39  ;;  %v435_v49 = vadd.f32 1.0, %v578_v41 }
 0x110   :  { %v582_v50 = vpop.eup %581  ;;  %v444_v53 = vmul.f32 %v436_v43, %v380_v42  ;;  %v437_v55 = vadd.f32 1.0, %v580_v44 }
 0x111   :  { %v584_v56 = vpop.eup %583  ;;  %v443_v57 = vmul.f32 %v435_v49, %v379_v46  ;;  %v438_v58 = vadd.f32 1.0, %v582_v50 }
 0x112   :  { %v445_v59 = vmul.f32 %v437_v55, %v381_v54  ;;  %v586_v60 = vpop.eup %585  ;;  %v440_v48 = vadd.f32 1.0, %v584_v56 }
 0x113   :  { %v519_v63 = vpack.c.bf16 %v443_v57, %v442_v45  ;;  %v446_v1 = vmul.f32 %v438_v58, %v382_v47  ;;  %v439_v51 = vadd.f32 1.0, %v586_v60  ;;  %v588_v4 = vpop.eup %587 }
 0x114   :  { %v520_v0 = vpack.c.bf16 %v445_v59, %v444_v53  ;;  %v448_v5 = vmul.f32 %v440_v48, %v384_v52  ;;  %v441_v7 = vadd.f32 1.0, %v588_v4 }
 0x115   :  { %474 = vst [vmem:[%s783_s3] sm:$0xff] %v519_v63  ;;  %v447_v61 = vmul.f32 %v439_v51, %v383_v2 }
 0x116   :  { %475 = vst [vmem:[%s783_s3 + $0x8] sm:$0xff] %v520_v0  ;;  %v449_v9 = vmul.f32 %v441_v7, %v385_v6 }
 0x117   :  { %v521_v8 = vpack.c.bf16 %v447_v61, %v446_v1 }
 0x118   :  { %v522_v3 = vpack.c.bf16 %v449_v9, %v448_v5 }
 0x119   :  { %476 = vst [vmem:[%s783_s3 + $0x10] sm:$0xff] %v521_v8 }
 0x11a   :  { %477 = vst [vmem:[%s783_s3 + $0x18] sm:$0xff] %v522_v3 }

// kernel: bart_with_pointer_generator.33
= control target key start
LH: loop header
LB: loop body
LE: loop exit
PB: predicated region body
PF: predicated region fallthrough
CT: control target
= control target key end

     0   :  { %s969_s15 = smov 0   ;;  %s1076_s0 = inlined_call_operand.vmem [shape: bf16[2,8,128], index: 0, kind: input, shape index: {}]   ;;  %s1077_s1 = inlined_call_operand.vmem [shape: bf16[2,8,128], index: 1, kind: input, shape index: {}]   ;;  %s1078_s2 = inlined_call_operand.vmem [shape: bf16[2,8,128], index: 2, kind: input, shape index: {}]   ;;  %s1079_s3 = inlined_call_operand.vmem [shape: f32[2,1,8], index: 3, kind: input, shape index: {}]   ;;  %s1080_s4 = inlined_call_operand.vmem [shape: bf16[2,8,128], index: 4, kind: output, shape index: {}]  }
   0x1 LB: > { %s813_s16 = sadd.s32 4294967295, %s937_s15   ;;  %p817_p0 = scmp.ge.s32.totalorder %s937_s15, 1  ;;  %s937_s15 = sphi %s969_s15, %s14_s15  }
   0x2   : > { %p187_p1 = scmp.lt.s32.totalorder %s937_s15, 3 }
   0x4   : > { %p188_p2 = pnand %p817_p0, %p187_p1 }
   0x5   : > { %p222_p3 = scmp.lt.s32.totalorder (!%p188_p2), %s813_s16, 1  ;;  %v939_v0 = vmov (!%p188_p2), 0.0   ;;  %vm940_vm0 = vmmov (!%p188_p2), 0   ;;  %vm254_vm1 = vcmask (!%p188_p2), 261120   ;;  %v249_v4 = vlaneseq (!%p188_p2)  ;;  %s941_s27 = smov (!%p188_p2), 96  }
   0x6   : > { %191 = sbr.rel (%p188_p2) target bundleno = 1481 (0x5c9), region = 36  ;;  %851 = vmatprep.subr.bf16.mxu0 (!%p188_p2), %v939_v0  ;;  %853 = vmatprep.mubr.msk.bf16.mxu0 (!%p188_p2), %vm940_vm0, %v939_v0  ;;  %vm303_vm2 = vcmask (!%p188_p2), 64512   ;;  %s942_s28 = smov (!%p188_p2), 64   ;;  %vm319_vm3 = vcmask (!%p188_p2), 1043456   ;;  %vm721_vm4 = vcmask (!%p188_p2), 523264   ;;  %vm723_vm5 = vcmask (!%p188_p2), 785408  }
   0x7   : > { %857 = vmatprep.subr.bf16.mxu1 (!%p188_p2), %v939_v0  ;;  %859 = vmatprep.mubr.msk.bf16.mxu1 (!%p188_p2), %vm940_vm0, %v939_v0  ;;  %v250_v7 = vshrl.u32 (!%p188_p2), %v249_v4, 7  ;;  %s943_s29 = smov (!%p188_p2), 32  }
   0x9   : > { %v251_v9 = vsub.s32 (!%p188_p2), 0, %v250_v7 }
   0xd   : > { %s1082_s16 = smov (!%p222_p3, %s813_s16), 1 }
   0xe   : > { %s983_s17 = sshll.u32 %s1082_s16, 2  ;;  %s236_s26 = scalar_lea.vmem %s1079_s3, %s1082_s16 }
   0xf   : > { %s229_s20 = scalar_lea.vmem %s1077_s1, %s983_s17  ;;  %s225_s23 = scalar_lea.vmem %s1076_s0, %s983_s17  ;;  %v245_v5 = vld [vmem:[%s236_s26] sm:$0x1] }
  0x10   : > { %v243_v1 = vld [vmem:[%s229_s20] sm:$0xf]  ;;  %v246_v6 = vsub.f32 1.0, %v245_v5  ;;  %s233_s6 = scalar_lea.vmem %s1078_s2, %s983_s17  ;;  %s240_s9 = scalar_lea.vmem %s1080_s4, %s983_s17 }
  0x11   : > { %v259_v2 = vsel %vm254_vm1, %v243_v1, 0  ;;  %v242_v3 = vld [vmem:[%s225_s23] sm:$0xf]  ;;  %v825_v18 = vcombine.low %v243_v1, %v243_v1 }
  0x12   : > { %852 = vmatpush3.bf16.xpose.msra.mxu0 %v259_v2  ;;  %v247_v8 = vmul.f32 -1e+09, %v246_v6  ;;  %v824_v19 = vcombine.low %v242_v3, %v242_v3  ;;  %v1015_v25 = vld [vmem:[%s233_s6] sm:$0xf] }
  0x13   : > { %869 = vmatprep.subr.bf16.mxu0 %v939_v0  ;;  %371 = vrot.lane.b32.xlu1 %v825_v18, %s941_s27  ;;  %v321_v26 = vsel %vm319_vm3, %v1015_v25, 0 }
  0x14   : > { %v1001_v10 = vrot.slane %v247_v8, %v251_v9  ;;  %858 = vmatpush3.bf16.msra.mxu1 %v321_v26 }
  0x15   : > { %863 = vmatprep.subr.bf16.mxu1 %v939_v0 }
  0x17   : > { %366 = vrot.lane.b32.xlu1 %v824_v19, %s941_s27 }
  0x19   : > { %854 = vmatmul.mubr.msk.bf16.vlgmr.msra.gmra.mrb[0].mxu0 %vm254_vm1, %v242_v3 }
  0x1a   : > { %871 = vmatprep.mubr.msk.bf16.mxu0 %vm940_vm0, %v939_v0 }
  0x1b   : > { %484 = vrot.lane.b32.xlu1 %v824_v19, %s942_s28 }
  0x1f   : > { %598 = vrot.lane.b32.xlu1 %v825_v18, %s943_s29 }
  0x23   : > { %596 = vrot.lane.b32.xlu1 %v824_v19, %s943_s29 }
  0x85   : > { %v372_v29 = vpop.permute.xlu1 %371 }
  0x86   : > { %v377_v31 = vsel %vm254_vm1, %v372_v29, 0 }
  0x89   : > { %v367_v33 = vpop.permute.xlu1 %366 }
  0x8d   : > { %v485_v35 = vpop.permute.xlu1 %484 }
  0x91   : > { %v599_v37 = vpop.permute.xlu1 %598 }
  0x92   : > { %v604_v38 = vsel %vm254_vm1, %v599_v37, 0 }
  0x95   : > { %v597_v39 = vpop.permute.xlu1 %596 }
  0xec   : > { %v295_v11 = vpop.f32.mrb[0].mxu0 }
  0xed   : > { %v301_v12 = vmul.f32 0.17677669, %v295_v11  ;;  %v855_v13 = vpop.f32.mrb[1].mxu0 }
  0xee   : > { %v298_v14 = vpop.f32.mrb[2].mxu0 }
  0xef   : > { %v856_v15 = vpop.f32.mrb[3].mxu0  ;;  %v302_v16 = vadd.f32 %v301_v12, %v1001_v10 }
  0xf1   : > { %v304_v17 = vsel %vm303_vm2, %v302_v16, -inf }
  0xf2   : > { %305 = vmax.xlane.f32.xlu0 %v304_v17 }
 0x17f   : > { %v306_v20 = vpop.xlane.xlu0 %305 }
 0x180   : > { %v307_v21 = vsub.f32 %v302_v16, %v306_v20 }
 0x182   : > { %v308_v22 = vmul.f32 1.442695, %v307_v21 }
 0x184   : > { %915 = vpow2.f32 %v308_v22 }
 0x18e   : > { %v916_v23 = vpop.eup %915 }
 0x18f   : > { %v310_v24 = vsel %vm303_vm2, %v916_v23, 0.0 }
 0x190   : > { %311 = vadd.xlane.f32.xlu0 %v310_v24 }
 0x1a6   : > { %486 = vrot.lane.b32.xlu0 %v825_v18, %s942_s28 }
 0x21d   : > { %v312_v27 = vpop.xlane.xlu0 %311 }
 0x21e   : > { %917 = vrcp.f32 %v312_v27 }
 0x221   : > { %v487_v34 = vpop.permute.xlu0 %486 }
 0x222   : > { %v492_v36 = vsel %vm254_vm1, %v487_v34, 0 }
 0x228   : > { %v918_v28 = vpop.eup %917 }
 0x229   : > { %v314_v30 = vmul.f32 %v918_v28, %v916_v23 }
 0x22b   : > { %v315_v32 = vpack.c.bf16 %v314_v30, %v314_v30 }
 0x22d   : > { %860 = vmatmul.mubr.msk.bf16.vlgmr.msra.gmra.mrb[0].mxu1 %vm303_vm2, %v315_v32 }
 0x22e   : > { %864 = vmatpush3.bf16.xpose.msra.mxu1 %v377_v31  ;;  %865 = vmatprep.mubr.msk.bf16.mxu1 %vm940_vm0, %v939_v0 }
 0x22f   : > { %875 = vmatprep.subr.bf16.mxu1 %v939_v0 }
 0x235   : > { %866 = vmatmul.mubr.msk.bf16.vlgmr.msra.gmra.mrb[4].mxu1 %vm254_vm1, %v367_v33 }
 0x236   : > { %876 = vmatpush3.bf16.xpose.msra.mxu1 %v492_v36  ;;  %877 = vmatprep.mubr.msk.bf16.mxu1 %vm940_vm0, %v939_v0 }
 0x237   : > { %887 = vmatprep.subr.bf16.mxu1 %v939_v0 }
 0x23d   : > { %878 = vmatmul.mubr.msk.bf16.vlgmr.msra.gmra.mrb[8].mxu1 %vm254_vm1, %v485_v35 }
 0x23e   : > { %888 = vmatpush3.bf16.xpose.msra.mxu1 %v604_v38  ;;  %889 = vmatprep.mubr.msk.bf16.mxu1 %vm940_vm0, %v939_v0 }
 0x245   : > { %890 = vmatmul.mubr.msk.bf16.vlgmr.msra.gmra.mrb[12].mxu1 %vm254_vm1, %v597_v39 }
 0x300   : > { %v1036_v40 = vpop.f32.mrb[0].mxu1 }
 0x301   : > { %v861_v41 = vpop.f32.mrb[1].mxu1 }
 0x302   : > { %v360_v42 = vpop.f32.mrb[2].mxu1 }
 0x303   : > { %v862_v43 = vpop.f32.mrb[3].mxu1 }
 0x308   : > { %v413_v44 = vpop.f32.mrb[4].mxu1 }
 0x309   : > { %v419_v45 = vmul.f32 0.17677669, %v413_v44  ;;  %v867_v46 = vpop.f32.mrb[5].mxu1 }
 0x30a   : > { %v416_v47 = vpop.f32.mrb[6].mxu1 }
 0x30b   : > { %v868_v48 = vpop.f32.mrb[7].mxu1  ;;  %v420_v49 = vadd.f32 %v419_v45, %v1001_v10 }
 0x30d   : > { %v421_v50 = vsel %vm303_vm2, %v420_v49, -inf }
 0x30e   : > { %422 = vmax.xlane.f32.xlu1 %v421_v50 }
 0x310   : > { %v528_v51 = vpop.f32.mrb[8].mxu1 }
 0x311   : > { %v534_v52 = vmul.f32 0.17677669, %v528_v51  ;;  %v879_v53 = vpop.f32.mrb[9].mxu1 }
 0x312   : > { %v531_v54 = vpop.f32.mrb[10].mxu1 }
 0x313   : > { %v535_v55 = vadd.f32 %v534_v52, %v1001_v10  ;;  %v880_v56 = vpop.f32.mrb[11].mxu1 }
 0x315   : > { %v536_v57 = vsel %vm303_vm2, %v535_v55, -inf }
 0x316   : > { %537 = vmax.xlane.f32.xlu0 %v536_v57 }
 0x318   : > { %v640_v58 = vpop.f32.mrb[12].mxu1 }
 0x319   : > { %v646_v59 = vmul.f32 0.17677669, %v640_v58  ;;  %v891_v60 = vpop.f32.mrb[13].mxu1 }
 0x31a   : > { %v643_v61 = vpop.f32.mrb[14].mxu1 }
 0x31b   : > { %v647_v62 = vadd.f32 %v646_v59, %v1001_v10  ;;  %v892_v63 = vpop.f32.mrb[15].mxu1  ;;  %v827_v10 = vcombine.low %v1015_v25, %v1015_v25 }
 0x31d   : > { %v648_v1 = vsel %vm303_vm2, %v647_v62, -inf }
 0x31e   : > { %649 = vmax.xlane.f32.xlu1 %v648_v1 }
 0x39b   : > { %v423_v2 = vpop.xlane.xlu1 %422 }
 0x39c   : > { %v424_v3 = vsub.f32 %v420_v49, %v423_v2 }
 0x39e   : > { %v425_v4 = vmul.f32 1.442695, %v424_v3 }
 0x3a0   : > { %919 = vpow2.f32 %v425_v4 }
 0x3a3   : > { %v538_v5 = vpop.xlane.xlu0 %537 }
 0x3a4   : > { %v539_v6 = vsub.f32 %v535_v55, %v538_v5 }
 0x3a6   : > { %v540_v7 = vmul.f32 1.442695, %v539_v6 }
 0x3a8   : > { %921 = vpow2.f32 %v540_v7 }
 0x3aa   : > { %v920_v8 = vpop.eup %919 }
 0x3ab   : > { %v427_v9 = vsel %vm303_vm2, %v920_v8, 0.0  ;;  %v650_v13 = vpop.xlane.xlu1 %649 }
 0x3ac   : > { %428 = vadd.xlane.f32.xlu1 %v427_v9  ;;  %v651_v14 = vsub.f32 %v647_v62, %v650_v13 }
 0x3ae   : > { %v652_v15 = vmul.f32 1.442695, %v651_v14 }
 0x3b0   : > { %923 = vpow2.f32 %v652_v15 }
 0x3b2   : > { %v922_v11 = vpop.eup %921 }
 0x3b3   : > { %v542_v12 = vsel %vm303_vm2, %v922_v11, 0.0 }
 0x3b4   : > { %543 = vadd.xlane.f32.xlu0 %v542_v12 }
 0x3ba   : > { %v924_v16 = vpop.eup %923 }
 0x3bb   : > { %v654_v17 = vsel %vm303_vm2, %v924_v16, 0.0 }
 0x3bd   : > { %548 = vrot.lane.b32.xlu1 %v827_v10, %s942_s28 }
 0x3ca   : > { %436 = vrot.lane.b32.xlu0 %v827_v10, %s941_s27 }
 0x3e1   : > { %655 = vadd.xlane.f32.xlu1 %v654_v17 }
 0x3f2   : > { %660 = vrot.lane.b32.xlu1 %v827_v10, %s943_s29 }
 0x439   : > { %v429_v18 = vpop.xlane.xlu1 %428 }
 0x43a   : > { %925 = vrcp.f32 %v429_v18 }
 0x43d   : > { %v549_v24 = vpop.permute.xlu1 %548 }
 0x43e   : > { %v554_v26 = vsel %vm319_vm3, %v549_v24, 0 }
 0x441   : > { %v544_v19 = vpop.xlane.xlu0 %543 }
 0x442   : > { %927 = vrcp.f32 %v544_v19 }
 0x444   : > { %v926_v20 = vpop.eup %925 }
 0x445   : > { %v431_v21 = vmul.f32 %v926_v20, %v920_v8  ;;  %v437_v22 = vpop.permute.xlu0 %436 }
 0x446   : > { %v442_v23 = vsel %vm319_vm3, %v437_v22, 0 }
 0x447   : > { %870 = vmatpush3.bf16.msra.mxu0 %v442_v23  ;;  %v432_v25 = vpack.c.bf16 %v431_v21, %v431_v21 }
 0x448   : > { %881 = vmatprep.subr.bf16.mxu0 %v939_v0 }
 0x44a   : > { %872 = vmatmul.mubr.msk.bf16.vlgmr.msra.gmra.mrb[4].mxu0 %vm303_vm2, %v432_v25 }
 0x44b   : > { %882 = vmatpush3.bf16.msra.mxu0 %v554_v26  ;;  %883 = vmatprep.mubr.msk.bf16.mxu0 %vm940_vm0, %v939_v0 }
 0x44c   : > { %v928_v27 = vpop.eup %927  ;;  %893 = vmatprep.subr.bf16.mxu0 %v939_v0 }
 0x44d   : > { %v546_v28 = vmul.f32 %v928_v27, %v922_v11 }
 0x44f   : > { %v547_v29 = vpack.c.bf16 %v546_v28, %v546_v28 }
 0x452   : > { %884 = vmatmul.mubr.msk.bf16.vlgmr.msra.gmra.mrb[8].mxu0 %vm303_vm2, %v547_v29 }
 0x453   : > { %895 = vmatprep.mubr.msk.bf16.mxu0 %vm940_vm0, %v939_v0 }
 0x46e   : > { %v656_v30 = vpop.xlane.xlu1 %655 }
 0x46f   : > { %929 = vrcp.f32 %v656_v30 }
 0x472   : > { %v661_v31 = vpop.permute.xlu1 %660 }
 0x473   : > { %v666_v32 = vsel %vm319_vm3, %v661_v31, 0 }
 0x474   : > { %894 = vmatpush3.bf16.msra.mxu0 %v666_v32 }
 0x479   : > { %v930_v33 = vpop.eup %929 }
 0x47a   : > { %v658_v34 = vmul.f32 %v930_v33, %v924_v16 }
 0x47c   : > { %v659_v35 = vpack.c.bf16 %v658_v34, %v658_v34 }
 0x47e   : > { %896 = vmatmul.mubr.msk.bf16.vlgmr.msra.gmra.mrb[12].mxu0 %vm303_vm2, %v659_v35 }
 0x51d   : > { %v478_v36 = vpop.f32.mrb[4].mxu0 }
 0x51e   : > { %709 = vrot.lane.b32.xlu0 %v478_v36, %s943_s29  ;;  %v873_v37 = vpop.f32.mrb[5].mxu0 }
 0x51f   : > { %v481_v38 = vpop.f32.mrb[6].mxu0 }
 0x520   : > { %v874_v39 = vpop.f32.mrb[7].mxu0 }
 0x525   : > { %v590_v41 = vpop.f32.mrb[8].mxu0 }
 0x526   : > { %713 = vrot.lane.b32.xlu1 %v590_v41, %s942_s28  ;;  %v885_v0 = vpop.f32.mrb[9].mxu0 }
 0x527   : > { %v593_v42 = vpop.f32.mrb[10].mxu0 }
 0x528   : > { %v886_v43 = vpop.f32.mrb[11].mxu0 }
 0x551   : > { %v702_v44 = vpop.f32.mrb[12].mxu0 }
 0x552   : > { %717 = vrot.lane.b32.xlu0 %v702_v44, %s941_s27  ;;  %v897_v45 = vpop.f32.mrb[13].mxu0 }
 0x553   : > { %v705_v46 = vpop.f32.mrb[14].mxu0 }
 0x554   : > { %v898_v47 = vpop.f32.mrb[15].mxu0 }
 0x590   : > { %v710_v48 = vpop.permute.xlu0 %709 }
 0x591   : > { %v720_v50 = vsel %vm254_vm1, %v1036_v40, %v710_v48 }
 0x598   : > { %v714_v49 = vpop.permute.xlu1 %713 }
 0x599   : > { %v722_v51 = vsel %vm721_vm4, %v720_v50, %v714_v49 }
 0x5c4   : > { %v718_v52 = vpop.permute.xlu0 %717 }
 0x5c5   : > { %v724_v53 = vsel %vm723_vm5, %v722_v51, %v718_v52 }
 0x5c6   : > { %v725_v54 = vpack.c.bf16 %v724_v53, %v724_v53 }
 0x5c8   : > { %726 = vst [vmem:[%s240_s9] sm:$0xf] %v725_v54 }
 0x5c9 PF: > { %s14_s15 = sadd.s32 1, %s937_s15  }
 0x5ca   : > { %p11_p4 = scmp.ge.s32.totalorder %s14_s15, 4  }
 0x5cc   :  { %13 = sbr.rel (!%p11_p4) target bundleno = 1 (0x1), region = 75 }

// kernel: bart_with_pointer_generator.36
= control target key start
LH: loop header
LB: loop body
LE: loop exit
PB: predicated region body
PF: predicated region fallthrough
CT: control target
= control target key end

     0   :  { %s933_s21 = smov 0   ;;  %s935_s22 = smov 0   ;;  %s1040_s0 = inlined_call_operand.vmem [shape: bf16[16,512], index: 0, kind: input, shape index: {}]   ;;  %s1041_s1 = inlined_call_operand.vmem [shape: bf16[512,128], index: 1, kind: input, shape index: {}]   ;;  %s1042_s2 = inlined_call_operand.vmem [shape: f32[1,128], index: 2, kind: input, shape index: {}]   ;;  %s1043_s3 = inlined_call_operand.vmem [shape: bf16[16,128], index: 3, kind: input, shape index: {}]   ;;  %s1044_s4 = inlined_call_operand.vmem [shape: f32[1,128], index: 4, kind: input, shape index: {}]   ;;  %s1045_s5 = inlined_call_operand.vmem [shape: f32[1,128], index: 5, kind: input, shape index: {}]   ;;  %s1046_s6 = inlined_call_operand.vmem [shape: bf16[16,128], index: 6, kind: output, shape index: {}]  }
   0x1   :  { %s937_s23 = smov 0   ;;  %s939_s24 = smov 0  }
   0x2   :  { %s941_s25 = smov 0  }
   0x3 LB: > { %s25_s26 = sadd.s32 1, %s891_s24  ;;  %p44_p1 = scmp.ne.s32.totalorder %s883_s22, %s879_s21  ;;  %s895_s25 = sphi %s941_s25, %s16_s25   ;;  %s891_s24 = sphi %s939_s24, %s1050_s24   ;;  %s887_s23 = sphi %s937_s23, %s1049_s23   ;;  %s883_s22 = sphi %s935_s22, %s1048_s22   ;;  %s879_s21 = sphi %s933_s21, %s1047_s21  }
   0x4   : > { %p26_p0 = scmp.ge.s32.totalorder %s25_s26, 2  ;;  %p45_p2 = scmp.eq.s32.totalorder %s895_s25, 0 }
   0x5   : > { %s37_s28 = sadd.s32 1, %s883_s22  ;;  %p722_p5 = scmp.ge.s32.totalorder %s895_s25, 2 }
   0x6   : > { %s1052_s26 = smov (%p26_p0, %s25_s26), 0  ;;  %p46_p3 = por %p45_p2, %p44_p1 }
   0x7   : > { %s33_s27 = ssub.s32 %s891_s24, %s1052_s26  ;;  %229 = sbr.rel (%p722_p5) target bundleno = 21 (0x15), region = 32 }
   0x8   : > { %p35_p4 = scmp.eq.s32.totalorder %s33_s27, 0 }
   0xa   : > { %s968_s29 = scalar_select %p35_p4, %s883_s22, %s37_s28  }
   0xe   : > { %232 = sbr.rel (!%p46_p3) target bundleno = 21 (0x15), region = 36  ;;  %s234_s30 = sand.u32 (%p46_p3), 1, %s883_s22  }
   0xf   : > { %s759_s7 = sshll.u32 (%p46_p3), %s891_s24, 3  ;;  %s723_s8 = sshll.u32 (%p46_p3), %s234_s30, 4 }
  0x10   : > { %s242_s11 = scalar_lea.vmem (%p46_p3), %s1040_s0, %s759_s7  ;;  %s236_s12 = scalar_lea.vmem (%p46_p3), [#allocation3], %s723_s8 }
  0x11   : > { %v272_v0 = vld [vmem:[%s242_s11] sm:$0xff] (%p46_p3)  ;;  %v274_v1 = vld [vmem:[%s242_s11 + $0x10] sm:$0xff] (%p46_p3) }
  0x12   : > { %273 = vst [vmem:[%s236_s12] sm:$0xff] (%p46_p3), %v272_v0  ;;  %275 = vst [vmem:[%s236_s12 + $0x8] sm:$0xff] (%p46_p3), %v274_v1 }
  0x15 PF: > { %p726_p6 = scmp.ge.s32.totalorder %s895_s25, 1  ;;  %p289_p7 = scmp.lt.s32.totalorder %s895_s25, 3 }
  0x17   : > { %p290_p8 = pnand %p726_p6, %p289_p7 }
  0x18   : > { %s296_s13 = sand.u32 (!%p290_p8), 1, %s879_s21   ;;  %s728_s14 = sshll.u32 (!%p290_p8), %s887_s23, 5 }
  0x19   : > { %293 = sbr.rel (%p290_p8) target bundleno = 619 (0x26b), region = 78  ;;  %s980_s15 = sshll.u32 (!%p290_p8), %s296_s13, 4 }
  0x1a   : > { %p338_p9 = scmp.lt.s32.totalorder (!%p290_p8), %s728_s14, 63  ;;  %s298_s20 = scalar_lea.vmem (!%p290_p8), [#allocation3], %s980_s15 }
  0x1b   : > { %p730_p10 = scmp.ne.s32.totalorder (!%p290_p8), %s887_s23, 0 }
  0x20   : > { %s1054_s14 = smov (!%p338_p9, %s728_s14), 63  ;;  %359 = sbr.rel (%p730_p10) target bundleno = 39 (0x27), region = 86 }
  0x21   : > { %s729_s16 = sshll.u32 %s1054_s14, 2  ;;  %v897_v2 = vmov (!%p730_p10), 0.0  }
  0x22   : > { %s985_s19 = scalar_lea.vmem %s1041_s1, %s729_s16  ;;  %360 = vst [vmem:[#allocation2] sm:$0xff] (!%p730_p10), %v897_v2  ;;  %361 = vst [vmem:[#allocation2 + $0x8] sm:$0xff] (!%p730_p10), %v897_v2 }
  0x27 PF: > { %v834_v3 = vld [vmem:[%s985_s19 + $0x40] sm:$0xff]   ;;  %v836_v5 = vld [vmem:[%s985_s19 + $0x48] sm:$0xff]   ;;  %v838_v7 = vld [vmem:[%s985_s19 + $0x50] sm:$0xff]   ;;  %p749_p11 = scmp.ne.s32.totalorder %s887_s23, 1 }
  0x28   : > { %v835_v4 = vld [vmem:[%s985_s19] sm:$0xff]   ;;  %771 = vmatprep.subr.bf16.mxu0 %v834_v3  ;;  %v837_v6 = vld [vmem:[%s985_s19 + $0x8] sm:$0xff]   ;;  %v839_v8 = vld [vmem:[%s985_s19 + $0x10] sm:$0xff]  }
  0x29   : > { %772 = vmatpush3.bf16.msra.mxu0 %v835_v4  ;;  %v840_v9 = vld [vmem:[%s985_s19 + $0x58] sm:$0xff]   ;;  %v842_v11 = vld [vmem:[%s985_s19 + $0x60] sm:$0xff]   ;;  %v844_v13 = vld [vmem:[%s985_s19 + $0x68] sm:$0xff]  }
  0x2a   : > { %773 = vmatprep.subr.bf16.mxu0 %v836_v5  ;;  %v841_v10 = vld [vmem:[%s985_s19 + $0x18] sm:$0xff]   ;;  %v843_v12 = vld [vmem:[%s985_s19 + $0x20] sm:$0xff]   ;;  %v845_v15 = vld [vmem:[%s985_s19 + $0x28] sm:$0xff]  }
  0x2b   : > { %v852_v14 = vld [vmem:[%s298_s20 + $0x4] ss:$8 sps:$4 sm:$0xff]   ;;  %v850_v20 = vld [vmem:[%s298_s20] ss:$8 sps:$4 sm:$0xff]  }
  0x2c   : > { %536 = vmatprep.mubr.bf16.mxu0 %v852_v14  ;;  %v846_v16 = vld [vmem:[%s985_s19 + $0x70] sm:$0xff]   ;;  %v848_v18 = vld [vmem:[%s985_s19 + $0x78] sm:$0xff]   ;;  %v362_v22 = vld [vmem:[#allocation2] sm:$0xff] }
  0x2d   : > { %774 = vmatpush3.bf16.msra.mxu0 %v837_v6  ;;  %v847_v17 = vld [vmem:[%s985_s19 + $0x30] sm:$0xff]   ;;  %v849_v19 = vld [vmem:[%s985_s19 + $0x38] sm:$0xff]   ;;  %v363_v26 = vld [vmem:[#allocation2 + $0x8] sm:$0xff] }
  0x2e   : > { %775 = vmatprep.subr.bf16.mxu0 %v838_v7  ;;  %v750_v32 = vld [vmem:[%s1042_s2] ss:$0 sm:$0xff] (!%p749_p11) }
  0x2f   : > { %v763_v33 = vld [vmem:[%s1043_s3] sm:$0xff] (!%p749_p11)  }
  0x30   : > { %v764_v35 = vunpack.c.l.bf16 (!%p749_p11), %v763_v33  ;;  %v765_v37 = vunpack.c.h.bf16 (!%p749_p11), %v763_v33  ;;  %v751_v57 = vld [vmem:[%s1044_s4] ss:$0 sm:$0xff] (!%p749_p11) }
  0x31   : > { %776 = vmatpush3.bf16.msra.mxu0 %v839_v8  ;;  %v752_v61 = vld [vmem:[%s1045_s5] ss:$0 sm:$0xff] (!%p749_p11) }
  0x32   : > { %777 = vmatprep.subr.bf16.mxu0 %v840_v9 }
  0x35   : > { %778 = vmatpush3.bf16.msra.mxu0 %v841_v10 }
  0x36   : > { %779 = vmatprep.subr.bf16.mxu0 %v842_v11 }
  0x39   : > { %780 = vmatpush3.bf16.msra.mxu0 %v843_v12 }
  0x3a   : > { %781 = vmatprep.subr.bf16.mxu0 %v844_v13 }
  0x3d   : > { %782 = vmatpush3.bf16.msra.mxu0 %v845_v15 }
  0x3e   : > { %783 = vmatprep.subr.bf16.mxu0 %v846_v16 }
  0x41   : > { %784 = vmatpush3.bf16.msra.mxu0 %v847_v17 }
  0x42   : > { %785 = vmatprep.subr.bf16.mxu0 %v848_v18 }
  0x45   : > { %786 = vmatpush3.bf16.msra.mxu0 %v849_v19 }
  0x48   : > { %537 = vmatmul.mubr.bf16.vlgmr.msra.gmra.mrb[0].mxu0 %v850_v20 }
 0x11b   : > { %v787_v21 = vpop.f32.mrb[0].mxu0 }
 0x11c   : > { %v788_v23 = vpop.f32.mrb[1].mxu0 }
 0x11d   : > { %v789_v24 = vadd.f32 %v788_v23, %v787_v21  ;;  %v790_v25 = vpop.f32.mrb[2].mxu0  ;;  %552 = sbr.rel (%p749_p11) target bundleno = 619 (0x26b), region = 90 }
 0x11e   : > { %v791_v27 = vpop.f32.mrb[3].mxu0 }
 0x11f   : > { %v545_v28 = vadd.f32 %v789_v24, %v362_v22  ;;  %v792_v29 = vadd.f32 %v791_v27, %v790_v25 }
 0x121   : > { %547 = vst [vmem:[#allocation2] sm:$0xff] %v545_v28  ;;  %v546_v30 = vadd.f32 %v792_v29, %v363_v26 }
 0x123   : > { %548 = vst [vmem:[#allocation2 + $0x8] sm:$0xff] %v546_v30 }
 0x128   : > { %v553_v31 = vld [vmem:[#allocation2] sm:$0xff] }
 0x129   : > { %v562_v34 = vadd.f32 %v750_v32, %v553_v31 }
 0x12a   : > { %v554_v36 = vld [vmem:[#allocation2 + $0x8] sm:$0xff] }
 0x12b   : > { %v563_v38 = vadd.f32 %v750_v32, %v554_v36  ;;  %v568_v39 = vadd.f32 %v764_v35, %v562_v34 }
 0x12d   : > { %570 = vadd.xlane.f32.xlu0 %v568_v39  ;;  %v569_v40 = vadd.f32 %v765_v37, %v563_v38 }
 0x131   : > { %572 = vadd.xlane.f32.xlu0 %v569_v40 }
 0x1ba   : > { %v571_v41 = vpop.xlane.xlu0 %570 }
 0x1bb   : > { %v575_v42 = vmul.f32 0.0078125, %v571_v41 }
 0x1bd   : > { %v577_v43 = vsub.f32 %v568_v39, %v575_v42 }
 0x1be   : > { %v573_v44 = vpop.xlane.xlu0 %572 }
 0x1bf   : > { %v576_v45 = vmul.f32 0.0078125, %v573_v44  ;;  %v579_v46 = vmul.f32 %v577_v43, %v577_v43 }
 0x1c1   : > { %v578_v47 = vsub.f32 %v569_v40, %v576_v45  ;;  %581 = vadd.xlane.f32.xlu1 %v579_v46 }
 0x1c3   : > { %v580_v48 = vmul.f32 %v578_v47, %v578_v47 }
 0x1c5   : > { %583 = vadd.xlane.f32.xlu1 %v580_v48 }
 0x24e   : > { %v582_v49 = vpop.xlane.xlu1 %581 }
 0x24f   : > { %v585_v50 = vmul.f32 0.0078125, %v582_v49 }
 0x251   : > { %v587_v51 = vadd.f32 1e-05, %v585_v50 }
 0x252   : > { %v584_v52 = vpop.xlane.xlu1 %583 }
 0x253   : > { %853 = vrsqrt.f32 %v587_v51  ;;  %v586_v53 = vmul.f32 0.0078125, %v584_v52 }
 0x255   : > { %v588_v54 = vadd.f32 1e-05, %v586_v53 }
 0x257   : > { %855 = vrsqrt.f32 %v588_v54 }
 0x25d   : > { %v854_v55 = vpop.eup %853 }
 0x25e   : > { %v591_v56 = vmul.f32 %v854_v55, %v577_v43 }
 0x260   : > { %v600_v59 = vmul.f32 %v751_v57, %v591_v56 }
 0x261   : > { %v856_v58 = vpop.eup %855 }
 0x262   : > { %v592_v60 = vmul.f32 %v856_v58, %v578_v47  ;;  %v609_v63 = vadd.f32 %v752_v61, %v600_v59 }
 0x264   : > { %v601_v62 = vmul.f32 %v751_v57, %v592_v60 }
 0x266   : > { %v610_v0 = vadd.f32 %v752_v61, %v601_v62 }
 0x268   : > { %v769_v1 = vpack.c.bf16 %v610_v0, %v609_v63 }
 0x26a   : > { %770 = vst [vmem:[%s1046_s6] sm:$0xff] %v769_v1  }
 0x26b PF: > { %s16_s25 = sadd.s32 1, %s895_s25   ;;  %s1047_s21 = smov %s883_s22 }
 0x26c   : > { %p13_p12 = scmp.ge.s32.totalorder %s16_s25, 4   ;;  %s1048_s22 = smov %s968_s29 }
 0x26d   : > { %s1049_s23 = smov %s891_s24  ;;  %s1050_s24 = smov %s1052_s26 }
 0x26e   :  { %15 = sbr.rel (!%p13_p12) target bundleno = 3 (0x3), region = 131 }

// kernel: bart_with_pointer_generator.56
= control target key start
LH: loop header
LB: loop body
LE: loop exit
PB: predicated region body
PF: predicated region fallthrough
CT: control target
= control target key end

     0   :  { %v270_v1 = vmov 0   ;;  %v191_v18 = vlaneseq  ;;  %s351_s1 = inlined_call_operand.vmem [shape: bf16[128,256], index: 1, kind: input, shape index: {}]   ;;  %s352_s0 = inlined_call_operand.vmem [shape: bf16[16,128], index: 0, kind: input, shape index: {}]   ;;  %s353_s2 = inlined_call_operand.vmem [shape: f32[1,256], index: 2, kind: input, shape index: {}]   ;;  %s354_s3 = inlined_call_operand.vmem [shape: bf16[16,256], index: 3, kind: output, shape index: {}]  }
   0x1   :  { %v245_v0 = vld [vmem:[%s351_s1 + $0x4] ss:$8 sps:$4 sm:$0xff]   ;;  %163 = vmatprep.mubr.bf16.mxu0 %v270_v1  ;;  %v247_v2 = vld [vmem:[%s351_s1] ss:$8 sps:$4 sm:$0xff]   ;;  %v248_v3 = vld [vmem:[%s351_s1 + $0x14] ss:$8 sps:$4 sm:$0xff]  }
   0x2   :  { %131 = vmatprep.subr.bf16.mxu0 %v245_v0  ;;  %v250_v4 = vld [vmem:[%s351_s1 + $0x10] ss:$8 sps:$4 sm:$0xff]   ;;  %v251_v5 = vld [vmem:[%s351_s1 + $0x24] ss:$8 sps:$4 sm:$0xff]   ;;  %v253_v6 = vld [vmem:[%s351_s1 + $0x20] ss:$8 sps:$4 sm:$0xff]  }
   0x3   :  { %132 = vmatpush1.bf16.msra.mxu0 %v247_v2  ;;  %v254_v7 = vld [vmem:[%s351_s1 + $0x34] ss:$8 sps:$4 sm:$0xff]   ;;  %v256_v8 = vld [vmem:[%s351_s1 + $0x30] ss:$8 sps:$4 sm:$0xff]   ;;  %v257_v9 = vld [vmem:[%s351_s1 + $0x44] ss:$8 sps:$4 sm:$0xff]  }
   0x4   :  { %133 = vmatprep.subr.bf16.mxu0 %v248_v3  ;;  %v259_v10 = vld [vmem:[%s351_s1 + $0x40] ss:$8 sps:$4 sm:$0xff]   ;;  %v260_v11 = vld [vmem:[%s351_s1 + $0x54] ss:$8 sps:$4 sm:$0xff]   ;;  %v262_v12 = vld [vmem:[%s351_s1 + $0x50] ss:$8 sps:$4 sm:$0xff]  }
   0x5   :  { %v263_v13 = vld [vmem:[%s351_s1 + $0x64] ss:$8 sps:$4 sm:$0xff]   ;;  %v265_v14 = vld [vmem:[%s351_s1 + $0x60] ss:$8 sps:$4 sm:$0xff]   ;;  %v266_v15 = vld [vmem:[%s351_s1 + $0x74] ss:$8 sps:$4 sm:$0xff]  }
   0x6   :  { %v268_v16 = vld [vmem:[%s351_s1 + $0x70] ss:$8 sps:$4 sm:$0xff]   ;;  %v269_v17 = vld [vmem:[%s352_s0] sm:$0xff]   ;;  %v192_v19 = vshrl.u32 %v191_v18, 7 }
   0x7   :  { %134 = vmatpush1.bf16.msra.mxu0 %v250_v4  ;;  %v189_v21 = vld [vmem:[%s353_s2] sm:$0x3] }
   0x8   :  { %135 = vmatprep.subr.bf16.mxu0 %v251_v5  ;;  %v193_v20 = vsub.s32 0, %v192_v19  ;;  %v197_v22 = vsub.s32 1, %v192_v19 }
   0xa   :  { %v194_v23 = vrot.slane %v189_v21, %v193_v20  ;;  %v198_v24 = vrot.slane %v189_v21, %v197_v22 }
   0xb   :  { %136 = vmatpush1.bf16.msra.mxu0 %v253_v6 }
   0xc   :  { %137 = vmatprep.subr.bf16.mxu0 %v254_v7 }
   0xf   :  { %138 = vmatpush1.bf16.msra.mxu0 %v256_v8 }
  0x10   :  { %139 = vmatprep.subr.bf16.mxu0 %v257_v9 }
  0x13   :  { %140 = vmatpush1.bf16.msra.mxu0 %v259_v10 }
  0x14   :  { %141 = vmatprep.subr.bf16.mxu0 %v260_v11 }
  0x17   :  { %142 = vmatpush1.bf16.msra.mxu0 %v262_v12 }
  0x18   :  { %143 = vmatprep.subr.bf16.mxu0 %v263_v13 }
  0x1b   :  { %144 = vmatpush1.bf16.msra.mxu0 %v265_v14 }
  0x1c   :  { %145 = vmatprep.subr.bf16.mxu0 %v266_v15 }
  0x1f   :  { %146 = vmatpush1.bf16.msra.mxu0 %v268_v16 }
  0x22   :  { %164 = vmatmul.mubr.bf16.vlgmr.msra.gmra.mrb[0].mxu0 %v269_v17 }
  0xf5   :  { %v165_v25 = vpop.f32.mrb[0].mxu0 }
  0xf6   :  { %v201_v26 = vadd.f32 %v194_v23, %v165_v25  ;;  %v167_v27 = vpop.f32.mrb[1].mxu0 }
  0xf7   :  { %v202_v28 = vadd.f32 %v198_v24, %v167_v27  ;;  %v169_v29 = vpop.f32.mrb[2].mxu0 }
  0xf8   :  { %v203_v30 = vadd.f32 %v194_v23, %v169_v29  ;;  %v171_v31 = vpop.f32.mrb[3].mxu0 }
  0xf9   :  { %v242_v32 = vpack.c.bf16 %v202_v28, %v201_v26  ;;  %v204_v33 = vadd.f32 %v198_v24, %v171_v31 }
  0xfb   :  { %217 = vst [vmem:[%s354_s3] sm:$0xff] %v242_v32  ;;  %v243_v34 = vpack.c.bf16 %v204_v33, %v203_v30 }
  0xfd   :  { %218 = vst [vmem:[%s354_s3 + $0x8] sm:$0xff] %v243_v34 }

// kernel: bart_with_pointer_generator.61
= control target key start
LH: loop header
LB: loop body
LE: loop exit
PB: predicated region body
PF: predicated region fallthrough
CT: control target
= control target key end

     0   :  { %7 = vsyncpa [#allocation4], 0  ;;  %s1162_s0 = inlined_call_operand.vmem [shape: bf16[16,128], index: 0, kind: input, shape index: {}]   ;;  %s1163_s1 = inlined_call_operand.vmem [shape: bf16[1024,128], index: 1, kind: input, shape index: {}]   ;;  %s1164_s2 = inlined_call_operand.hbm [shape: f32[16,1024], index: 2, kind: output, shape index: {}]  }
   0x1   :  { %9 = vsyncpa [#allocation4 + $0x1], 0  ;;  %s1005_s9 = smov 0   ;;  %s1007_s10 = smov 0  }
   0x2   :  { %s1009_s11 = smov 0   ;;  %s1011_s12 = smov 0  }
   0x3   :  { %s1013_s13 = smov 0   ;;  %s1015_s14 = smov 0  }
   0x4 LB: > { %s731_s15 = sadd.s32 4294967295, %s984_s14   ;;  %s732_s16 = sadd.s32 4294967294, %s984_s14   ;;  %s984_s14 = sphi %s1015_s14, %s15_s14   ;;  %s980_s13 = sphi %s1013_s13, %s1171_s13   ;;  %s976_s12 = sphi %s1011_s12, %s1170_s12   ;;  %s972_s11 = sphi %s1009_s11, %s1169_s11   ;;  %s968_s10 = sphi %s1007_s10, %s1168_s10   ;;  %s964_s9 = sphi %s1005_s9, %s1167_s9  }
   0x5   : > { %s30_s17 = sadd.s32 1, %s980_s13  ;;  %s99_s18 = sadd.s32 1, %s972_s11 }
   0x6   : > { %p32_p0 = scmp.ge.s32.totalorder %s30_s17, 2  ;;  %p109_p1 = scmp.ne.s32.totalorder %s972_s11, %s968_s10 }
   0x7   : > { %p110_p2 = scmp.eq.s32.totalorder %s731_s15, 1  ;;  %p115_p3 = scmp.ne.s32.totalorder %s968_s10, %s964_s9 }
   0x8   : > { %s1173_s17 = smov (%p32_p0, %s30_s17), 0  ;;  %p116_p5 = scmp.eq.s32.totalorder %s732_s16, 1 }
   0x9   : > { %p1045_p4 = por %p110_p2, %p109_p1  ;;  %s95_s20 = ssub.s32 %s980_s13, %s1173_s17 }
   0xa   : > { %p736_p6 = scmp.ge.s32.totalorder %s984_s14, 1  ;;  %p97_p7 = scmp.eq.s32.totalorder %s95_s20, 0 }
   0xb   : > { %p1052_p8 = por %p116_p5, %p115_p3  ;;  %p158_p9 = scmp.lt.s32.totalorder %s984_s14, 3 }
   0xc   : > { %s1058_s22 = scalar_select %p97_p7, %s972_s11, %s99_s18  }
   0xd   : > { %p159_p10 = pnand %p736_p6, %p158_p9 }
   0xe   : > { %s738_s23 = sshll.u32 (!%p159_p10), %s976_s12, 6  ;;  %v1064_v0 = vld [vmem:[%s1162_s0] sm:$0xff] (!%p159_p10)   ;;  %s188_s30 = sand.u32 (!%p159_p10), 1, %s968_s10  }
   0xf   : > { %162 = sbr.rel (%p159_p10) target bundleno = 323 (0x143), region = 28  ;;  %p201_p11 = scmp.lt.s32.totalorder (!%p159_p10), %s738_s23, 127  ;;  %795 = vmatprep.mubr.bf16.mxu0 (!%p159_p10), %v1064_v0  ;;  %813 = vmatprep.mubr.bf16.mxu1 (!%p159_p10), %v1064_v0 }
  0x10   : > { %s737_s3 = sshll.u32 (!%p159_p10), %s188_s30, 6  ;;  %s778_s6 = sshll.u32 (!%p159_p10), %s976_s12, 9 }
  0x11   : > { %s190_s4 = scalar_lea.vmem (!%p159_p10), [#allocation3], %s737_s3  ;;  %s1114_s15 = scalar_lea.hbm (!%p159_p10), %s1164_s2, %s778_s6 }
  0x12   : > { %s634_s5 = sshll.u32 (!%p159_p10), %s190_s4, 4  ;;  %s1116_s12 = scalar_lea.sflag (!%p159_p10), [#allocation4], %s188_s30  ;;  %s1109_s5 = int_to_ptr.vmem [resolvable:$true] %s634_s5 }
  0x13   : > { %s906_s16 = scalar_lea.vmem (!%p159_p10), %s1109_s5, 1024  ;;  %s986_s18 = smov (!%p159_p10), [#allocation3]  }
  0x14   : > { %p907_p12 = scmp.ne.s32.totalorder (!%p159_p10), %s1109_s5, %s906_s16  ;;  %s910_s20 = sshll.u32 (!%p159_p10), %s986_s18, 4  ;;  %s911_s20 = int_to_ptr.vmem [resolvable:$false] %s910_s20 }
  0x15   : > { %p913_p1 = scmp.lt.s32.totalorder (!%p159_p10), %s1109_s5, %s911_s20 }
  0x16   : > { %s1175_s23 = smov (!%p201_p11, %s738_s23), 127  ;;  %p908_p13 = pnand %p907_p12, %p1045_p4 }
  0x17   : > { %s739_s26 = sshll.u32 %s1175_s23, 2  ;;  %s912_s23 = scalar_lea.vmem %s911_s20, 2048 }
  0x18   : > { %s1071_s29 = scalar_lea.vmem %s1163_s1, %s739_s26  ;;  %p909_p0 = pneg %p908_p13 }
  0x19   : > { %v873_v1 = vld [vmem:[%s1071_s29 + $0x40] sm:$0xff]   ;;  %v877_v5 = vld [vmem:[%s1071_s29 + $0x48] sm:$0xff]   ;;  %v881_v9 = vld [vmem:[%s1071_s29 + $0x50] sm:$0xff]   ;;  %p914_p2 = scmp.lt.s32.totalorder %s912_s23, %s906_s16 }
  0x1a   : > { %v874_v2 = vld [vmem:[%s1071_s29 + $0xc0] sm:$0xff]   ;;  %779 = vmatprep.subr.bf16.mxu0 %v873_v1  ;;  %v878_v6 = vld [vmem:[%s1071_s29 + $0xc8] sm:$0xff]   ;;  %v882_v10 = vld [vmem:[%s1071_s29 + $0xd0] sm:$0xff]  }
  0x1b   : > { %v875_v3 = vld [vmem:[%s1071_s29] sm:$0xff]   ;;  %797 = vmatprep.subr.bf16.mxu1 %v874_v2  ;;  %v879_v7 = vld [vmem:[%s1071_s29 + $0x8] sm:$0xff]   ;;  %v883_v11 = vld [vmem:[%s1071_s29 + $0x10] sm:$0xff]   ;;  %p915_p3 = por %p914_p2, %p913_p1 }
  0x1c   : > { %v876_v4 = vld [vmem:[%s1071_s29 + $0x80] sm:$0xff]   ;;  %780 = vmatpush3.bf16.xpose.msra.mxu0 %v875_v3  ;;  %v880_v8 = vld [vmem:[%s1071_s29 + $0x88] sm:$0xff]   ;;  %v884_v12 = vld [vmem:[%s1071_s29 + $0x90] sm:$0xff]  }
  0x1d   : > { %798 = vmatpush3.bf16.xpose.msra.mxu1 %v876_v4  ;;  %781 = vmatprep.subr.bf16.mxu0 %v877_v5  ;;  %v885_v13 = vld [vmem:[%s1071_s29 + $0x58] sm:$0xff]   ;;  %v889_v17 = vld [vmem:[%s1071_s29 + $0x60] sm:$0xff]   ;;  %v893_v21 = vld [vmem:[%s1071_s29 + $0x68] sm:$0xff]   ;;  %p916_p5 = pnand %p915_p3, %p909_p0 }
  0x1e   : > { %799 = vmatprep.subr.bf16.mxu1 %v878_v6  ;;  %v886_v14 = vld [vmem:[%s1071_s29 + $0xd8] sm:$0xff]   ;;  %v890_v18 = vld [vmem:[%s1071_s29 + $0xe0] sm:$0xff]   ;;  %v894_v22 = vld [vmem:[%s1071_s29 + $0xe8] sm:$0xff]  }
  0x1f   : > { %v887_v15 = vld [vmem:[%s1071_s29 + $0x18] sm:$0xff]   ;;  %v891_v19 = vld [vmem:[%s1071_s29 + $0x20] sm:$0xff]   ;;  %v895_v23 = vld [vmem:[%s1071_s29 + $0x28] sm:$0xff]  }
  0x20   : > { %v888_v16 = vld [vmem:[%s1071_s29 + $0x98] sm:$0xff]   ;;  %v892_v20 = vld [vmem:[%s1071_s29 + $0xa0] sm:$0xff]   ;;  %v896_v24 = vld [vmem:[%s1071_s29 + $0xa8] sm:$0xff]  }
  0x21   : > { %v897_v25 = vld [vmem:[%s1071_s29 + $0x70] sm:$0xff]   ;;  %v901_v29 = vld [vmem:[%s1071_s29 + $0x78] sm:$0xff]  }
  0x22   : > { %v898_v26 = vld [vmem:[%s1071_s29 + $0xf0] sm:$0xff]   ;;  %v902_v30 = vld [vmem:[%s1071_s29 + $0xf8] sm:$0xff]  }
  0x23   : > { %v899_v27 = vld [vmem:[%s1071_s29 + $0x30] sm:$0xff]   ;;  %v903_v31 = vld [vmem:[%s1071_s29 + $0x38] sm:$0xff]  }
  0x24   : > { %782 = vmatpush3.bf16.xpose.msra.mxu0 %v879_v7  ;;  %v900_v28 = vld [vmem:[%s1071_s29 + $0xb0] sm:$0xff]   ;;  %v904_v32 = vld [vmem:[%s1071_s29 + $0xb8] sm:$0xff]  }
  0x25   : > { %800 = vmatpush3.bf16.xpose.msra.mxu1 %v880_v8  ;;  %783 = vmatprep.subr.bf16.mxu0 %v881_v9 }
  0x26   : > { %801 = vmatprep.subr.bf16.mxu1 %v882_v10 }
  0x2c   : > { %784 = vmatpush3.bf16.xpose.msra.mxu0 %v883_v11 }
  0x2d   : > { %802 = vmatpush3.bf16.xpose.msra.mxu1 %v884_v12  ;;  %785 = vmatprep.subr.bf16.mxu0 %v885_v13 }
  0x2e   : > { %803 = vmatprep.subr.bf16.mxu1 %v886_v14 }
  0x34   : > { %786 = vmatpush3.bf16.xpose.msra.mxu0 %v887_v15 }
  0x35   : > { %804 = vmatpush3.bf16.xpose.msra.mxu1 %v888_v16  ;;  %787 = vmatprep.subr.bf16.mxu0 %v889_v17 }
  0x36   : > { %805 = vmatprep.subr.bf16.mxu1 %v890_v18 }
  0x3c   : > { %788 = vmatpush3.bf16.xpose.msra.mxu0 %v891_v19 }
  0x3d   : > { %806 = vmatpush3.bf16.xpose.msra.mxu1 %v892_v20  ;;  %789 = vmatprep.subr.bf16.mxu0 %v893_v21 }
  0x3e   : > { %807 = vmatprep.subr.bf16.mxu1 %v894_v22 }
  0x44   : > { %790 = vmatpush3.bf16.xpose.msra.mxu0 %v895_v23 }
  0x45   : > { %808 = vmatpush3.bf16.xpose.msra.mxu1 %v896_v24  ;;  %791 = vmatprep.subr.bf16.mxu0 %v897_v25 }
  0x46   : > { %809 = vmatprep.subr.bf16.mxu1 %v898_v26 }
  0x4c   : > { %792 = vmatpush3.bf16.xpose.msra.mxu0 %v899_v27 }
  0x4d   : > { %810 = vmatpush3.bf16.xpose.msra.mxu1 %v900_v28  ;;  %793 = vmatprep.subr.bf16.mxu0 %v901_v29 }
  0x4e   : > { %811 = vmatprep.subr.bf16.mxu1 %v902_v30 }
  0x54   : > { %794 = vmatpush3.bf16.xpose.msra.mxu0 %v903_v31 }
  0x55   : > { %812 = vmatpush3.bf16.xpose.msra.mxu1 %v904_v32 }
  0x5b   : > { %796 = vmatmul.mubr.bf16.vlgmr.msra.gmra.mrb[0].mxu0 %v1064_v0 }
  0x5c   : > { %814 = vmatmul.mubr.bf16.vlgmr.msra.gmra.mrb[0].mxu1 %v1064_v0 }
 0x12e   : > { %v530_v33 = vpop.f32.mrb[0].mxu0 }
 0x12f   : > { %609 = vst [vmem:[%s190_s4] sm:$0xff] %v530_v33  ;;  %v573_v34 = vpop.f32.mrb[0].mxu1  ;;  %v532_v35 = vpop.f32.mrb[1].mxu0 }
 0x130   : > { %611 = vst [vmem:[%s190_s4 + $0x10] sm:$0xff] %v573_v34  ;;  %610 = vst [vmem:[%s190_s4 + $0x8] sm:$0xff] %v532_v35  ;;  %v575_v36 = vpop.f32.mrb[1].mxu1  ;;  %v534_v37 = vpop.f32.mrb[2].mxu0 }
 0x131   : > { %612 = vst [vmem:[%s190_s4 + $0x18] sm:$0xff] %v575_v36  ;;  %613 = vst [vmem:[%s190_s4 + $0x20] sm:$0xff] %v534_v37  ;;  %v577_v38 = vpop.f32.mrb[2].mxu1  ;;  %v536_v39 = vpop.f32.mrb[3].mxu0 }
 0x132   : > { %615 = vst [vmem:[%s190_s4 + $0x30] sm:$0xff] %v577_v38  ;;  %614 = vst [vmem:[%s190_s4 + $0x28] sm:$0xff] %v536_v39  ;;  %v579_v40 = vpop.f32.mrb[3].mxu1 }
 0x133   : > { %616 = vst [vmem:[%s190_s4 + $0x38] sm:$0xff] %v579_v40 }
 0x134   : > { %919 = shalt.err (!%p916_p5)
}
 0x135   : > { %s920_s24 = scalar_lea.hbm %s1114_s15, 1024  ;;  %s924_s27 = scalar_lea.hbm %s1164_s2, 2048 }
 0x136   : > { %p921_p6 = scmp.ne.s32.totalorder %s1114_s15, %s920_s24  ;;  %p925_p10 = scmp.lt.u32.totalorder %s1114_s15, %s1164_s2 }
 0x137   : > { %p926_p11 = scmp.lt.u32.totalorder %s924_s27, %s920_s24  ;;  %p928_p13 = scmp.lt.u32.totalorder %s920_s24, %s1114_s15 }
 0x138   : > { %p922_p7 = pnand %p921_p6, %p1045_p4 }
 0x139   : > { %p927_p12 = por %p926_p11, %p925_p10 }
 0x13a   : > { %p923_p9 = pneg %p922_p7 }
 0x13b   : > { %p929_p0 = por %p928_p13, %p927_p12 }
 0x13d   : > { %p930_p1 = pnand %p929_p0, %p923_p9 }
 0x13f   : > { %933 = shalt.err (!%p930_p1)
}
 0x140   : > { %s987_s30 = smov 512   ;;  %s988_s3 = smov 1024  }
 0x141   : > { %s989_s4 = smov 32  }
 0x142   : > { %815 = dma.vmem_to_hbm [thread:$0]  (%p1045_p4), %s1109_s5, 1024, %s1114_s15, %s1116_s12, %s987_s30, %s988_s3, %s989_s4  }
 0x143 PF: > { %p821_p2 = scmp.ge.s32.totalorder %s984_s14, 2  ;;  %s649_s6 = sand.u32 1, %s964_s9  }
 0x144   : > { %s650_s7 = scalar_lea.sflag [#allocation4], %s649_s6 }
 0x145   : > { %p818_p3 = pnand %p821_p2, %p1052_p8 }
 0x147   : > { %959 = dma.done.wait (!%p818_p3), %s650_s7, 1024  }
 0x148   : > { %961 = vsyncadd (!%p818_p3), %s650_s7, 4294966272  ;;  %s15_s14 = sadd.s32 1, %s984_s14   ;;  %s1167_s9 = smov %s968_s10 }
 0x149   : > { %p12_p5 = scmp.ge.s32.totalorder %s15_s14, 4   ;;  %s1168_s10 = smov %s972_s11 }
 0x14a   : > { %s1169_s11 = smov %s1058_s22  ;;  %s1170_s12 = smov %s980_s13 }
 0x14b   : > { %s1171_s13 = smov %s1173_s17  ;;  %14 = sbr.rel (!%p12_p5) target bundleno = 4 (0x4), region = 74 }
 0x152   :  { %655 = vsyncpa [#allocation4], 1 }
 0x153   :  { %657 = vsyncpa [#allocation4 + $0x1], 1 }

</bundles_post_ra>
